<compile_context>
chip_gen: v7x
topology: tpu7x:2x2x1
jax: 0.10.0
libtpu: 0.0.40
codegen_flags: <defaults>
</compile_context>

<pallas_src>
import jax
import jax.numpy as jnp
from jax.experimental import pallas as pl
from jax.experimental.pallas import tpu as pltpu


def _round_up(x, m):
    return (x + m - 1) // m * m


def _pick_tile_rows(H, W, cout_p):
    """Largest TH in {32,16,8,...} dividing H whose f32 accumulators stay small."""
    budget = 8 * 1024 * 1024          # conv1 + conv2 f32 accumulators per grid step
    for th in (32, 16, 8, 4, 2, 1):
        if H % th == 0 and (2 * th + 2) * W * cout_p * 4 <= budget:
            return th
    return 1


def _double_conv_kernel(x_hbm, w1_ref, s1_ref, b1_ref, w2_ref, s2_ref, b2_ref,
                        o_ref, xbuf, hbuf, sem):
    # x_hbm : (N, H+4, Wx, Cin_p)  bf16 in HBM (rows padded by 2, cols by >=1)
    # w1_ref: (3, 3*Cin_p, Cout_p) bf16   (ky, kx*Cin_p + cin, cout)
    # w2_ref: (3, 3*Cout_p, Cout_p) bf16
    # s/b   : (1, Cout_p) f32  folded BN scale / shift (shift includes conv bias)
    # o_ref : (1, TH, W, Cout_p)  bf16 -- one row tile of one batch element
    # xbuf  : (2, TH+4, Wx, Cin_p) bf16 VMEM double buffer for the input row slab
    # hbuf  : (TH+2, Wx, Cout_p)   bf16 VMEM staging for conv1 output (+halos)
    _, TH, W, cout_p = o_ref.shape
    cin_p = xbuf.shape[3]
    rows1 = TH + 2                    # conv1 rows: tile + 1-row halo needed by conv2

    n = pl.program_id(0)
    t = pl.program_id(1)
    T = pl.num_programs(1)
    slot = t % 2

    def tile_copy(tt, s):
        # rows [tt*TH, tt*TH + TH + 4) of the (H+4)-row padded image of batch n
        return pltpu.make_async_copy(
            x_hbm.at[n, pl.ds(tt * TH, TH + 4)], xbuf.at[s], sem.at[s])

    # Prime the pipeline once per batch element (t == 0), then prefetch tile t+1
    # while computing tile t.  Keyed on t only -> safe under megacore sharding of N.
    @pl.when(t == 0)
    def _prime():
        tile_copy(0, 0).start()

    tile_copy(t, slot).wait()

    @pl.when(t + 1 < T)
    def _prefetch():
        tile_copy(t + 1, 1 - slot).start()

    xcur = xbuf.at[slot]

    # ---- conv1 + BN1 + ReLU over rows1 rows (kx folded into K: 3 wide matmuls) ---
    acc1 = jnp.zeros((rows1 * W, cout_p), jnp.float32)
    for ky in range(3):
        xk = xcur[ky:ky + rows1, :, :]                      # (rows1, Wx, Cin_p)
        patch = jnp.concatenate([xk[:, dx:dx + W, :] for dx in range(3)], axis=-1)
        acc1 += jnp.dot(patch.reshape(rows1 * W, 3 * cin_p), w1_ref[ky],
                        preferred_element_type=jnp.float32)
    h = jnp.maximum(acc1 * s1_ref[...] + b1_ref[...], 0.0)  # f32 epilogue
    h = h.astype(jnp.bfloat16).reshape(rows1, W, cout_p)    # bf16 MXU operand

    # Stage conv1 output in VMEM with a zero column halo (conv2's 'same' padding).
    zcol = jnp.zeros((rows1, 1, cout_p), jnp.bfloat16)
    hbuf[:, 0:1, :] = zcol
    hbuf[:, W + 1:W + 2, :] = zcol
    hbuf[:, 1:W + 1, :] = h

    # Row halos falling outside the image are conv2's zero padding, not conv1
    # outputs -> zero them only on the first / last row tile.
    zrow = jnp.zeros((1, hbuf.shape[1], cout_p), jnp.bfloat16)

    @pl.when(t == 0)
    def _zero_top():
        hbuf[0:1, :, :] = zrow

    @pl.when(t == T - 1)
    def _zero_bot():
        hbuf[rows1 - 1:rows1, :, :] = zrow

    # ---- conv2 + BN2 + ReLU over the TH output rows ------------------------------
    acc2 = jnp.zeros((TH * W, cout_p), jnp.float32)
    for ky in range(3):
        hk = hbuf[ky:ky + TH, :, :]                         # (TH, Wx, Cout_p)
        patch = jnp.concatenate([hk[:, dx:dx + W, :] for dx in range(3)], axis=-1)
        acc2 += jnp.dot(patch.reshape(TH * W, 3 * cout_p), w2_ref[ky],
                        preferred_element_type=jnp.float32)
    y = jnp.maximum(acc2 * s2_ref[...] + b2_ref[...], 0.0)
    o_ref[...] = y.astype(o_ref.dtype).reshape(1, TH, W, cout_p)


@jax.jit
def double_conv(x_nchw, w1_oihw, bias1, g1, beta1, mean1, var1,
                w2_oihw, bias2, g2, beta2, mean2, var2, eps=1e-5):
    N, Cin, H, W = x_nchw.shape
    Cout = w1_oihw.shape[0]

    cin_p = _round_up(Cin, 128)                       # lane-dense channels
    # Fill the full 256-wide MXU on v6e/v7x when Cout > 128 (128 is native on v5e).
    cout_p = _round_up(Cout, 128) if Cout <= 128 else _round_up(Cout, 256)

    TH = _pick_tile_rows(H, W, cout_p)                # output rows per grid step
    T = H // TH
    Wx = _round_up(W + 2, 8)                          # pre-padded width (col halo)

    # NCHW -> NHWC in bf16 (cast BEFORE transpose/pad to halve wrapper HBM traffic);
    # pad 2 zero rows top/bottom (conv1 halo for conv2's row halo), 1 zero column
    # left (+ alignment columns right), and channels to a 128 multiple.
    x_nhwc = jnp.transpose(x_nchw.astype(jnp.bfloat16), (0, 2, 3, 1))
    x_pad = jnp.pad(x_nhwc, ((0, 0), (2, 2), (1, Wx - W - 1), (0, cin_p - Cin)))

    # Weights OIHW -> (ky, kx, ci, co), zero-pad channels, fuse kx into the K dim.
    def prep_w(w, ci, ci_p):
        w = jnp.transpose(w.astype(jnp.float32), (2, 3, 1, 0))     # (ky, kx, ci, co)
        w = jnp.pad(w, ((0, 0), (0, 0), (0, ci_p - ci), (0, cout_p - Cout)))
        return w.reshape(3, 3 * ci_p, cout_p).astype(jnp.bfloat16)

    w1f = prep_w(w1_oihw, Cin, cin_p)
    w2f = prep_w(w2_oihw, Cout, cout_p)

    # Fold conv bias + eval-mode BatchNorm into per-channel scale/shift (f32).
    def fold(gamma, beta, mean, var, bias):
        s = gamma / jnp.sqrt(var + eps)
        b = beta + (bias - mean) * s
        s = jnp.pad(s, (0, cout_p - Cout)).reshape(1, cout_p).astype(jnp.float32)
        b = jnp.pad(b, (0, cout_p - Cout)).reshape(1, cout_p).astype(jnp.float32)
        return s, b

    s1, b1 = fold(g1, beta1, mean1, var1, bias1)
    s2, b2 = fold(g2, beta2, mean2, var2, bias2)

    out_nhwc = pl.pallas_call(
        _double_conv_kernel,
        out_shape=jax.ShapeDtypeStruct((N, H, W, cout_p), jnp.bfloat16),
        grid_spec=pltpu.PrefetchScalarGridSpec(
            num_scalar_prefetch=0,
            grid=(N, T),
            in_specs=[
                # x stays in HBM; the kernel DMAs (TH+4, Wx, cin_p) row slabs itself.
                pl.BlockSpec(memory_space=pl.ANY),
                pl.BlockSpec((3, 3 * cin_p, cout_p), lambda n, t: (0, 0, 0)),
                pl.BlockSpec((1, cout_p), lambda n, t: (0, 0)),
                pl.BlockSpec((1, cout_p), lambda n, t: (0, 0)),
                pl.BlockSpec((3, 3 * cout_p, cout_p), lambda n, t: (0, 0, 0)),
                pl.BlockSpec((1, cout_p), lambda n, t: (0, 0)),
                pl.BlockSpec((1, cout_p), lambda n, t: (0, 0)),
            ],
            out_specs=pl.BlockSpec((1, TH, W, cout_p), lambda n, t: (n, t, 0, 0)),
            scratch_shapes=[
                pltpu.VMEM((2, TH + 4, Wx, cin_p), jnp.bfloat16),   # input slabs
                pltpu.VMEM((TH + 2, Wx, cout_p), jnp.bfloat16),     # conv1 output
                pltpu.SemaphoreType.DMA((2,)),
            ],
        ),
        compiler_params=pltpu.CompilerParams(
            # N sharded across cores; the row-tile axis must stay sequential per n
            # (manual DMA priming / prefetch is keyed on t).
            dimension_semantics=("parallel", "arbitrary"),
            # 48 MiB fits v7x's 64 MiB VMEM; could be raised to ~100 MiB on v5e/v6e.
            vmem_limit_bytes=48 * 1024 * 1024,
        ),
    )(x_pad, w1f, s1, b1, w2f, s2, b2)

    # Drop channel padding, back to NCHW f32 (module interface).  In a fused UNet
    # pipeline the next layer would consume out_nhwc (bf16 NHWC) directly.
    return jnp.transpose(out_nhwc[..., :Cout], (0, 3, 1, 2)).astype(jnp.float32)


def _reference(x, w1, b1, g1, be1, m1, v1, w2, b2, g2, be2, m2, v2,
               eps=1e-5, quantize_bf16=False):
    """Pure-JAX DoubleConv (eval-mode BN). With quantize_bf16=True it mirrors the
    kernel's quantization points: bf16 conv inputs (activations + weights), f32
    accumulation / BN / ReLU, bf16 intermediate and bf16 output."""
    q = ((lambda a: a.astype(jnp.bfloat16).astype(jnp.float32))
         if quantize_bf16 else (lambda a: a))

    def conv(x, w):
        return jax.lax.conv_general_dilated(
            q(x), q(w), window_strides=(1, 1), padding=((1, 1), (1, 1)),
            dimension_numbers=('NCHW', 'OIHW', 'NCHW'),
            preferred_element_type=jnp.float32)

    def bn(y, b, g, be, m, v):
        y = y + b[None, :, None, None]
        return (y - m[None, :, None, None]) / jnp.sqrt(v[None, :, None, None] + eps) \
            * g[None, :, None, None] + be[None, :, None, None]

    h = jnp.maximum(bn(conv(x, w1), b1, g1, be1, m1, v1), 0.0)
    h = q(h)
    out = jnp.maximum(bn(conv(h, w2), b2, g2, be2, m2, v2), 0.0)
    return q(out)


if __name__ == "__main__":
    key = jax.random.PRNGKey(0)
    N, Cin, Cout, H, W = 2, 4, 8, 16, 16

    ks = jax.random.split(key, 16)
    x = jax.random.normal(ks[0], (N, Cin, H, W), jnp.float32)

    # Conv weights / biases (PyTorch OIHW layout).
    w1 = jax.random.normal(ks[1], (Cout, Cin, 3, 3), jnp.float32) * 0.2
    bias1 = jax.random.normal(ks[2], (Cout,), jnp.float32) * 0.1
    w2 = jax.random.normal(ks[3], (Cout, Cout, 3, 3), jnp.float32) * 0.2
    bias2 = jax.random.normal(ks[4], (Cout,), jnp.float32) * 0.1

    # BatchNorm parameters / running stats (deterministic, non-trivial).
    g1 = 1.0 + 0.2 * jax.random.normal(ks[5], (Cout,), jnp.float32)
    beta1 = 0.1 * jax.random.normal(ks[6], (Cout,), jnp.float32)
    mean1 = 0.1 * jax.random.normal(ks[7], (Cout,), jnp.float32)
    var1 = 0.8 + 0.4 * jax.random.uniform(ks[8], (Cout,), jnp.float32)

    g2 = 1.0 + 0.2 * jax.random.normal(ks[9], (Cout,), jnp.float32)
    beta2 = 0.1 * jax.random.normal(ks[10], (Cout,), jnp.float32)
    mean2 = 0.1 * jax.random.normal(ks[11], (Cout,), jnp.float32)
    var2 = 0.8 + 0.4 * jax.random.uniform(ks[12], (Cout,), jnp.float32)

    out = double_conv(x, w1, bias1, g1, beta1, mean1, var1,
                      w2, bias2, g2, beta2, mean2, var2)
    out = jax.block_until_ready(out)
    assert out.shape == (N, Cout, H, W)

    # Tight check against a reference with the same bf16 quantization points.
    ref_q = _reference(x, w1, bias1, g1, beta1, mean1, var1,
                       w2, bias2, g2, beta2, mean2, var2, quantize_bf16=True)
    err_q = float(jnp.max(jnp.abs(out - ref_q)))
    assert jnp.allclose(out, ref_q, atol=2e-2, rtol=2e-2), err_q

    # Loose sanity check against full-f32 module semantics (bf16 rounding headroom).
    ref_f = _reference(x, w1, bias1, g1, beta1, mean1, var1,
                       w2, bias2, g2, beta2, mean2, var2, quantize_bf16=False)
    err_f = float(jnp.max(jnp.abs(out - ref_f)))
    assert jnp.allclose(out, ref_f, atol=0.2, rtol=0.1), err_f

    print("KERNEL_OK")
</pallas_src>

<mosaic_0001>
module attributes {stable_mosaic.version = 11 : i64} {
  func.func @_double_conv_kernel(%arg0: i32, %arg1: i32, %arg2: memref<2x20x24x128xbf16, #tpu.memory_space<any>>, %arg3: memref<3x384x128xbf16, #tpu.memory_space<vmem>>, %arg4: memref<1x128xf32, #tpu.memory_space<vmem>>, %arg5: memref<1x128xf32, #tpu.memory_space<vmem>>, %arg6: memref<3x384x128xbf16, #tpu.memory_space<vmem>>, %arg7: memref<1x128xf32, #tpu.memory_space<vmem>>, %arg8: memref<1x128xf32, #tpu.memory_space<vmem>>, %arg9: memref<1x16x16x128xbf16, #tpu.memory_space<vmem>>, %arg10: memref<2x20x24x128xbf16, #tpu.memory_space<vmem>>, %arg11: memref<18x24x128xbf16, #tpu.memory_space<vmem>>, %arg12: memref<2x!tpu.dma_semaphore, #tpu.memory_space<semaphore_mem>>) attributes {dimension_semantics = [#tpu.dimension_semantics<parallel>, #tpu.dimension_semantics<arbitrary>], iteration_bounds = array<i64: 2, 1>, scalar_prefetch = 0 : i64, scratch_operands = 3 : i64, tpu.core_type = #tpu.core_type<tc>, window_params = [{}, {pipeline_mode = #tpu.pipeline_mode<synchronous>, transform_indices = @transform_1, window_bounds = array<i64: 3, 384, 128>}, {pipeline_mode = #tpu.pipeline_mode<synchronous>, transform_indices = @transform_2, window_bounds = array<i64: 1, 128>}, {pipeline_mode = #tpu.pipeline_mode<synchronous>, transform_indices = @transform_3, window_bounds = array<i64: 1, 128>}, {pipeline_mode = #tpu.pipeline_mode<synchronous>, transform_indices = @transform_4, window_bounds = array<i64: 3, 384, 128>}, {pipeline_mode = #tpu.pipeline_mode<synchronous>, transform_indices = @transform_5, window_bounds = array<i64: 1, 128>}, {pipeline_mode = #tpu.pipeline_mode<synchronous>, transform_indices = @transform_6, window_bounds = array<i64: 1, 128>}, {transform_indices = @transform_7, window_bounds = array<i64: 1, 16, 16, 128>}]} {
    %c2_i32 = arith.constant 2 : i32
    %c0_i32 = arith.constant 0 : i32
    %0 = arith.cmpi eq, %c2_i32, %c0_i32 : i32
    %c1_i32 = arith.constant 1 : i32
    %1 = arith.select %0, %c1_i32, %c2_i32 : i32
    %2 = arith.remsi %arg1, %1 : i32
    %c0_i32_0 = arith.constant 0 : i32
    %3 = arith.cmpi ne, %2, %c0_i32_0 : i32
    %c0_i32_1 = arith.constant 0 : i32
    %4 = arith.cmpi slt, %2, %c0_i32_1 : i32
    %c0_i32_2 = arith.constant 0 : i32
    %5 = arith.cmpi slt, %1, %c0_i32_2 : i32
    %6 = arith.xori %4, %5 : i1
    %7 = arith.andi %6, %3 : i1
    %8 = arith.addi %2, %1 : i32
    %9 = arith.select %7, %8, %2 : i32
    %c0_i32_3 = arith.constant 0 : i32
    %10 = arith.cmpi eq, %arg1, %c0_i32_3 : i32
    %11 = arith.extui %10 : i1 to i32
    %c0_i32_4 = arith.constant 0 : i32
    %12 = arith.cmpi ne, %11, %c0_i32_4 : i32
    scf.if %12 {
      %c0_i32_90 = arith.constant 0 : i32
      %c0_i32_91 = arith.constant 0 : i32
      %c0_i32_92 = arith.constant 0 : i32
      %c0_i32_93 = arith.constant 0 : i32
      %c0_i32_94 = arith.constant 0 : i32
      %124 = tpu.memref_slice %arg2[%arg0, %c0_i32_92, %c0_i32_93, %c0_i32_94] : memref<2x20x24x128xbf16, #tpu.memory_space<any>> -> memref<1x20x24x128xbf16, #tpu.memory_space<any>>
      %125 = tpu.memref_squeeze %124 : memref<1x20x24x128xbf16, #tpu.memory_space<any>> -> memref<20x24x128xbf16, #tpu.memory_space<any>>
      %c0_i32_95 = arith.constant 0 : i32
      %c0_i32_96 = arith.constant 0 : i32
      %c0_i32_97 = arith.constant 0 : i32
      %126 = tpu.memref_slice %arg10[%c0_i32_90, %c0_i32_95, %c0_i32_96, %c0_i32_97] : memref<2x20x24x128xbf16, #tpu.memory_space<vmem>> -> memref<1x20x24x128xbf16, #tpu.memory_space<vmem>>
      %127 = tpu.memref_squeeze %126 : memref<1x20x24x128xbf16, #tpu.memory_space<vmem>> -> memref<20x24x128xbf16, #tpu.memory_space<vmem>>
      %128 = tpu.memref_slice %arg12[%c0_i32_91] : memref<2x!tpu.dma_semaphore, #tpu.memory_space<semaphore_mem>> -> memref<1x!tpu.dma_semaphore, #tpu.memory_space<semaphore_mem>>
      %129 = tpu.memref_squeeze %128 : memref<1x!tpu.dma_semaphore, #tpu.memory_space<semaphore_mem>> -> memref<!tpu.dma_semaphore, #tpu.memory_space<semaphore_mem>>
      tpu.enqueue_dma source(%125 : memref<20x24x128xbf16, #tpu.memory_space<any>>) target(%127 : memref<20x24x128xbf16, #tpu.memory_space<vmem>>) target_semaphore(%129 : memref<!tpu.dma_semaphore, #tpu.memory_space<semaphore_mem>>)
    } else {
    }
    %c16_i32 = arith.constant 16 : i32
    %13 = arith.muli %arg1, %c16_i32 : i32
    %c0_i32_5 = arith.constant 0 : i32
    %c0_i32_6 = arith.constant 0 : i32
    %14 = tpu.memref_slice %arg2[%arg0, %13, %c0_i32_5, %c0_i32_6] : memref<2x20x24x128xbf16, #tpu.memory_space<any>> -> memref<1x20x24x128xbf16, #tpu.memory_space<any>>
    %15 = tpu.memref_squeeze %14 : memref<1x20x24x128xbf16, #tpu.memory_space<any>> -> memref<20x24x128xbf16, #tpu.memory_space<any>>
    %c0_i32_7 = arith.constant 0 : i32
    %c0_i32_8 = arith.constant 0 : i32
    %c0_i32_9 = arith.constant 0 : i32
    %16 = tpu.memref_slice %arg10[%9, %c0_i32_7, %c0_i32_8, %c0_i32_9] : memref<2x20x24x128xbf16, #tpu.memory_space<vmem>> -> memref<1x20x24x128xbf16, #tpu.memory_space<vmem>>
    %17 = tpu.memref_squeeze %16 : memref<1x20x24x128xbf16, #tpu.memory_space<vmem>> -> memref<20x24x128xbf16, #tpu.memory_space<vmem>>
    %18 = tpu.memref_slice %arg12[%9] : memref<2x!tpu.dma_semaphore, #tpu.memory_space<semaphore_mem>> -> memref<1x!tpu.dma_semaphore, #tpu.memory_space<semaphore_mem>>
    %19 = tpu.memref_squeeze %18 : memref<1x!tpu.dma_semaphore, #tpu.memory_space<semaphore_mem>> -> memref<!tpu.dma_semaphore, #tpu.memory_space<semaphore_mem>>
    tpu.wait_dma2 semaphore(%19 : memref<!tpu.dma_semaphore, #tpu.memory_space<semaphore_mem>>) src(%15 : memref<20x24x128xbf16, #tpu.memory_space<any>>) dst(%17 : memref<20x24x128xbf16, #tpu.memory_space<vmem>>)
    %c1_i32_10 = arith.constant 1 : i32
    %20 = arith.addi %arg1, %c1_i32_10 : i32
    %c1_i32_11 = arith.constant 1 : i32
    %21 = arith.cmpi slt, %20, %c1_i32_11 : i32
    %22 = arith.extui %21 : i1 to i32
    %c0_i32_12 = arith.constant 0 : i32
    %23 = arith.cmpi ne, %22, %c0_i32_12 : i32
    scf.if %23 {
      %c1_i32_90 = arith.constant 1 : i32
      %124 = arith.addi %arg1, %c1_i32_90 : i32
      %c1_i32_91 = arith.constant 1 : i32
      %125 = arith.subi %c1_i32_91, %9 : i32
      %c16_i32_92 = arith.constant 16 : i32
      %126 = arith.muli %124, %c16_i32_92 : i32
      %c0_i32_93 = arith.constant 0 : i32
      %c0_i32_94 = arith.constant 0 : i32
      %127 = tpu.memref_slice %arg2[%arg0, %126, %c0_i32_93, %c0_i32_94] : memref<2x20x24x128xbf16, #tpu.memory_space<any>> -> memref<1x20x24x128xbf16, #tpu.memory_space<any>>
      %128 = tpu.memref_squeeze %127 : memref<1x20x24x128xbf16, #tpu.memory_space<any>> -> memref<20x24x128xbf16, #tpu.memory_space<any>>
      %c0_i32_95 = arith.constant 0 : i32
      %c0_i32_96 = arith.constant 0 : i32
      %c0_i32_97 = arith.constant 0 : i32
      %129 = tpu.memref_slice %arg10[%125, %c0_i32_95, %c0_i32_96, %c0_i32_97] : memref<2x20x24x128xbf16, #tpu.memory_space<vmem>> -> memref<1x20x24x128xbf16, #tpu.memory_space<vmem>>
      %130 = tpu.memref_squeeze %129 : memref<1x20x24x128xbf16, #tpu.memory_space<vmem>> -> memref<20x24x128xbf16, #tpu.memory_space<vmem>>
      %131 = tpu.memref_slice %arg12[%125] : memref<2x!tpu.dma_semaphore, #tpu.memory_space<semaphore_mem>> -> memref<1x!tpu.dma_semaphore, #tpu.memory_space<semaphore_mem>>
      %132 = tpu.memref_squeeze %131 : memref<1x!tpu.dma_semaphore, #tpu.memory_space<semaphore_mem>> -> memref<!tpu.dma_semaphore, #tpu.memory_space<semaphore_mem>>
      tpu.enqueue_dma source(%128 : memref<20x24x128xbf16, #tpu.memory_space<any>>) target(%130 : memref<20x24x128xbf16, #tpu.memory_space<vmem>>) target_semaphore(%132 : memref<!tpu.dma_semaphore, #tpu.memory_space<semaphore_mem>>)
    } else {
    }
    %cst = arith.constant 0.000000e+00 : f32
    %24 = vector.broadcast %cst : f32 to vector<288x128xf32>
    %c0_i32_13 = arith.constant 0 : i32
    %c0_i32_14 = arith.constant 0 : i32
    %c0_i32_15 = arith.constant 0 : i32
    %25 = tpu.memref_slice %arg10[%9, %c0_i32_13, %c0_i32_14, %c0_i32_15] : memref<2x20x24x128xbf16, #tpu.memory_space<vmem>> -> memref<1x20x24x128xbf16, #tpu.memory_space<vmem>>
    %26 = tpu.memref_squeeze %25 : memref<1x20x24x128xbf16, #tpu.memory_space<vmem>> -> memref<20x24x128xbf16, #tpu.memory_space<vmem>>
    %c0 = arith.constant 0 : index
    %c0_16 = arith.constant 0 : index
    %c0_17 = arith.constant 0 : index
    %27 = vector.load %26[%c0, %c0_16, %c0_17] : memref<20x24x128xbf16, #tpu.memory_space<vmem>>, vector<18x24x128xbf16>
    %28 = vector.extract_strided_slice %27 {offsets = [0, 0, 0], sizes = [18, 16, 128], strides = [1, 1, 1]} : vector<18x24x128xbf16> to vector<18x16x128xbf16>
    %29 = vector.extract_strided_slice %27 {offsets = [0, 1, 0], sizes = [18, 16, 128], strides = [1, 1, 1]} : vector<18x24x128xbf16> to vector<18x16x128xbf16>
    %30 = vector.extract_strided_slice %27 {offsets = [0, 2, 0], sizes = [18, 16, 128], strides = [1, 1, 1]} : vector<18x24x128xbf16> to vector<18x16x128xbf16>
    %31 = tpu.concatenate %28, %29, %30 in 2 : vector<18x16x128xbf16>, vector<18x16x128xbf16>, vector<18x16x128xbf16> -> vector<18x16x384xbf16>
    %32 = vector.shape_cast %31 : vector<18x16x384xbf16> to vector<288x384xbf16>
    %c0_18 = arith.constant 0 : index
    %c0_19 = arith.constant 0 : index
    %c0_20 = arith.constant 0 : index
    %33 = vector.load %arg3[%c0_18, %c0_19, %c0_20] : memref<3x384x128xbf16, #tpu.memory_space<vmem>>, vector<1x384x128xbf16>
    %34 = vector.shape_cast %33 : vector<1x384x128xbf16> to vector<384x128xbf16>
    %cst_21 = arith.constant dense<0.000000e+00> : vector<288x128xf32>
    %35 = tpu.matmul %32, %34, %cst_21 {dimension_numbers = #tpu.dot_dimension_numbers<[1], [0], [0], [1], [0, 0, 1, 1], [], []>} : vector<288x384xbf16>, vector<384x128xbf16>, vector<288x128xf32> -> vector<288x128xf32>
    %36 = arith.addf %24, %35 : vector<288x128xf32>
    %c0_i32_22 = arith.constant 0 : i32
    %c0_i32_23 = arith.constant 0 : i32
    %c0_i32_24 = arith.constant 0 : i32
    %37 = tpu.memref_slice %arg10[%9, %c0_i32_22, %c0_i32_23, %c0_i32_24] : memref<2x20x24x128xbf16, #tpu.memory_space<vmem>> -> memref<1x20x24x128xbf16, #tpu.memory_space<vmem>>
    %38 = tpu.memref_squeeze %37 : memref<1x20x24x128xbf16, #tpu.memory_space<vmem>> -> memref<20x24x128xbf16, #tpu.memory_space<vmem>>
    %c1 = arith.constant 1 : index
    %c0_25 = arith.constant 0 : index
    %c0_26 = arith.constant 0 : index
    %39 = vector.load %38[%c1, %c0_25, %c0_26] : memref<20x24x128xbf16, #tpu.memory_space<vmem>>, vector<18x24x128xbf16>
    %40 = vector.extract_strided_slice %39 {offsets = [0, 0, 0], sizes = [18, 16, 128], strides = [1, 1, 1]} : vector<18x24x128xbf16> to vector<18x16x128xbf16>
    %41 = vector.extract_strided_slice %39 {offsets = [0, 1, 0], sizes = [18, 16, 128], strides = [1, 1, 1]} : vector<18x24x128xbf16> to vector<18x16x128xbf16>
    %42 = vector.extract_strided_slice %39 {offsets = [0, 2, 0], sizes = [18, 16, 128], strides = [1, 1, 1]} : vector<18x24x128xbf16> to vector<18x16x128xbf16>
    %43 = tpu.concatenate %40, %41, %42 in 2 : vector<18x16x128xbf16>, vector<18x16x128xbf16>, vector<18x16x128xbf16> -> vector<18x16x384xbf16>
    %44 = vector.shape_cast %43 : vector<18x16x384xbf16> to vector<288x384xbf16>
    %c1_27 = arith.constant 1 : index
    %c0_28 = arith.constant 0 : index
    %c0_29 = arith.constant 0 : index
    %45 = vector.load %arg3[%c1_27, %c0_28, %c0_29] : memref<3x384x128xbf16, #tpu.memory_space<vmem>>, vector<1x384x128xbf16>
    %46 = vector.shape_cast %45 : vector<1x384x128xbf16> to vector<384x128xbf16>
    %cst_30 = arith.constant dense<0.000000e+00> : vector<288x128xf32>
    %47 = tpu.matmul %44, %46, %cst_30 {dimension_numbers = #tpu.dot_dimension_numbers<[1], [0], [0], [1], [0, 0, 1, 1], [], []>} : vector<288x384xbf16>, vector<384x128xbf16>, vector<288x128xf32> -> vector<288x128xf32>
    %48 = arith.addf %36, %47 : vector<288x128xf32>
    %c0_i32_31 = arith.constant 0 : i32
    %c0_i32_32 = arith.constant 0 : i32
    %c0_i32_33 = arith.constant 0 : i32
    %49 = tpu.memref_slice %arg10[%9, %c0_i32_31, %c0_i32_32, %c0_i32_33] : memref<2x20x24x128xbf16, #tpu.memory_space<vmem>> -> memref<1x20x24x128xbf16, #tpu.memory_space<vmem>>
    %50 = tpu.memref_squeeze %49 : memref<1x20x24x128xbf16, #tpu.memory_space<vmem>> -> memref<20x24x128xbf16, #tpu.memory_space<vmem>>
    %c2 = arith.constant 2 : index
    %c0_34 = arith.constant 0 : index
    %c0_35 = arith.constant 0 : index
    %51 = vector.load %50[%c2, %c0_34, %c0_35] : memref<20x24x128xbf16, #tpu.memory_space<vmem>>, vector<18x24x128xbf16>
    %52 = vector.extract_strided_slice %51 {offsets = [0, 0, 0], sizes = [18, 16, 128], strides = [1, 1, 1]} : vector<18x24x128xbf16> to vector<18x16x128xbf16>
    %53 = vector.extract_strided_slice %51 {offsets = [0, 1, 0], sizes = [18, 16, 128], strides = [1, 1, 1]} : vector<18x24x128xbf16> to vector<18x16x128xbf16>
    %54 = vector.extract_strided_slice %51 {offsets = [0, 2, 0], sizes = [18, 16, 128], strides = [1, 1, 1]} : vector<18x24x128xbf16> to vector<18x16x128xbf16>
    %55 = tpu.concatenate %52, %53, %54 in 2 : vector<18x16x128xbf16>, vector<18x16x128xbf16>, vector<18x16x128xbf16> -> vector<18x16x384xbf16>
    %56 = vector.shape_cast %55 : vector<18x16x384xbf16> to vector<288x384xbf16>
    %c2_36 = arith.constant 2 : index
    %c0_37 = arith.constant 0 : index
    %c0_38 = arith.constant 0 : index
    %57 = vector.load %arg3[%c2_36, %c0_37, %c0_38] : memref<3x384x128xbf16, #tpu.memory_space<vmem>>, vector<1x384x128xbf16>
    %58 = vector.shape_cast %57 : vector<1x384x128xbf16> to vector<384x128xbf16>
    %cst_39 = arith.constant dense<0.000000e+00> : vector<288x128xf32>
    %59 = tpu.matmul %56, %58, %cst_39 {dimension_numbers = #tpu.dot_dimension_numbers<[1], [0], [0], [1], [0, 0, 1, 1], [], []>} : vector<288x384xbf16>, vector<384x128xbf16>, vector<288x128xf32> -> vector<288x128xf32>
    %60 = arith.addf %48, %59 : vector<288x128xf32>
    %c0_40 = arith.constant 0 : index
    %c0_41 = arith.constant 0 : index
    %61 = vector.load %arg4[%c0_40, %c0_41] : memref<1x128xf32, #tpu.memory_space<vmem>>, vector<1x128xf32>
    %62 = vector.broadcast %61 : vector<1x128xf32> to vector<288x128xf32>
    %63 = arith.mulf %60, %62 : vector<288x128xf32>
    %c0_42 = arith.constant 0 : index
    %c0_43 = arith.constant 0 : index
    %64 = vector.load %arg5[%c0_42, %c0_43] : memref<1x128xf32, #tpu.memory_space<vmem>>, vector<1x128xf32>
    %65 = vector.broadcast %64 : vector<1x128xf32> to vector<288x128xf32>
    %66 = arith.addf %63, %65 : vector<288x128xf32>
    %cst_44 = arith.constant 0.000000e+00 : f32
    %67 = vector.broadcast %cst_44 : f32 to vector<288x128xf32>
    %68 = arith.maximumf %66, %67 : vector<288x128xf32>
    %69 = arith.truncf %68 : vector<288x128xf32> to vector<288x128xbf16>
    %70 = vector.shape_cast %69 : vector<288x128xbf16> to vector<18x16x128xbf16>
    %cst_45 = arith.constant 0.000000e+00 : bf16
    %71 = vector.broadcast %cst_45 : bf16 to vector<18x1x128xbf16>
    %c0_46 = arith.constant 0 : index
    %c0_47 = arith.constant 0 : index
    %c0_48 = arith.constant 0 : index
    %72 = vector.load %arg11[%c0_46, %c0_47, %c0_48] : memref<18x24x128xbf16, #tpu.memory_space<vmem>>, vector<18x1x128xbf16>
    tpu.vector_store %arg11[%c0_46, %c0_47, %c0_48], %71 {strides = array<i32>} : memref<18x24x128xbf16, #tpu.memory_space<vmem>>, vector<18x1x128xbf16>,
    %c0_49 = arith.constant 0 : index
    %c17 = arith.constant 17 : index
    %c0_50 = arith.constant 0 : index
    %73 = vector.load %arg11[%c0_49, %c17, %c0_50] : memref<18x24x128xbf16, #tpu.memory_space<vmem>>, vector<18x1x128xbf16>
    tpu.vector_store %arg11[%c0_49, %c17, %c0_50], %71 {strides = array<i32>} : memref<18x24x128xbf16, #tpu.memory_space<vmem>>, vector<18x1x128xbf16>,
    %c0_51 = arith.constant 0 : index
    %c1_52 = arith.constant 1 : index
    %c0_53 = arith.constant 0 : index
    %74 = vector.load %arg11[%c0_51, %c1_52, %c0_53] : memref<18x24x128xbf16, #tpu.memory_space<vmem>>, vector<18x16x128xbf16>
    tpu.vector_store %arg11[%c0_51, %c1_52, %c0_53], %70 {strides = array<i32>} : memref<18x24x128xbf16, #tpu.memory_space<vmem>>, vector<18x16x128xbf16>,
    %cst_54 = arith.constant 0.000000e+00 : bf16
    %75 = vector.broadcast %cst_54 : bf16 to vector<1x24x128xbf16>
    %c0_i32_55 = arith.constant 0 : i32
    %76 = arith.cmpi eq, %arg1, %c0_i32_55 : i32
    %77 = arith.extui %76 : i1 to i32
    %c0_i32_56 = arith.constant 0 : i32
    %78 = arith.cmpi ne, %77, %c0_i32_56 : i32
    scf.if %78 {
      %c0_90 = arith.constant 0 : index
      %c0_91 = arith.constant 0 : index
      %c0_92 = arith.constant 0 : index
      %124 = vector.load %arg11[%c0_90, %c0_91, %c0_92] : memref<18x24x128xbf16, #tpu.memory_space<vmem>>, vector<1x24x128xbf16>
      tpu.vector_store %arg11[%c0_90, %c0_91, %c0_92], %75 {strides = array<i32>} : memref<18x24x128xbf16, #tpu.memory_space<vmem>>, vector<1x24x128xbf16>,
    } else {
    }
    %c0_i32_57 = arith.constant 0 : i32
    %79 = arith.cmpi eq, %arg1, %c0_i32_57 : i32
    %80 = arith.extui %79 : i1 to i32
    %c0_i32_58 = arith.constant 0 : i32
    %81 = arith.cmpi ne, %80, %c0_i32_58 : i32
    scf.if %81 {
      %c17_90 = arith.constant 17 : index
      %c0_91 = arith.constant 0 : index
      %c0_92 = arith.constant 0 : index
      %124 = vector.load %arg11[%c17_90, %c0_91, %c0_92] : memref<18x24x128xbf16, #tpu.memory_space<vmem>>, vector<1x24x128xbf16>
      tpu.vector_store %arg11[%c17_90, %c0_91, %c0_92], %75 {strides = array<i32>} : memref<18x24x128xbf16, #tpu.memory_space<vmem>>, vector<1x24x128xbf16>,
    } else {
    }
    %cst_59 = arith.constant 0.000000e+00 : f32
    %82 = vector.broadcast %cst_59 : f32 to vector<256x128xf32>
    %c0_60 = arith.constant 0 : index
    %c0_61 = arith.constant 0 : index
    %c0_62 = arith.constant 0 : index
    %83 = vector.load %arg11[%c0_60, %c0_61, %c0_62] : memref<18x24x128xbf16, #tpu.memory_space<vmem>>, vector<16x24x128xbf16>
    %84 = vector.extract_strided_slice %83 {offsets = [0, 0, 0], sizes = [16, 16, 128], strides = [1, 1, 1]} : vector<16x24x128xbf16> to vector<16x16x128xbf16>
    %85 = vector.extract_strided_slice %83 {offsets = [0, 1, 0], sizes = [16, 16, 128], strides = [1, 1, 1]} : vector<16x24x128xbf16> to vector<16x16x128xbf16>
    %86 = vector.extract_strided_slice %83 {offsets = [0, 2, 0], sizes = [16, 16, 128], strides = [1, 1, 1]} : vector<16x24x128xbf16> to vector<16x16x128xbf16>
    %87 = tpu.concatenate %84, %85, %86 in 2 : vector<16x16x128xbf16>, vector<16x16x128xbf16>, vector<16x16x128xbf16> -> vector<16x16x384xbf16>
    %88 = vector.shape_cast %87 : vector<16x16x384xbf16> to vector<256x384xbf16>
    %c0_63 = arith.constant 0 : index
    %c0_64 = arith.constant 0 : index
    %c0_65 = arith.constant 0 : index
    %89 = vector.load %arg6[%c0_63, %c0_64, %c0_65] : memref<3x384x128xbf16, #tpu.memory_space<vmem>>, vector<1x384x128xbf16>
    %90 = vector.shape_cast %89 : vector<1x384x128xbf16> to vector<384x128xbf16>
    %cst_66 = arith.constant dense<0.000000e+00> : vector<256x128xf32>
    %91 = tpu.matmul %88, %90, %cst_66 {dimension_numbers = #tpu.dot_dimension_numbers<[1], [0], [0], [1], [0, 0, 1, 1], [], []>} : vector<256x384xbf16>, vector<384x128xbf16>, vector<256x128xf32> -> vector<256x128xf32>
    %92 = arith.addf %82, %91 : vector<256x128xf32>
    %c1_67 = arith.constant 1 : index
    %c0_68 = arith.constant 0 : index
    %c0_69 = arith.constant 0 : index
    %93 = vector.load %arg11[%c1_67, %c0_68, %c0_69] : memref<18x24x128xbf16, #tpu.memory_space<vmem>>, vector<16x24x128xbf16>
    %94 = vector.extract_strided_slice %93 {offsets = [0, 0, 0], sizes = [16, 16, 128], strides = [1, 1, 1]} : vector<16x24x128xbf16> to vector<16x16x128xbf16>
    %95 = vector.extract_strided_slice %93 {offsets = [0, 1, 0], sizes = [16, 16, 128], strides = [1, 1, 1]} : vector<16x24x128xbf16> to vector<16x16x128xbf16>
    %96 = vector.extract_strided_slice %93 {offsets = [0, 2, 0], sizes = [16, 16, 128], strides = [1, 1, 1]} : vector<16x24x128xbf16> to vector<16x16x128xbf16>
    %97 = tpu.concatenate %94, %95, %96 in 2 : vector<16x16x128xbf16>, vector<16x16x128xbf16>, vector<16x16x128xbf16> -> vector<16x16x384xbf16>
    %98 = vector.shape_cast %97 : vector<16x16x384xbf16> to vector<256x384xbf16>
    %c1_70 = arith.constant 1 : index
    %c0_71 = arith.constant 0 : index
    %c0_72 = arith.constant 0 : index
    %99 = vector.load %arg6[%c1_70, %c0_71, %c0_72] : memref<3x384x128xbf16, #tpu.memory_space<vmem>>, vector<1x384x128xbf16>
    %100 = vector.shape_cast %99 : vector<1x384x128xbf16> to vector<384x128xbf16>
    %cst_73 = arith.constant dense<0.000000e+00> : vector<256x128xf32>
    %101 = tpu.matmul %98, %100, %cst_73 {dimension_numbers = #tpu.dot_dimension_numbers<[1], [0], [0], [1], [0, 0, 1, 1], [], []>} : vector<256x384xbf16>, vector<384x128xbf16>, vector<256x128xf32> -> vector<256x128xf32>
    %102 = arith.addf %92, %101 : vector<256x128xf32>
    %c2_74 = arith.constant 2 : index
    %c0_75 = arith.constant 0 : index
    %c0_76 = arith.constant 0 : index
    %103 = vector.load %arg11[%c2_74, %c0_75, %c0_76] : memref<18x24x128xbf16, #tpu.memory_space<vmem>>, vector<16x24x128xbf16>
    %104 = vector.extract_strided_slice %103 {offsets = [0, 0, 0], sizes = [16, 16, 128], strides = [1, 1, 1]} : vector<16x24x128xbf16> to vector<16x16x128xbf16>
    %105 = vector.extract_strided_slice %103 {offsets = [0, 1, 0], sizes = [16, 16, 128], strides = [1, 1, 1]} : vector<16x24x128xbf16> to vector<16x16x128xbf16>
    %106 = vector.extract_strided_slice %103 {offsets = [0, 2, 0], sizes = [16, 16, 128], strides = [1, 1, 1]} : vector<16x24x128xbf16> to vector<16x16x128xbf16>
    %107 = tpu.concatenate %104, %105, %106 in 2 : vector<16x16x128xbf16>, vector<16x16x128xbf16>, vector<16x16x128xbf16> -> vector<16x16x384xbf16>
    %108 = vector.shape_cast %107 : vector<16x16x384xbf16> to vector<256x384xbf16>
    %c2_77 = arith.constant 2 : index
    %c0_78 = arith.constant 0 : index
    %c0_79 = arith.constant 0 : index
    %109 = vector.load %arg6[%c2_77, %c0_78, %c0_79] : memref<3x384x128xbf16, #tpu.memory_space<vmem>>, vector<1x384x128xbf16>
    %110 = vector.shape_cast %109 : vector<1x384x128xbf16> to vector<384x128xbf16>
    %cst_80 = arith.constant dense<0.000000e+00> : vector<256x128xf32>
    %111 = tpu.matmul %108, %110, %cst_80 {dimension_numbers = #tpu.dot_dimension_numbers<[1], [0], [0], [1], [0, 0, 1, 1], [], []>} : vector<256x384xbf16>, vector<384x128xbf16>, vector<256x128xf32> -> vector<256x128xf32>
    %112 = arith.addf %102, %111 : vector<256x128xf32>
    %c0_81 = arith.constant 0 : index
    %c0_82 = arith.constant 0 : index
    %113 = vector.load %arg7[%c0_81, %c0_82] : memref<1x128xf32, #tpu.memory_space<vmem>>, vector<1x128xf32>
    %114 = vector.broadcast %113 : vector<1x128xf32> to vector<256x128xf32>
    %115 = arith.mulf %112, %114 : vector<256x128xf32>
    %c0_83 = arith.constant 0 : index
    %c0_84 = arith.constant 0 : index
    %116 = vector.load %arg8[%c0_83, %c0_84] : memref<1x128xf32, #tpu.memory_space<vmem>>, vector<1x128xf32>
    %117 = vector.broadcast %116 : vector<1x128xf32> to vector<256x128xf32>
    %118 = arith.addf %115, %117 : vector<256x128xf32>
    %cst_85 = arith.constant 0.000000e+00 : f32
    %119 = vector.broadcast %cst_85 : f32 to vector<256x128xf32>
    %120 = arith.maximumf %118, %119 : vector<256x128xf32>
    %121 = arith.truncf %120 : vector<256x128xf32> to vector<256x128xbf16>
    %122 = vector.shape_cast %121 : vector<256x128xbf16> to vector<1x16x16x128xbf16>
    %c0_86 = arith.constant 0 : index
    %c0_87 = arith.constant 0 : index
    %c0_88 = arith.constant 0 : index
    %c0_89 = arith.constant 0 : index
    %123 = vector.load %arg9[%c0_86, %c0_87, %c0_88, %c0_89] : memref<1x16x16x128xbf16, #tpu.memory_space<vmem>>, vector<1x16x16x128xbf16>
    tpu.vector_store %arg9[%c0_86, %c0_87, %c0_88, %c0_89], %122 {strides = array<i32>} : memref<1x16x16x128xbf16, #tpu.memory_space<vmem>>, vector<1x16x16x128xbf16>,
    return
  }
  func.func @transform_1(%arg0: i32, %arg1: i32) -> (i32, i32, i32) {
    %c0_i32 = arith.constant 0 : i32
    %c0_i32_0 = arith.constant 0 : i32
    %c0_i32_1 = arith.constant 0 : i32
    %c0_i32_2 = arith.constant 0 : i32
    return %c0_i32, %c0_i32_0, %c0_i32_1 : i32, i32, i32
  }
  func.func @transform_2(%arg0: i32, %arg1: i32) -> (i32, i32) {
    %c0_i32 = arith.constant 0 : i32
    %c0_i32_0 = arith.constant 0 : i32
    %c0_i32_1 = arith.constant 0 : i32
    return %c0_i32, %c0_i32_0 : i32, i32
  }
  func.func @transform_3(%arg0: i32, %arg1: i32) -> (i32, i32) {
    %c0_i32 = arith.constant 0 : i32
    %c0_i32_0 = arith.constant 0 : i32
    %c0_i32_1 = arith.constant 0 : i32
    return %c0_i32, %c0_i32_0 : i32, i32
  }
  func.func @transform_4(%arg0: i32, %arg1: i32) -> (i32, i32, i32) {
    %c0_i32 = arith.constant 0 : i32
    %c0_i32_0 = arith.constant 0 : i32
    %c0_i32_1 = arith.constant 0 : i32
    %c0_i32_2 = arith.constant 0 : i32
    return %c0_i32, %c0_i32_0, %c0_i32_1 : i32, i32, i32
  }
  func.func @transform_5(%arg0: i32, %arg1: i32) -> (i32, i32) {
    %c0_i32 = arith.constant 0 : i32
    %c0_i32_0 = arith.constant 0 : i32
    %c0_i32_1 = arith.constant 0 : i32
    return %c0_i32, %c0_i32_0 : i32, i32
  }
  func.func @transform_6(%arg0: i32, %arg1: i32) -> (i32, i32) {
    %c0_i32 = arith.constant 0 : i32
    %c0_i32_0 = arith.constant 0 : i32
    %c0_i32_1 = arith.constant 0 : i32
    return %c0_i32, %c0_i32_0 : i32, i32
  }
  func.func @transform_7(%arg0: i32, %arg1: i32) -> (i32, i32, i32, i32) {
    %c0_i32 = arith.constant 0 : i32
    %c0_i32_0 = arith.constant 0 : i32
    %c0_i32_1 = arith.constant 0 : i32
    return %arg0, %arg1, %c0_i32, %c0_i32_0 : i32, i32, i32, i32
  }
}

</mosaic_0001>

<bundles_post_ra>
// kernel: double_conv.1
= control target key start
LH: loop header
LB: loop body
LE: loop exit
PB: predicated region body
PF: predicated region fallthrough
CT: control target
= control target key end

     0   :  { %s10360_s24 = smov 0   ;;  %s10362_s25 = smov 0   ;;  %s13430_s0 = inlined_call_operand.vmem [shape: bf16[2,20,24,128], index: 0, kind: input, shape index: {}]   ;;  %s13431_s1 = inlined_call_operand.vmem [shape: bf16[3,384,128], index: 1, kind: input, shape index: {}]   ;;  %s13432_s2 = inlined_call_operand.vmem [shape: f32[1,128], index: 2, kind: input, shape index: {}]   ;;  %s13433_s3 = inlined_call_operand.vmem [shape: f32[1,128], index: 3, kind: input, shape index: {}]   ;;  %s13434_s4 = inlined_call_operand.vmem [shape: bf16[3,384,128], index: 4, kind: input, shape index: {}]   ;;  %s13435_s5 = inlined_call_operand.vmem [shape: f32[1,128], index: 5, kind: input, shape index: {}]   ;;  %s13436_s6 = inlined_call_operand.vmem [shape: f32[1,128], index: 6, kind: input, shape index: {}]   ;;  %s13437_s7 = inlined_call_operand.vmem [shape: bf16[2,16,16,128], index: 7, kind: output, shape index: {}]  }
   0x1   :  { %s10364_s26 = smov 0  }
   0x2 LB: > { %s29_s27 = sadd.s32 1, %s10313_s25  ;;  %p7953_p0 = scmp.ge.s32.totalorder %s10317_s26, 1  ;;  %s10317_s26 = sphi %s10364_s26, %s17_s26   ;;  %s10313_s25 = sphi %s10362_s25, %s13554_s25   ;;  %s10309_s24 = sphi %s10360_s24, %s13553_s24  }
   0x3   : > { %p31_p1 = scmp.ge.s32.totalorder %s29_s27, 2  ;;  %p217_p2 = scmp.lt.s32.totalorder %s10317_s26, 3 }
   0x5   : > { %s13556_s27 = smov (%p31_p1, %s29_s27), 0  ;;  %p218_p3 = pnand %p7953_p0, %p217_p2 }
   0x7   : > { %221 = sbr.rel (%p218_p3) target bundleno = 1219 (0x4c3), region = 44 }
   0xe   : > { %p248_p4 = scmp.lt.s32.totalorder %s10309_s24, 1  ;;  %s8745_s28 = smul.u32 240, %s10309_s24 }
  0x10   : > { %s13558_s24 = smov (!%p248_p4, %s10309_s24), 1  ;;  %s10381_s8 = scalar_lea.vmem %s13430_s0, %s8745_s28 }
  0x11   : > { %s8744_s9 = sshll.u32 %s13558_s24, 7  ;;  %v310_v0 = vld [vmem:[%s10381_s8] sm:$0xff]  ;;  %v312_v1 = vld [vmem:[%s10381_s8 + $0x8] sm:$0xff]  ;;  %v314_v2 = vld [vmem:[%s10381_s8 + $0x10] sm:$0xff] }
  0x12   : > { %s10389_s12 = scalar_lea.vmem %s13437_s7, %s8744_s9  ;;  %311 = vst [vmem:[#allocation2] sm:$0xff] %v310_v0  ;;  %313 = vst [vmem:[#allocation2 + $0x8] sm:$0xff] %v312_v1  ;;  %v316_v3 = vld [vmem:[%s10381_s8 + $0x18] sm:$0xff]  ;;  %v318_v4 = vld [vmem:[%s10381_s8 + $0x20] sm:$0xff] }
  0x13   : > { %315 = vst [vmem:[#allocation2 + $0x10] sm:$0xff] %v314_v2  ;;  %v320_v5 = vld [vmem:[%s10381_s8 + $0x28] sm:$0xff]  ;;  %317 = vst [vmem:[#allocation2 + $0x18] sm:$0xff] %v316_v3  ;;  %v322_v6 = vld [vmem:[%s10381_s8 + $0x30] sm:$0xff] }
  0x14   : > { %319 = vst [vmem:[#allocation2 + $0x20] sm:$0xff] %v318_v4  ;;  %321 = vst [vmem:[#allocation2 + $0x28] sm:$0xff] %v320_v5  ;;  %v324_v7 = vld [vmem:[%s10381_s8 + $0x38] sm:$0xff]  ;;  %v326_v8 = vld [vmem:[%s10381_s8 + $0x40] sm:$0xff] }
  0x15   : > { %323 = vst [vmem:[#allocation2 + $0x30] sm:$0xff] %v322_v6  ;;  %325 = vst [vmem:[#allocation2 + $0x38] sm:$0xff] %v324_v7  ;;  %v328_v9 = vld [vmem:[%s10381_s8 + $0x48] sm:$0xff]  ;;  %v330_v10 = vld [vmem:[%s10381_s8 + $0x50] sm:$0xff] }
  0x16   : > { %327 = vst [vmem:[#allocation2 + $0x40] sm:$0xff] %v326_v8  ;;  %v332_v11 = vld [vmem:[%s10381_s8 + $0x58] sm:$0xff]  ;;  %329 = vst [vmem:[#allocation2 + $0x48] sm:$0xff] %v328_v9  ;;  %v334_v12 = vld [vmem:[%s10381_s8 + $0x60] sm:$0xff] }
  0x17   : > { %331 = vst [vmem:[#allocation2 + $0x50] sm:$0xff] %v330_v10  ;;  %333 = vst [vmem:[#allocation2 + $0x58] sm:$0xff] %v332_v11  ;;  %v336_v13 = vld [vmem:[%s10381_s8 + $0x68] sm:$0xff]  ;;  %v338_v14 = vld [vmem:[%s10381_s8 + $0x70] sm:$0xff] }
  0x18   : > { %335 = vst [vmem:[#allocation2 + $0x60] sm:$0xff] %v334_v12  ;;  %337 = vst [vmem:[#allocation2 + $0x68] sm:$0xff] %v336_v13  ;;  %v340_v15 = vld [vmem:[%s10381_s8 + $0x78] sm:$0xff]  ;;  %v342_v16 = vld [vmem:[%s10381_s8 + $0x80] sm:$0xff] }
  0x19   : > { %339 = vst [vmem:[#allocation2 + $0x70] sm:$0xff] %v338_v14  ;;  %v344_v17 = vld [vmem:[%s10381_s8 + $0x88] sm:$0xff]  ;;  %341 = vst [vmem:[#allocation2 + $0x78] sm:$0xff] %v340_v15  ;;  %v346_v18 = vld [vmem:[%s10381_s8 + $0x90] sm:$0xff] }
  0x1a   : > { %343 = vst [vmem:[#allocation2 + $0x80] sm:$0xff] %v342_v16  ;;  %345 = vst [vmem:[#allocation2 + $0x88] sm:$0xff] %v344_v17  ;;  %v348_v19 = vld [vmem:[%s10381_s8 + $0x98] sm:$0xff]  ;;  %v350_v20 = vld [vmem:[%s10381_s8 + $0xa0] sm:$0xff] }
  0x1b   : > { %347 = vst [vmem:[#allocation2 + $0x90] sm:$0xff] %v346_v18  ;;  %349 = vst [vmem:[#allocation2 + $0x98] sm:$0xff] %v348_v19  ;;  %v352_v21 = vld [vmem:[%s10381_s8 + $0xa8] sm:$0xff]  ;;  %v354_v22 = vld [vmem:[%s10381_s8 + $0xb0] sm:$0xff] }
  0x1c   : > { %351 = vst [vmem:[#allocation2 + $0xa0] sm:$0xff] %v350_v20  ;;  %v356_v23 = vld [vmem:[%s10381_s8 + $0xb8] sm:$0xff]  ;;  %353 = vst [vmem:[#allocation2 + $0xa8] sm:$0xff] %v352_v21  ;;  %v358_v24 = vld [vmem:[%s10381_s8 + $0xc0] sm:$0xff] }
  0x1d   : > { %355 = vst [vmem:[#allocation2 + $0xb0] sm:$0xff] %v354_v22  ;;  %357 = vst [vmem:[#allocation2 + $0xb8] sm:$0xff] %v356_v23  ;;  %v360_v25 = vld [vmem:[%s10381_s8 + $0xc8] sm:$0xff]  ;;  %v362_v26 = vld [vmem:[%s10381_s8 + $0xd0] sm:$0xff] }
  0x1e   : > { %359 = vst [vmem:[#allocation2 + $0xc0] sm:$0xff] %v358_v24  ;;  %361 = vst [vmem:[#allocation2 + $0xc8] sm:$0xff] %v360_v25  ;;  %v364_v27 = vld [vmem:[%s10381_s8 + $0xd8] sm:$0xff]  ;;  %v366_v28 = vld [vmem:[%s10381_s8 + $0xe0] sm:$0xff] }
  0x1f   : > { %363 = vst [vmem:[#allocation2 + $0xd0] sm:$0xff] %v362_v26  ;;  %v368_v29 = vld [vmem:[%s10381_s8 + $0xe8] sm:$0xff]  ;;  %365 = vst [vmem:[#allocation2 + $0xd8] sm:$0xff] %v364_v27 }
  0x20   : > { %367 = vst [vmem:[#allocation2 + $0xe0] sm:$0xff] %v366_v28  ;;  %369 = vst [vmem:[#allocation2 + $0xe8] sm:$0xff] %v368_v29 }
  0x21   : > { %377 = vsyncadd [#allocation4], 3840 }
  0x22   : > { %10305 = dma.done.wait [#allocation4], 3840 }
  0x23   : > { %10306 = vsyncadd [#allocation4], 4294963456  ;;  %v13438_v30 = vmov 0   ;;  %v9912_v31 = vld [vmem:[%s13431_s1 + $0xc0] sm:$0xff]   ;;  %v9913_v32 = vld [vmem:[%s13431_s1 + $0xc8] sm:$0xff]   ;;  %vm954_vm0 = vcmask 1046528  }
  0x24   : > { %1791 = vmatprep.subr.bf16.mxu0 %v13438_v30  ;;  %v9915_v33 = vld [vmem:[%s13431_s1 + $0x140] sm:$0xff]   ;;  %v9917_v34 = vld [vmem:[%s13431_s1 + $0x148] sm:$0xff]   ;;  %v9914_v35 = vld [vmem:[%s13431_s1 + $0xd0] sm:$0xff]   ;;  %vm719_vm1 = vsmask.f32 7424  ;;  %vm3889_vm2 = vcmask 1040384  }
  0x25   : > { %1792 = vmatpush1.bf16.msra.mxu0 %v9912_v31  ;;  %9395 = vmatprep.subr.bf16.mxu1 %v9915_v33  ;;  %v9919_v36 = vld [vmem:[%s13431_s1 + $0x150] sm:$0xff]   ;;  %v9916_v37 = vld [vmem:[%s13431_s1 + $0xd8] sm:$0xff]   ;;  %v9918_v39 = vld [vmem:[%s13431_s1 + $0xe0] sm:$0xff]   ;;  %vm3890_vm3 = vsmask.f32 256  ;;  %vm4454_vm7 = vcmask 1043456  }
  0x26   : > { %1793 = vmatprep.subr.bf16.mxu0 %v13438_v30  ;;  %9396 = vmatpush3.bf16.msra.mxu1 %v9915_v33  ;;  %v9921_v38 = vld [vmem:[%s13431_s1 + $0x158] sm:$0xff]   ;;  %v9923_v40 = vld [vmem:[%s13431_s1 + $0x160] sm:$0xff]   ;;  %v9920_v41 = vld [vmem:[%s13431_s1 + $0xe8] sm:$0xff]   ;;  %vm3946_vm5 = vsmask.f32 7938 }
  0x27   : > { %9397 = vmatprep.subr.bf16.mxu1 %v9917_v34  ;;  %v9925_v42 = vld [vmem:[%s13431_s1 + $0x168] sm:$0xff]   ;;  %v9932_v44 = vld [vmem:[#allocation2 + $0x14] ss:$0 sps:$4 sm:$0xff]   ;;  %v9924_v49 = vld [vmem:[%s13431_s1 + $0xf8] sm:$0xff]   ;;  %vm4092_vm8 = vsmask.f32 4368 }
  0x28   : > { %v10460_v43 = vld [vmem:[#allocation2 + $0xc] sm:$0xff]   ;;  %v1527_v47 = vrot.slane %v9932_v44, 1  ;;  %v10474_v51 = vld [vmem:[#allocation2 + $0x18] sm:$0xff]   ;;  %v10476_v52 = vld [vmem:[#allocation2 + $0x20] ss:$0 sps:$4 sm:$0xff]   ;;  %v1300_v63 = vshll.u32 %v9932_v44, 16 }
  0x29   : > { %1794 = vmatpush1.bf16.msra.mxu0 %v9913_v32  ;;  %v9922_v45 = vld [vmem:[%s13431_s1 + $0xf0] sm:$0xff]   ;;  %v1526_v46 = vrot.slane %v10460_v43, 1  ;;  %v10478_v53 = vld [vmem:[#allocation2 + $0x24] sm:$0xff]   ;;  %v9929_v54 = vld [vmem:[%s13431_s1 + $0x178] sm:$0xff]   ;;  %v1529_v57 = vrot.slane %v10474_v51, 1  ;;  %v1530_v58 = vrot.slane %v10476_v52, 1 }
  0x2a   : > { %1795 = vmatprep.subr.bf16.mxu0 %v13438_v30  ;;  %9398 = vmatpush3.bf16.msra.mxu1 %v9917_v34  ;;  %v9927_v48 = vld [vmem:[%s13431_s1 + $0x170] sm:$0xff]   ;;  %v10484_v55 = vld [vmem:[#allocation2 + $0x2c] ss:$0 sps:$4 sm:$0xff]   ;;  %v9926_v56 = vld [vmem:[%s13431_s1 + $0x100] sm:$0xff]   ;;  %v1293_v59 = vshrl.u32 %v10460_v43, 16  ;;  %v1532_v60 = vrot.slane %v10478_v53, 1 }
  0x2b   : > { %9399 = vmatprep.subr.bf16.mxu1 %v9919_v36  ;;  %v1528_v50 = vsel %vm954_vm0, %v1526_v46, %v1527_v47  ;;  %v1295_v61 = vshll.u32 %v10460_v43, 16  ;;  %v1533_v62 = vrot.slane %v10484_v55, 1  ;;  %v9928_v0 = vld [vmem:[%s13431_s1 + $0x108] sm:$0xff]   ;;  %v10499_v2 = vld [vmem:[#allocation2 + $0x30] sm:$0xff]   ;;  %v10501_v3 = vld [vmem:[#allocation2 + $0x38] ss:$0 sps:$4 sm:$0xff]   ;;  %v1531_v5 = vsel %vm954_vm0, %v1529_v57, %v1530_v58 }
  0x2c   : > { %9411 = vmatprep.mubr.bf16.mxu1 %v1528_v50  ;;  %v1302_v4 = vrot.slane %v1300_v63, 1  ;;  %v10510_v8 = vld [vmem:[%s13431_s1] sm:$0xff]   ;;  %v9930_v12 = vld [vmem:[%s13431_s1 + $0x110] sm:$0xff]   ;;  %v1535_v13 = vrot.slane %v10499_v2, 1  ;;  %v1536_v14 = vrot.slane %v10501_v3, 1  ;;  %v10525_v15 = vld [vmem:[%s13431_s1 + $0x8] sm:$0xff]  }
  0x2d   : > { %1796 = vmatpush1.bf16.msra.mxu0 %v9914_v35  ;;  %v1297_v1 = vrot.slane %v1295_v61, 1  ;;  %v1534_v7 = vsel %vm954_vm0, %v1532_v60, %v1533_v62  ;;  %v10512_v9 = vld [vmem:[#allocation2 + $0x3c] sm:$0xff]   ;;  %v10514_v10 = vld [vmem:[#allocation2 + $0x44] ss:$0 sps:$4 sm:$0xff]   ;;  %v10535_v19 = vld [vmem:[#allocation2 + $0x48] sm:$0xff]   ;;  %v1305_v44 = vshrl.u32 %v10474_v51, 16 }
  0x2e   : > { %1797 = vmatprep.subr.bf16.mxu0 %v13438_v30  ;;  %9400 = vmatpush3.bf16.msra.mxu1 %v9919_v36  ;;  %v1538_v16 = vrot.slane %v10512_v9, 1  ;;  %v1539_v17 = vrot.slane %v10514_v10, 1  ;;  %v9935_v18 = vld [vmem:[%s13431_s1 + $0x118] sm:$0xff]   ;;  %v10537_v20 = vld [vmem:[#allocation2 + $0x50] ss:$0 sps:$4 sm:$0xff]   ;;  %v1537_v21 = vsel %vm954_vm0, %v1535_v13, %v1536_v14  ;;  %v9936_v26 = vld [vmem:[%s13431_s1 + $0x120] sm:$0xff]  }
  0x2f   : > { %9401 = vmatprep.subr.bf16.mxu1 %v9921_v38  ;;  %v1298_v6 = vor.u32 %v1297_v1, %v1293_v59  ;;  %v10543_v22 = vld [vmem:[%s13431_s1 + $0x10] sm:$0xff]   ;;  %v10550_v25 = vld [vmem:[#allocation2 + $0x5c] ss:$0 sps:$4 sm:$0xff]   ;;  %v1541_v27 = vrot.slane %v10535_v19, 1  ;;  %v1542_v28 = vrot.slane %v10537_v20, 1  ;;  %v9942_v33 = vld [vmem:[%s13431_s1 + $0x128] sm:$0xff]  }
  0x30   : > { %v1540_v23 = vsel %vm954_vm0, %v1538_v16, %v1539_v17  ;;  %v10548_v24 = vld [vmem:[#allocation2 + $0x54] sm:$0xff]   ;;  %v1545_v32 = vrot.slane %v10550_v25, 1  ;;  %v10571_v34 = vld [vmem:[#allocation2 + $0x60] sm:$0xff]   ;;  %v10573_v35 = vld [vmem:[#allocation2 + $0x68] ss:$0 sps:$4 sm:$0xff]   ;;  %v1312_v47 = vshll.u32 %v10476_v52, 16 }
  0x31   : > { %1798 = vmatpush1.bf16.msra.mxu0 %v9916_v37  ;;  %v1303_v11 = vsel %vm719_vm1, %v1298_v6, %v1302_v4  ;;  %v10561_v29 = vld [vmem:[%s13431_s1 + $0x18] sm:$0xff]   ;;  %v1544_v31 = vrot.slane %v10548_v24, 1  ;;  %v10578_v36 = vld [vmem:[%s13431_s1 + $0x20] sm:$0xff]   ;;  %v1307_v37 = vshll.u32 %v10474_v51, 16  ;;  %v1548_v46 = vrot.slane %v10573_v35, 1  ;;  %v10617_v58 = vld [vmem:[%s13431_s1 + $0x30] sm:$0xff]  }
  0x32   : > { %1799 = vmatprep.subr.bf16.mxu0 %v13438_v30  ;;  %9402 = vmatpush3.bf16.msra.mxu1 %v9921_v38  ;;  %v10581_v38 = vld [vmem:[#allocation2 + $0x6c] sm:$0xff]   ;;  %v9950_v52 = vld [vmem:[%s13431_s1 + $0x138] sm:$0xff]   ;;  %v10612_v57 = vld [vmem:[#allocation2 + $0x80] ss:$0 sps:$4 sm:$0xff]   ;;  %v1319_v59 = vshll.u32 %v10478_v53, 16  ;;  %v1314_v61 = vrot.slane %v1312_v47, 1 }
  0x33   : > { %9403 = vmatprep.subr.bf16.mxu1 %v9923_v40  ;;  %1823 = vmatprep.mubr.bf16.mxu0 %v1303_v11  ;;  %v1550_v50 = vrot.slane %v10581_v38, 1  ;;  %v10621_v62 = vld [vmem:[#allocation2 + $0x84] sm:$0xff]   ;;  %v10626_v1 = vld [vmem:[#allocation2 + $0x8c] ss:$0 sps:$4 sm:$0xff]   ;;  %v1554_v11 = vrot.slane %v10612_v57, 1  ;;  %v1331_v17 = vshll.u32 %v10499_v2, 16  ;;  %vm11552_vm4 = vmand %vm3889_vm2, %vm3890_vm3 }
  0x34   : > { %v1321_v6 = vrot.slane %v1319_v59, 1  ;;  %v1556_v14 = vrot.slane %v10621_v62, 1  ;;  %v1557_v16 = vrot.slane %v10626_v1, 1  ;;  %v10689_v47 = vld [vmem:[%s13431_s1 + $0x50] sm:$0xff]   ;;  %v10696_v59 = vld [vmem:[#allocation2 + $0xbc] ss:$0 sps:$4 sm:$0xff]   ;;  %vm11565_vm6 = vmand %vm3889_vm2, %vm3946_vm5 }
  0x35   : > { %1800 = vmatpush1.bf16.msra.mxu0 %v9918_v39  ;;  %v1543_v39 = vsel %vm954_vm0, %v1541_v27, %v1542_v28  ;;  %v10657_v27 = vld [vmem:[#allocation2 + $0x9c] sm:$0xff]   ;;  %vm11927_vm9 = vmand %vm4454_vm7, %vm3946_vm5 }
  0x36   : > { %1801 = vmatprep.subr.bf16.mxu0 %v13438_v30  ;;  %9404 = vmatpush3.bf16.msra.mxu1 %v9923_v40  ;;  %v10584_v40 = vld [vmem:[#allocation2 + $0x74] ss:$0 sps:$4 sm:$0xff]   ;;  %vm11934_vm10 = vmor %vm3890_vm3, %vm4092_vm8 }
  0x37   : > { %9405 = vmatprep.subr.bf16.mxu1 %v9925_v42 }
  0x39   : > { %1802 = vmatpush1.bf16.msra.mxu0 %v9920_v41  ;;  %v1546_v41 = vsel %vm954_vm0, %v1544_v31, %v1545_v32  ;;  %v1329_v32 = vshrl.u32 %v10499_v2, 16 }
  0x3a   : > { %1803 = vmatprep.subr.bf16.mxu0 %v13438_v30  ;;  %9406 = vmatpush3.bf16.msra.mxu1 %v9925_v42  ;;  %v9944_v42 = vld [vmem:[%s13431_s1 + $0x130] sm:$0xff]  }
  0x3b   : > { %9407 = vmatprep.subr.bf16.mxu1 %v9927_v48 }
  0x3d   : > { %1804 = vmatpush1.bf16.msra.mxu0 %v9922_v45  ;;  %v1547_v45 = vrot.slane %v10571_v34, 1 }
  0x3e   : > { %1805 = vmatprep.subr.bf16.mxu0 %v13438_v30  ;;  %9408 = vmatpush3.bf16.msra.mxu1 %v9927_v48  ;;  %v10600_v48 = vld [vmem:[%s13431_s1 + $0x28] sm:$0xff]  }
  0x3f   : > { %9409 = vmatprep.subr.bf16.mxu1 %v9929_v54  ;;  %v1549_v60 = vsel %vm954_vm0, %v1547_v45, %v1548_v46  ;;  %v10683_v45 = vld [vmem:[#allocation2 + $0xb0] ss:$0 sps:$4 sm:$0xff]  }
  0x41   : > { %1806 = vmatpush1.bf16.msra.mxu0 %v9924_v49  ;;  %v1309_v49 = vrot.slane %v1307_v37, 1  ;;  %v1336_v37 = vshll.u32 %v10501_v3, 16 }
  0x42   : > { %1807 = vmatprep.subr.bf16.mxu0 %v13438_v30  ;;  %9410 = vmatpush3.bf16.msra.mxu1 %v9929_v54  ;;  %v1551_v54 = vrot.slane %v10584_v40, 1 }
  0x43   : > { %9695 = vmatprep.subr.bf16.mxu1 %v13438_v30  ;;  %v1310_v63 = vor.u32 %v1309_v49, %v1305_v44  ;;  %v1562_v44 = vrot.slane %v10657_v27, 1  ;;  %v1338_v46 = vrot.slane %v1336_v37, 1  ;;  %v10748_v37 = vld [vmem:[%s13431_s1 + $0x68] sm:$0xff]  }
  0x45   : > { %1808 = vmatpush1.bf16.msra.mxu0 %v9926_v56  ;;  %9412 = vmatmul.mubr.bf16.vlgmr.msra.gmra.mrb[0].mxu1 %v1531_v5  ;;  %v10606_v56 = vld [vmem:[#allocation2 + $0x78] sm:$0xff]   ;;  %v1317_v5 = vshrl.u32 %v10478_v53, 16  ;;  %v1315_v13 = vsel %vm719_vm1, %v1310_v63, %v1314_v61  ;;  %v1566_v61 = vrot.slane %v10683_v45, 1  ;;  %v1341_v63 = vshrl.u32 %v10512_v9, 16 }
  0x46   : > { %1809 = vmatprep.subr.bf16.mxu0 %v13438_v30  ;;  %9415 = vmatprep.mubr.bf16.mxu1 %v1534_v7  ;;  %v1553_v4 = vrot.slane %v10606_v56, 1  ;;  %v1324_v7 = vshll.u32 %v10484_v55, 16  ;;  %v10644_v55 = vld [vmem:[#allocation2 + $0x90] sm:$0xff]  }
  0x47   : > { %9711 = vmatpush1.bf16.msra.mxu1 %v10510_v8  ;;  %v1322_v28 = vor.u32 %v1321_v6, %v1317_v5  ;;  %v1559_v31 = vrot.slane %v10644_v55, 1  ;;  %v10712_v5 = vld [vmem:[%s13431_s1 + $0x58] sm:$0xff]  }
  0x48   : > { %9696 = vmatprep.subr.bf16.mxu1 %v13438_v30 }
  0x49   : > { %1810 = vmatpush1.bf16.msra.mxu0 %v9928_v0  ;;  %v1552_v0 = vsel %vm954_vm0, %v1550_v50, %v1551_v54  ;;  %v1343_v54 = vshll.u32 %v10512_v9, 16 }
  0x4a   : > { %1811 = vmatprep.subr.bf16.mxu0 %v13438_v30 }
  0x4b   : > { %9712 = vmatpush1.bf16.msra.mxu1 %v10525_v15 }
  0x4c   : > { %9697 = vmatprep.subr.bf16.mxu1 %v13438_v30 }
  0x4d   : > { %1812 = vmatpush1.bf16.msra.mxu0 %v9930_v12  ;;  %9416 = vmatmul.mubr.bf16.gmra.mrb[4].mxu1 %v1537_v21  ;;  %v10636_v12 = vld [vmem:[%s13431_s1 + $0x38] sm:$0xff]   ;;  %v1326_v21 = vrot.slane %v1324_v7, 1  ;;  %v1569_v7 = vrot.slane %v10696_v59, 1 }
  0x4e   : > { %1813 = vmatprep.subr.bf16.mxu0 %v13438_v30  ;;  %9419 = vmatprep.mubr.bf16.mxu1 %v1540_v23  ;;  %v10650_v23 = vld [vmem:[#allocation2 + $0x98] ss:$0 sps:$4 sm:$0xff]  }
  0x4f   : > { %9713 = vmatpush1.bf16.msra.mxu1 %v10543_v22 }
  0x50   : > { %9698 = vmatprep.subr.bf16.mxu1 %v13438_v30 }
  0x51   : > { %1814 = vmatpush1.bf16.msra.mxu0 %v9935_v18  ;;  %v1555_v18 = vsel %vm954_vm0, %v1553_v4, %v1554_v11  ;;  %v1348_v4 = vshll.u32 %v10514_v10, 16  ;;  %v10722_v11 = vld [vmem:[#allocation2 + $0xc8] ss:$0 sps:$4 sm:$0xff]  }
  0x52   : > { %1815 = vmatprep.subr.bf16.mxu0 %v13438_v30 }
  0x53   : > { %9714 = vmatpush1.bf16.msra.mxu1 %v10561_v29 }
  0x54   : > { %9699 = vmatprep.subr.bf16.mxu1 %v13438_v30 }
  0x55   : > { %1816 = vmatpush1.bf16.msra.mxu0 %v9936_v26  ;;  %9420 = vmatmul.mubr.bf16.gmra.mrb[8].mxu1 %v1543_v39  ;;  %v10655_v26 = vld [vmem:[%s13431_s1 + $0x40] sm:$0xff]   ;;  %v1560_v39 = vrot.slane %v10650_v23, 1 }
  0x56   : > { %1817 = vmatprep.subr.bf16.mxu0 %v13438_v30  ;;  %9423 = vmatprep.mubr.bf16.mxu1 %v1546_v41  ;;  %v10673_v41 = vld [vmem:[%s13431_s1 + $0x48] sm:$0xff]  }
  0x57   : > { %9715 = vmatpush1.bf16.msra.mxu1 %v10578_v36  ;;  %v1561_v49 = vsel %vm954_vm0, %v1559_v31, %v1560_v39  ;;  %v1360_v31 = vshll.u32 %v10537_v20, 16 }
  0x58   : > { %9700 = vmatprep.subr.bf16.mxu1 %v13438_v30 }
  0x59   : > { %1818 = vmatpush1.bf16.msra.mxu0 %v9942_v33  ;;  %v1333_v33 = vrot.slane %v1331_v17, 1  ;;  %v1350_v17 = vrot.slane %v1348_v4, 1 }
  0x5a   : > { %1819 = vmatprep.subr.bf16.mxu0 %v13438_v30 }
  0x5b   : > { %9716 = vmatpush1.bf16.msra.mxu1 %v10600_v48  ;;  %v1334_v50 = vor.u32 %v1333_v33, %v1329_v32  ;;  %v1572_v32 = vrot.slane %v10722_v11, 1 }
  0x5c   : > { %9701 = vmatprep.subr.bf16.mxu1 %v13438_v30 }
  0x5d   : > { %1820 = vmatpush1.bf16.msra.mxu0 %v9944_v42  ;;  %9424 = vmatmul.mubr.bf16.gmra.mrb[12].mxu1 %v1549_v60  ;;  %v1327_v42 = vsel %vm719_vm1, %v1322_v28, %v1326_v21  ;;  %v10735_v21 = vld [vmem:[#allocation2 + $0xd4] ss:$0 sps:$4 sm:$0xff]  }
  0x5e   : > { %1821 = vmatprep.subr.bf16.mxu0 %v13438_v30  ;;  %9427 = vmatprep.mubr.bf16.mxu1 %v1552_v0  ;;  %v1345_v0 = vrot.slane %v1343_v54, 1  ;;  %v1575_v20 = vrot.slane %v10735_v21, 1  ;;  %v10762_v54 = vld [vmem:[#allocation2 + $0xe0] ss:$0 sps:$4 sm:$0xff]  }
  0x5f   : > { %9717 = vmatpush1.bf16.msra.mxu1 %v10617_v58 }
  0x60   : > { %9702 = vmatprep.subr.bf16.mxu1 %v13438_v30 }
  0x61   : > { %1822 = vmatpush1.bf16.msra.mxu0 %v9950_v52  ;;  %v10694_v52 = vld [vmem:[#allocation2 + $0xb4] sm:$0xff]  }
  0x62   : > { %2289 = vmatprep.subr.bf16.mxu0 %v13438_v30  ;;  %v1568_v6 = vrot.slane %v10694_v52, 1 }
  0x63   : > { %9718 = vmatpush1.bf16.msra.mxu1 %v10636_v12 }
  0x64   : > { %1824 = vmatmul.mubr.bf16.vlgmr.msra.gmra.mrb[0].mxu0 %v10460_v43  ;;  %v1558_v43 = vsel %vm954_vm0, %v1556_v14, %v1557_v16  ;;  %9703 = vmatprep.subr.bf16.mxu1 %v13438_v30  ;;  %v10726_v14 = vld [vmem:[#allocation2 + $0xcc] sm:$0xff]   ;;  %v1346_v16 = vor.u32 %v1345_v0, %v1341_v63  ;;  %v10774_v0 = vld [vmem:[#allocation2 + $0x54] sm:$0xff]  }
  0x65   : > { %2290 = vmatpush1.bf16.msra.mxu0 %v10510_v8  ;;  %1831 = vmatprep.mubr.bf16.mxu0 %v1315_v13  ;;  %v10662_v8 = vld [vmem:[#allocation2 + $0xa4] ss:$0 sps:$4 sm:$0xff]   ;;  %v1355_v13 = vshll.u32 %v10535_v19, 16  ;;  %v1574_v39 = vrot.slane %v10726_v14, 1 }
  0x66   : > { %2291 = vmatprep.subr.bf16.mxu0 %v13438_v30  ;;  %9428 = vmatmul.mubr.bf16.gmra.mrb[16].mxu1 %v1555_v18  ;;  %v1563_v3 = vrot.slane %v10662_v8, 1  ;;  %v1570_v18 = vsel %vm954_vm0, %v1568_v6, %v1569_v7  ;;  %v1365_v6 = vshrl.u32 %v10548_v24, 16 }
  0x67   : > { %9431 = vmatprep.mubr.bf16.mxu1 %v1558_v43  ;;  %9719 = vmatpush1.bf16.msra.mxu1 %v10655_v26  ;;  %v1353_v43 = vshrl.u32 %v10535_v19, 16  ;;  %v1357_v33 = vrot.slane %v1355_v13, 1  ;;  %v10785_v13 = vld [vmem:[%s13431_s1 + $0x78] sm:$0xff]  }
  0x68   : > { %9704 = vmatprep.subr.bf16.mxu1 %v13438_v30 }
  0x69   : > { %2292 = vmatpush1.bf16.msra.mxu0 %v10525_v15  ;;  %v10681_v15 = vld [vmem:[#allocation2 + $0xa8] sm:$0xff]  }
  0x6a   : > { %2293 = vmatprep.subr.bf16.mxu0 %v13438_v30  ;;  %v1565_v60 = vrot.slane %v10681_v15, 1 }
  0x6b   : > { %9720 = vmatpush1.bf16.msra.mxu1 %v10673_v41 }
  0x6c   : > { %1832 = vmatmul.mubr.bf16.gmra.mrb[4].mxu0 %v10474_v51  ;;  %v1564_v51 = vsel %vm954_vm0, %v1562_v44, %v1563_v3  ;;  %9705 = vmatprep.subr.bf16.mxu1 %v13438_v30  ;;  %v1567_v10 = vsel %vm954_vm0, %v1565_v60, %v1566_v61  ;;  %v1351_v44 = vsel %vm719_vm1, %v1346_v16, %v1350_v17  ;;  %v1367_v60 = vshll.u32 %v10548_v24, 16 }
  0x6d   : > { %1839 = vmatprep.mubr.bf16.mxu0 %v1327_v42  ;;  %2294 = vmatpush1.bf16.msra.mxu0 %v10543_v22  ;;  %v1339_v22 = vsel %vm719_vm1, %v1334_v50, %v1338_v46  ;;  %v9989_v42 = vld [vmem:[#allocation2 + $0x50] ss:$0 sps:$4 sm:$0xff]   ;;  %v1362_v46 = vrot.slane %v1360_v31, 1  ;;  %v1358_v50 = vor.u32 %v1357_v33, %v1353_v43  ;;  %v807_v43 = vshll.u32 %v10774_v0, 16  ;;  %v10796_v33 = vld [vmem:[#allocation2 + $0x60] sm:$0xff]  }
  0x6e   : > { %2295 = vmatprep.subr.bf16.mxu0 %v13438_v30  ;;  %9432 = vmatmul.mubr.bf16.gmra.mrb[20].mxu1 %v1561_v49  ;;  %v10759_v49 = vld [vmem:[#allocation2 + $0xd8] sm:$0xff]   ;;  %v800_v63 = vshll.u32 %v9989_v42, 16  ;;  %v1369_v7 = vrot.slane %v1367_v60, 1  ;;  %v805_v42 = vshrl.u32 %v10774_v0, 16 }
  0x6f   : > { %9435 = vmatprep.mubr.bf16.mxu1 %v1564_v51  ;;  %9721 = vmatpush1.bf16.msra.mxu1 %v10689_v47  ;;  %v10767_v51 = vld [vmem:[%s13431_s1 + $0x70] sm:$0xff]   ;;  %v1577_v4 = vrot.slane %v10759_v49, 1  ;;  %v1363_v16 = vsel %vm719_vm1, %v1358_v50, %v1362_v46  ;;  %v9993_v46 = vld [vmem:[#allocation2 + $0x68] ss:$0 sps:$4 sm:$0xff]  }
  0x70   : > { %9706 = vmatprep.subr.bf16.mxu1 %v13438_v30  ;;  %v1370_v31 = vor.u32 %v1369_v7, %v1365_v6  ;;  %v1389_v7 = vshrl.u32 %v10581_v38, 16 }
  0x71   : > { %2296 = vmatpush1.bf16.msra.mxu0 %v10561_v29  ;;  %v10719_v29 = vld [vmem:[#allocation2 + $0xc0] sm:$0xff]  }
  0x72   : > { %2297 = vmatprep.subr.bf16.mxu0 %v13438_v30  ;;  %v1571_v28 = vrot.slane %v10719_v29, 1 }
  0x73   : > { %9722 = vmatpush1.bf16.msra.mxu1 %v10712_v5 }
  0x74   : > { %1840 = vmatmul.mubr.bf16.gmra.mrb[8].mxu0 %v10478_v53  ;;  %v10733_v53 = vld [vmem:[%s13431_s1 + $0x60] sm:$0xff]   ;;  %9707 = vmatprep.subr.bf16.mxu1 %v13438_v30 }
  0x75   : > { %1847 = vmatprep.mubr.bf16.mxu0 %v1339_v22  ;;  %2298 = vmatpush1.bf16.msra.mxu0 %v10578_v36  ;;  %v10738_v36 = vld [vmem:[#allocation2 + $0x48] sm:$0xff]  }
  0x76   : > { %2299 = vmatprep.subr.bf16.mxu0 %v13438_v30  ;;  %9436 = vmatmul.mubr.bf16.gmra.mrb[24].mxu1 %v1567_v10  ;;  %v795_v3 = vshll.u32 %v10738_v36, 16  ;;  %v793_v22 = vshrl.u32 %v10738_v36, 16  ;;  %v1372_v10 = vshll.u32 %v10550_v25, 16 }
  0x77   : > { %9439 = vmatprep.mubr.bf16.mxu1 %v1570_v18  ;;  %9723 = vmatpush1.bf16.msra.mxu1 %v10733_v53  ;;  %v802_v18 = vrot.slane %v800_v63, 1 }
  0x78   : > { %9708 = vmatprep.subr.bf16.mxu1 %v13438_v30  ;;  %v797_v61 = vrot.slane %v795_v3, 1  ;;  %v1384_v3 = vshll.u32 %v10573_v35, 16  ;;  %v817_v35 = vshrl.u32 %v10796_v33, 16 }
  0x79   : > { %2300 = vmatpush1.bf16.msra.mxu0 %v10600_v48  ;;  %v1573_v48 = vsel %vm954_vm0, %v1571_v28, %v1572_v32  ;;  %v9991_v28 = vld [vmem:[#allocation2 + $0x5c] ss:$0 sps:$4 sm:$0xff]   ;;  %v1379_v32 = vshll.u32 %v10571_v34, 16 }
  0x7a   : > { %2301 = vmatprep.subr.bf16.mxu0 %v13438_v30  ;;  %v798_v17 = vor.u32 %v797_v61, %v793_v22  ;;  %v1391_v22 = vshll.u32 %v10581_v38, 16  ;;  %v1386_v61 = vrot.slane %v1384_v3, 1 }
  0x7b   : > { %9724 = vmatpush1.bf16.msra.mxu1 %v10748_v37  ;;  %v1381_v50 = vrot.slane %v1379_v32, 1 }
  0x7c   : > { %1848 = vmatmul.mubr.bf16.gmra.mrb[12].mxu0 %v10499_v2  ;;  %v1576_v2 = vsel %vm954_vm0, %v1574_v39, %v1575_v20  ;;  %9709 = vmatprep.subr.bf16.mxu1 %v13438_v30  ;;  %v803_v39 = vsel %vm719_vm1, %v798_v17, %v802_v18  ;;  %v812_v20 = vshll.u32 %v9991_v28, 16  ;;  %v9995_v17 = vld [vmem:[#allocation2 + $0x74] ss:$0 sps:$4 sm:$0xff]  }
  0x7d   : > { %1855 = vmatprep.mubr.bf16.mxu0 %v1351_v44  ;;  %2302 = vmatpush1.bf16.msra.mxu0 %v10617_v58  ;;  %v1578_v58 = vrot.slane %v10762_v54, 1  ;;  %v809_v44 = vrot.slane %v807_v43, 1  ;;  %v836_v32 = vshll.u32 %v9995_v17, 16  ;;  %v1427_v17 = vshll.u32 %v10644_v55, 16 }
  0x7e   : > { %2303 = vmatprep.subr.bf16.mxu0 %v13438_v30  ;;  %9440 = vmatmul.mubr.bf16.gmra.mrb[28].mxu1 %v1573_v48 }
  0x7f   : > { %9443 = vmatprep.mubr.bf16.mxu1 %v1576_v2  ;;  %9725 = vmatpush1.bf16.msra.mxu1 %v10767_v51  ;;  %v1579_v25 = vsel %vm954_vm0, %v1577_v4, %v1578_v58  ;;  %v810_v60 = vor.u32 %v809_v44, %v805_v42  ;;  %v814_v2 = vrot.slane %v812_v20, 1  ;;  %v10813_v4 = vld [vmem:[#allocation2 + $0x6c] sm:$0xff]   ;;  %v824_v58 = vshll.u32 %v9993_v46, 16 }
  0x80   : > { %9710 = vmatprep.subr.bf16.mxu1 %v13438_v30  ;;  %v831_v43 = vshll.u32 %v10813_v4, 16  ;;  %v1401_v44 = vshrl.u32 %v10606_v56, 16  ;;  %v1408_v20 = vshll.u32 %v10612_v57, 16 }
  0x81   : > { %2304 = vmatpush1.bf16.msra.mxu0 %v10636_v12  ;;  %v1374_v12 = vrot.slane %v1372_v10, 1  ;;  %v815_v6 = vsel %vm719_vm1, %v810_v60, %v814_v2  ;;  %v1393_v10 = vrot.slane %v1391_v22, 1  ;;  %v826_v28 = vrot.slane %v824_v58, 1  ;;  %v10858_v60 = vld [vmem:[#allocation2 + $0x84] sm:$0xff]  }
  0x82   : > { %2305 = vmatprep.subr.bf16.mxu0 %v13438_v30  ;;  %v833_v42 = vrot.slane %v831_v43, 1  ;;  %v1410_v57 = vrot.slane %v1408_v20, 1  ;;  %v10018_v43 = vld [vmem:[%s13431_s1 + $0x1b0] sm:$0xff]   ;;  %v1439_v20 = vshll.u32 %v10657_v27, 16 }
  0x83   : > { %9726 = vmatpush1.bf16.msra.mxu1 %v10785_v13  ;;  %v1375_v48 = vsel %vm719_vm1, %v1370_v31, %v1374_v12  ;;  %v1403_v31 = vshll.u32 %v10606_v56, 16  ;;  %v829_v12 = vshrl.u32 %v10813_v4, 16 }
  0x84   : > { %1856 = vmatmul.mubr.bf16.gmra.mrb[16].mxu0 %v10512_v9  ;;  %3359 = vmatprep.subr.bf16.mxu1 %v13438_v30  ;;  %v1377_v9 = vshrl.u32 %v10571_v34, 16 }
  0x85   : > { %1863 = vmatprep.mubr.bf16.mxu0 %v1363_v16  ;;  %2306 = vmatpush1.bf16.msra.mxu0 %v10655_v26  ;;  %v819_v26 = vshll.u32 %v10796_v33, 16  ;;  %v1396_v16 = vshll.u32 %v10584_v40, 16  ;;  %v1394_v40 = vor.u32 %v1393_v10, %v1389_v7  ;;  %v1405_v3 = vrot.slane %v1403_v31, 1  ;;  %v10001_v31 = vld [vmem:[#allocation2 + $0x98] ss:$0 sps:$4 sm:$0xff]  }
  0x86   : > { %2307 = vmatprep.subr.bf16.mxu0 %v13438_v30  ;;  %9444 = vmatmul.mubr.bf16.gmra.mrb[32].mxu1 %v1579_v25  ;;  %v10833_v25 = vld [vmem:[#allocation2 + $0x78] sm:$0xff]   ;;  %v834_v46 = vor.u32 %v833_v42, %v829_v12  ;;  %v1429_v12 = vrot.slane %v1427_v17, 1 }
  0x87   : > { %2369 = vmatprep.mubr.bf16.mxu1 %v803_v39  ;;  %v821_v63 = vrot.slane %v819_v26, 1  ;;  %v838_v26 = vrot.slane %v836_v32, 1  ;;  %v1406_v2 = vor.u32 %v1405_v3, %v1401_v44  ;;  %v10022_v44 = vld [vmem:[%s13431_s1 + $0x1b8] sm:$0xff]  }
  0x89   : > { %2308 = vmatpush1.bf16.msra.mxu0 %v10673_v41  ;;  %v1382_v41 = vor.u32 %v1381_v50, %v1377_v9  ;;  %v822_v18 = vor.u32 %v821_v63, %v817_v35  ;;  %v9997_v9 = vld [vmem:[#allocation2 + $0x80] ss:$0 sps:$4 sm:$0xff]   ;;  %v1415_v50 = vshll.u32 %v10621_v62, 16  ;;  %v839_v22 = vsel %vm719_vm1, %v834_v46, %v838_v26 }
  0x8a   : > { %2309 = vmatprep.subr.bf16.mxu0 %v13438_v30  ;;  %v848_v35 = vshll.u32 %v9997_v9, 16  ;;  %v10869_v63 = vld [vmem:[%s13431_s1 + $0x80] sm:$0xff]   ;;  %v1411_v7 = vsel %vm719_vm1, %v1406_v2, %v1410_v57  ;;  %v872_v9 = vshll.u32 %v10001_v31, 16  ;;  %v1441_v57 = vrot.slane %v1439_v20, 1 }
  0x8b   : > { %v827_v39 = vsel %vm719_vm1, %v822_v18, %v826_v28  ;;  %v1417_v58 = vrot.slane %v1415_v50, 1 }
  0x8c   : > { %1864 = vmatmul.mubr.bf16.gmra.mrb[20].mxu0 %v10535_v19  ;;  %v10004_v19 = vld [vmem:[%s13431_s1 + $0x180] sm:$0xff]   ;;  %v874_v50 = vrot.slane %v872_v9, 1 }
  0x8d   : > { %1871 = vmatprep.mubr.bf16.mxu0 %v1375_v48  ;;  %2310 = vmatpush1.bf16.msra.mxu0 %v10689_v47  ;;  %v1387_v47 = vsel %vm719_vm1, %v1382_v41, %v1386_v61  ;;  %v843_v48 = vshll.u32 %v10833_v25, 16  ;;  %v1413_v41 = vshrl.u32 %v10621_v62, 16 }
  0x8e   : > { %2311 = vmatprep.subr.bf16.mxu0 %v13438_v30  ;;  %2370 = vmatmul.mubr.bf16.vlgmr.msra.gmra.mrb[36].mxu1 %v10738_v36  ;;  %v10005_v36 = vld [vmem:[%s13431_s1 + $0x188] sm:$0xff]  }
  0x8f   : > { %2377 = vmatprep.mubr.bf16.mxu1 %v815_v6  ;;  %3360 = vmatpush1.bf16.msra.mxu1 %v10004_v19  ;;  %v845_v61 = vrot.slane %v843_v48, 1  ;;  %v9999_v6 = vld [vmem:[#allocation2 + $0x8c] ss:$0 sps:$4 sm:$0xff]   ;;  %v855_v19 = vshll.u32 %v10858_v60, 16  ;;  %v10026_v48 = vld [vmem:[%s13431_s1 + $0x1c0] sm:$0xff]  }
  0x90   : > { %3361 = vmatprep.subr.bf16.mxu1 %v13438_v30  ;;  %v860_v28 = vshll.u32 %v9999_v6, 16 }
  0x91   : > { %2312 = vmatpush1.bf16.msra.mxu0 %v10712_v5  ;;  %v1398_v5 = vrot.slane %v1396_v16, 1  ;;  %v850_v16 = vrot.slane %v848_v35, 1  ;;  %v857_v18 = vrot.slane %v855_v19, 1  ;;  %v10030_v35 = vld [vmem:[%s13431_s1 + $0x1c8] sm:$0xff]  }
  0x92   : > { %2313 = vmatprep.subr.bf16.mxu0 %v13438_v30  ;;  %v862_v32 = vrot.slane %v860_v28, 1  ;;  %v10036_v28 = vld [vmem:[%s13431_s1 + $0x1d8] sm:$0xff]  }
  0x93   : > { %3362 = vmatpush1.bf16.msra.mxu1 %v10005_v36  ;;  %v1418_v36 = vor.u32 %v1417_v58, %v1413_v41 }
  0x94   : > { %1872 = vmatmul.mubr.bf16.gmra.mrb[24].mxu0 %v10548_v24  ;;  %v10008_v24 = vld [vmem:[%s13431_s1 + $0x190] sm:$0xff]   ;;  %3363 = vmatprep.subr.bf16.mxu1 %v13438_v30 }
  0x95   : > { %1879 = vmatprep.mubr.bf16.mxu0 %v1387_v47  ;;  %2314 = vmatpush1.bf16.msra.mxu0 %v10733_v53  ;;  %v1399_v53 = vsel %vm719_vm1, %v1394_v40, %v1398_v5  ;;  %v10885_v47 = vld [vmem:[#allocation2 + $0x90] sm:$0xff]   ;;  %v1432_v5 = vshll.u32 %v10650_v23, 16  ;;  %v10903_v23 = vld [vmem:[#allocation2 + $0x9c] sm:$0xff]  }
  0x96   : > { %2315 = vmatprep.subr.bf16.mxu0 %v13438_v30  ;;  %2378 = vmatmul.mubr.bf16.gmra.mrb[40].mxu1 %v10774_v0  ;;  %v10011_v0 = vld [vmem:[%s13431_s1 + $0x198] sm:$0xff]   ;;  %v877_v41 = vshrl.u32 %v10903_v23, 16 }
  0x97   : > { %2385 = vmatprep.mubr.bf16.mxu1 %v827_v39  ;;  %3364 = vmatpush1.bf16.msra.mxu1 %v10008_v24  ;;  %v867_v24 = vshll.u32 %v10885_v47, 16 }
  0x98   : > { %3365 = vmatprep.subr.bf16.mxu1 %v13438_v30 }
  0x99   : > { %2316 = vmatpush1.bf16.msra.mxu0 %v10748_v37  ;;  %v841_v37 = vshrl.u32 %v10833_v25, 16  ;;  %v869_v26 = vrot.slane %v867_v24, 1 }
  0x9a   : > { %2317 = vmatprep.subr.bf16.mxu0 %v13438_v30 }
  0x9b   : > { %3366 = vmatpush1.bf16.msra.mxu1 %v10011_v0  ;;  %v846_v10 = vor.u32 %v845_v61, %v841_v37  ;;  %v1444_v0 = vshll.u32 %v10662_v8, 16  ;;  %v10003_v37 = vld [vmem:[#allocation2 + $0xa4] ss:$0 sps:$4 sm:$0xff]   ;;  %v879_v61 = vshll.u32 %v10903_v23, 16 }
  0x9c   : > { %1880 = vmatmul.mubr.bf16.gmra.mrb[28].mxu0 %v10571_v34  ;;  %v10014_v34 = vld [vmem:[%s13431_s1 + $0x1a0] sm:$0xff]   ;;  %3367 = vmatprep.subr.bf16.mxu1 %v13438_v30 }
  0x9d   : > { %1887 = vmatprep.mubr.bf16.mxu0 %v1399_v53  ;;  %2318 = vmatpush1.bf16.msra.mxu0 %v10767_v51  ;;  %v1420_v51 = vshll.u32 %v10626_v1, 16  ;;  %v10015_v1 = vld [vmem:[%s13431_s1 + $0x1a8] sm:$0xff]   ;;  %v851_v40 = vsel %vm719_vm1, %v846_v10, %v850_v16  ;;  %v865_v53 = vshrl.u32 %v10885_v47, 16  ;;  %v1446_v8 = vrot.slane %v1444_v0, 1  ;;  %v10045_v0 = vld [vmem:[%s13431_s1 + $0x1f0] sm:$0xff]  }
  0x9e   : > { %2319 = vmatprep.subr.bf16.mxu0 %v13438_v30  ;;  %2386 = vmatmul.mubr.bf16.gmra.mrb[44].mxu1 %v10796_v33  ;;  %v881_v19 = vrot.slane %v879_v61, 1  ;;  %v1456_v10 = vshll.u32 %v10683_v45, 16 }
  0x9f   : > { %2393 = vmatprep.mubr.bf16.mxu1 %v839_v22  ;;  %3368 = vmatpush1.bf16.msra.mxu1 %v10014_v34  ;;  %v1422_v33 = vrot.slane %v1420_v51, 1  ;;  %v870_v22 = vor.u32 %v869_v26, %v865_v53  ;;  %v10923_v34 = vld [vmem:[#allocation2 + $0xa8] sm:$0xff]   ;;  %v884_v51 = vshll.u32 %v10003_v37, 16 }
  0xa0   : > { %3369 = vmatprep.subr.bf16.mxu1 %v13438_v30  ;;  %v1458_v45 = vrot.slane %v1456_v10, 1  ;;  %v10042_v53 = vld [vmem:[%s13431_s1 + $0x1e8] sm:$0xff]   ;;  %v10017_v10 = vld [vmem:[#allocation2 + $0xd4] ss:$0 sps:$4 sm:$0xff]  }
  0xa1   : > { %2320 = vmatpush1.bf16.msra.mxu0 %v10785_v13  ;;  %v853_v13 = vshrl.u32 %v10858_v60, 16  ;;  %v1423_v39 = vsel %vm719_vm1, %v1418_v36, %v1422_v33  ;;  %v875_v58 = vsel %vm719_vm1, %v870_v22, %v874_v50  ;;  %v10007_v33 = vld [vmem:[#allocation2 + $0xb0] ss:$0 sps:$4 sm:$0xff]   ;;  %v889_v36 = vshrl.u32 %v10923_v34, 16  ;;  %v10013_v37 = vld [vmem:[#allocation2 + $0xc8] ss:$0 sps:$4 sm:$0xff]  }
  0xa2   : > { %9447 = vmatprep.subr.bf16.mxu0 %v10869_v63  ;;  %v1480_v50 = vshll.u32 %v10722_v11, 16  ;;  %v1487_v11 = vshll.u32 %v10726_v14, 16 }
  0xa3   : > { %3370 = vmatpush1.bf16.msra.mxu1 %v10015_v1  ;;  %v858_v42 = vor.u32 %v857_v18, %v853_v13  ;;  %v886_v1 = vrot.slane %v884_v51, 1  ;;  %v882_v13 = vor.u32 %v881_v19, %v877_v41  ;;  %v891_v18 = vshll.u32 %v10923_v34, 16  ;;  %v10982_v19 = vld [vmem:[#allocation2 + $0xcc] sm:$0xff]  }
  0xa4   : > { %1888 = vmatmul.mubr.bf16.gmra.mrb[32].mxu0 %v10581_v38  ;;  %v1425_v38 = vshrl.u32 %v10644_v55, 16  ;;  %3371 = vmatprep.subr.bf16.mxu1 %v13438_v30  ;;  %v920_v41 = vshll.u32 %v10013_v37, 16 }
  0xa5   : > { %1895 = vmatprep.mubr.bf16.mxu0 %v1411_v7  ;;  %v863_v46 = vsel %vm719_vm1, %v858_v42, %v862_v32  ;;  %v10032_v7 = vld [vmem:[%s13431_s1 + $0x1d0] sm:$0xff]   ;;  %v893_v31 = vrot.slane %v891_v18, 1  ;;  %v1468_v32 = vshll.u32 %v10696_v59, 16  ;;  %v1475_v59 = vshll.u32 %v10719_v29, 16 }
  0xa6   : > { %2394 = vmatmul.mubr.bf16.gmra.mrb[48].mxu1 %v10813_v4  ;;  %v1434_v4 = vrot.slane %v1432_v5, 1  ;;  %v1430_v3 = vor.u32 %v1429_v12, %v1425_v38  ;;  %v887_v5 = vsel %vm719_vm1, %v882_v13, %v886_v1  ;;  %v10040_v12 = vld [vmem:[%s13431_s1 + $0x1e0] sm:$0xff]   ;;  %v1499_v18 = vshll.u32 %v10759_v49, 16 }
  0xa7   : > { %2401 = vmatprep.mubr.bf16.mxu1 %v851_v40  ;;  %3372 = vmatpush1.bf16.msra.mxu1 %v10018_v43  ;;  %v1463_v43 = vshll.u32 %v10694_v52, 16  ;;  %v896_v40 = vshll.u32 %v10007_v33, 16  ;;  %v1470_v9 = vrot.slane %v1468_v32, 1  ;;  %v922_v33 = vrot.slane %v920_v41, 1  ;;  %v10055_v41 = vld [vmem:[#allocation2 + $0x38] ss:$0 sps:$4 sm:$0xff]  }
  0xa8   : > { %3373 = vmatprep.subr.bf16.mxu1 %v13438_v30  ;;  %v1435_v2 = vsel %vm719_vm1, %v1430_v3, %v1434_v4  ;;  %v10010_v4 = vld [vmem:[#allocation2 + $0xbc] ss:$0 sps:$4 sm:$0xff]   ;;  %v10961_v3 = vld [vmem:[#allocation2 + $0xc0] sm:$0xff]  }
  0xa9   : > { %v898_v42 = vrot.slane %v896_v40, 1  ;;  %v1497_v40 = vshrl.u32 %v10759_v49, 16 }
  0xab   : > { %3374 = vmatpush1.bf16.msra.mxu1 %v10022_v44  ;;  %v894_v44 = vor.u32 %v893_v31, %v889_v36  ;;  %v10994_v36 = vld [vmem:[#allocation2 + $0x18] sm:$0xff]  }
  0xac   : > { %1896 = vmatmul.mubr.bf16.gmra.mrb[36].mxu0 %v10606_v56  ;;  %v1437_v56 = vshrl.u32 %v10657_v27, 16  ;;  %3375 = vmatprep.subr.bf16.mxu1 %v13438_v30  ;;  %v2863_v32 = vshll.u32 %v10994_v36, 16 }
  0xad   : > { %1903 = vmatprep.mubr.bf16.mxu0 %v1423_v39  ;;  %v1465_v39 = vrot.slane %v1463_v43, 1  ;;  %v932_v43 = vshll.u32 %v10017_v10, 16 }
  0xae   : > { %2402 = vmatmul.mubr.bf16.gmra.mrb[52].mxu1 %v10833_v25  ;;  %v1451_v25 = vshll.u32 %v10681_v15, 16  ;;  %v1442_v6 = vor.u32 %v1441_v57, %v1437_v56  ;;  %v908_v56 = vshll.u32 %v10010_v4, 16  ;;  %v1477_v57 = vrot.slane %v1475_v59, 1  ;;  %v11014_v59 = vld [vmem:[#allocation2 + $0x14] ss:$0 sps:$4 sm:$0xff]  }
  0xaf   : > { %2409 = vmatprep.mubr.bf16.mxu1 %v863_v46  ;;  %3376 = vmatpush1.bf16.msra.mxu1 %v10026_v48  ;;  %v899_v46 = vsel %vm719_vm1, %v894_v44, %v898_v42  ;;  %v11006_v42 = vld [vmem:[#allocation2 + $0xc] sm:$0xff]   ;;  %v2861_v44 = vshrl.u32 %v10994_v36, 16  ;;  %v2865_v4 = vrot.slane %v2863_v32, 1 }
  0xb0   : > { %3377 = vmatprep.subr.bf16.mxu1 %v13438_v30  ;;  %v1453_v16 = vrot.slane %v1451_v25, 1  ;;  %v1447_v17 = vsel %vm719_vm1, %v1442_v6, %v1446_v8  ;;  %v910_v61 = vrot.slane %v908_v56, 1  ;;  %v10047_v8 = vld [vmem:[%s13431_s1 + $0x1f8] sm:$0xff]   ;;  %v913_v25 = vshrl.u32 %v10961_v3, 16 }
  0xb3   : > { %3378 = vmatpush1.bf16.msra.mxu1 %v10030_v35  ;;  %v915_v35 = vshll.u32 %v10961_v3, 16 }
  0xb4   : > { %1904 = vmatmul.mubr.bf16.gmra.mrb[40].mxu0 %v10621_v62  ;;  %3379 = vmatprep.subr.bf16.mxu1 %v13438_v30  ;;  %v1449_v62 = vshrl.u32 %v10681_v15, 16 }
  0xb5   : > { %1911 = vmatprep.mubr.bf16.mxu0 %v1435_v2 }
  0xb6   : > { %2410 = vmatmul.mubr.bf16.gmra.mrb[56].mxu1 %v10858_v60  ;;  %v10941_v60 = vld [vmem:[#allocation2 + $0xb4] sm:$0xff]   ;;  %v1454_v38 = vor.u32 %v1453_v16, %v1449_v62  ;;  %v1489_v62 = vrot.slane %v1487_v11, 1 }
  0xb7   : > { %2417 = vmatprep.mubr.bf16.mxu1 %v875_v58  ;;  %3380 = vmatpush1.bf16.msra.mxu1 %v10032_v7  ;;  %v903_v20 = vshll.u32 %v10941_v60, 16  ;;  %v901_v26 = vshrl.u32 %v10941_v60, 16  ;;  %v917_v58 = vrot.slane %v915_v35, 1  ;;  %v1492_v7 = vshll.u32 %v10735_v21, 16 }
  0xb8   : > { %3381 = vmatprep.subr.bf16.mxu1 %v13438_v30  ;;  %v1459_v24 = vsel %vm719_vm1, %v1454_v38, %v1458_v45  ;;  %v1501_v38 = vrot.slane %v1499_v18, 1 }
  0xb9   : > { %v905_v48 = vrot.slane %v903_v20, 1  ;;  %v918_v1 = vor.u32 %v917_v58, %v913_v25  ;;  %v1494_v13 = vrot.slane %v1492_v7, 1  ;;  %v11026_v25 = vld [vmem:[#allocation2 + $0x30] sm:$0xff]  }
  0xba   : > { %v1502_v49 = vor.u32 %v1501_v38, %v1497_v40  ;;  %v10023_v40 = vld [vmem:[%s13431_s1 + $0x88] sm:$0xff]  }
  0xbb   : > { %3382 = vmatpush1.bf16.msra.mxu1 %v10036_v28  ;;  %v906_v22 = vor.u32 %v905_v48, %v901_v26  ;;  %v923_v28 = vsel %vm719_vm1, %v918_v1, %v922_v33  ;;  %v2866_v48 = vor.u32 %v2865_v4, %v2861_v44  ;;  %v11060_v4 = vld [vmem:[#allocation2 + $0x2c] ss:$0 sps:$4 sm:$0xff]  }
  0xbc   : > { %1912 = vmatmul.mubr.bf16.gmra.mrb[44].mxu0 %v10644_v55  ;;  %3383 = vmatprep.subr.bf16.mxu1 %v13438_v30  ;;  %v1461_v55 = vshrl.u32 %v10694_v52, 16 }
  0xbd   : > { %1919 = vmatprep.mubr.bf16.mxu0 %v1447_v17  ;;  %v911_v6 = vsel %vm719_vm1, %v906_v22, %v910_v61  ;;  %v927_v17 = vshll.u32 %v10982_v19, 16  ;;  %v11022_v61 = vld [vmem:[#allocation2 + $0x18] sm:$0xff]  }
  0xbe   : > { %2418 = vmatmul.mubr.bf16.gmra.mrb[60].mxu1 %v10885_v47  ;;  %v1466_v47 = vor.u32 %v1465_v39, %v1461_v55  ;;  %v10049_v55 = vld [vmem:[#allocation2 + $0x20] ss:$0 sps:$4 sm:$0xff]   ;;  %v11003_v39 = vld [vmem:[#allocation2 + $0x8] ss:$0 sps:$4 sm:$0xff]   ;;  %v747_v18 = vshll.u32 %v11022_v61, 16  ;;  %v745_v38 = vshrl.u32 %v11022_v61, 16 }
  0xbf   : > { %2425 = vmatprep.mubr.bf16.mxu1 %v887_v5  ;;  %3384 = vmatpush1.bf16.msra.mxu1 %v10040_v12  ;;  %v929_v45 = vrot.slane %v927_v17, 1  ;;  %v934_v12 = vrot.slane %v932_v43, 1  ;;  %v2868_v20 = vshll.u32 %v10049_v55, 16  ;;  %v11044_v43 = vld [vmem:[#allocation2 + $0x3c] sm:$0xff]  }
  0xc0   : > { %3385 = vmatprep.subr.bf16.mxu1 %v13438_v30  ;;  %v1471_v2 = vsel %vm719_vm1, %v1466_v47, %v1470_v9  ;;  %v735_v47 = vshll.u32 %v11006_v42, 16 }
  0xc1   : > { %v2870_v56 = vrot.slane %v2868_v20, 1 }
  0xc2   : > { %v737_v37 = vrot.slane %v735_v47, 1  ;;  %v2897_v47 = vshrl.u32 %v11044_v43, 16 }
  0xc3   : > { %3386 = vmatpush1.bf16.msra.mxu1 %v10042_v53  ;;  %v11010_v53 = vld [vmem:[#allocation2 + $0x24] sm:$0xff]   ;;  %v2871_v35 = vsel %vm719_vm1, %v2866_v48, %v2870_v56  ;;  %v10031_v48 = vld [vmem:[%s13431_s1 + $0x98] sm:$0xff]  }
  0xc4   : > { %1920 = vmatmul.mubr.bf16.gmra.mrb[48].mxu0 %v10657_v27  ;;  %3387 = vmatprep.subr.bf16.mxu1 %v13438_v30  ;;  %v1473_v27 = vshrl.u32 %v10719_v29, 16  ;;  %v3097_v7 = vrot.slane %v11010_v53, 1 }
  0xc5   : > { %1927 = vmatprep.mubr.bf16.mxu0 %v1459_v24 }
  0xc6   : > { %2426 = vmatmul.mubr.bf16.gmra.mrb[64].mxu1 %v10903_v23  ;;  %v1482_v23 = vrot.slane %v1480_v50, 1  ;;  %v1478_v51 = vor.u32 %v1477_v57, %v1473_v27  ;;  %v2875_v27 = vshll.u32 %v11010_v53, 16  ;;  %v10260_v57 = vld [vmem:[#allocation2 + $0xcc] sm:$0xff]   ;;  %v733_v50 = vshrl.u32 %v11006_v42, 16 }
  0xc7   : > { %2433 = vmatprep.mubr.bf16.mxu1 %v899_v46  ;;  %3388 = vmatpush1.bf16.msra.mxu1 %v10045_v0  ;;  %v10052_v0 = vld [vmem:[#allocation2 + $0x2c] ss:$0 sps:$4 sm:$0xff]  }
  0xc8   : > { %3389 = vmatprep.subr.bf16.mxu1 %v13438_v30  ;;  %v1483_v16 = vsel %vm719_vm1, %v1478_v51, %v1482_v23  ;;  %v2877_v23 = vrot.slane %v2875_v27, 1  ;;  %v2880_v11 = vshll.u32 %v10052_v0, 16  ;;  %v3094_v51 = vrot.slane %v10994_v36, 1  ;;  %v11073_v27 = vld [vmem:[#allocation2 + $0x30] sm:$0xff]  }
  0xca   : > { %v2882_v10 = vrot.slane %v2880_v11, 1 }
  0xcb   : > { %3390 = vmatpush1.bf16.msra.mxu1 %v10047_v8  ;;  %v2873_v8 = vshrl.u32 %v11010_v53, 16 }
  0xcc   : > { %1928 = vmatmul.mubr.bf16.gmra.mrb[52].mxu0 %v10681_v15  ;;  %v1485_v15 = vshrl.u32 %v10726_v14, 16  ;;  %v925_v14 = vshrl.u32 %v10982_v19, 16 }
  0xcd   : > { %1935 = vmatprep.mubr.bf16.mxu0 %v1471_v2  ;;  %v740_v2 = vshll.u32 %v11014_v59, 16 }
  0xce   : > { %2434 = vmatmul.mubr.bf16.gmra.mrb[68].mxu1 %v10923_v34  ;;  %v1504_v34 = vshll.u32 %v10762_v54, 16  ;;  %v1490_v21 = vor.u32 %v1489_v62, %v1485_v15  ;;  %v930_v31 = vor.u32 %v929_v45, %v925_v14  ;;  %v3098_v15 = vrot.slane %v10052_v0, 1 }
  0xcf   : > { %2441 = vmatprep.mubr.bf16.mxu1 %v911_v6  ;;  %v3095_v6 = vrot.slane %v10049_v55, 1  ;;  %v2878_v62 = vor.u32 %v2877_v23, %v2873_v8  ;;  %v742_v17 = vrot.slane %v740_v2, 1  ;;  %v2892_v45 = vshll.u32 %v10055_v41, 16  ;;  %v11084_v8 = vld [vmem:[#allocation2 + $0x38] ss:$0 sps:$4 sm:$0xff]  }
  0xd0   : > { %v1506_v5 = vrot.slane %v1504_v34, 1  ;;  %v1495_v54 = vsel %vm719_vm1, %v1490_v21, %v1494_v13  ;;  %v935_v24 = vsel %vm719_vm1, %v930_v31, %v934_v12  ;;  %v11037_v33 = vsel %vm954_vm0, %v3097_v7, %v3098_v15  ;;  %v11039_v13 = vld [vmem:[#allocation2 + $0x20] ss:$0 sps:$4 sm:$0xff]   ;;  %v11051_v31 = vld [vmem:[#allocation2 + $0x24] sm:$0xff]  }
  0xd1   : > { %v11034_v1 = vsel %vm954_vm0, %v3094_v51, %v3095_v6  ;;  %v738_v34 = vor.u32 %v737_v37, %v733_v50  ;;  %v2883_v21 = vsel %vm719_vm1, %v2878_v62, %v2882_v10  ;;  %v10058_v12 = vld [vmem:[#allocation2 + $0x44] ss:$0 sps:$4 sm:$0xff]   ;;  %v759_v20 = vshll.u32 %v11051_v31, 16  ;;  %v10037_v7 = vld [vmem:[%s13431_s1 + $0xa8] sm:$0xff]  }
  0xd2   : > { %v1507_v26 = vsel %vm719_vm1, %v1502_v49, %v1506_v5  ;;  %v749_v5 = vrot.slane %v747_v18, 1  ;;  %v2899_v49 = vshll.u32 %v11044_v43, 16  ;;  %v757_v56 = vshrl.u32 %v11051_v31, 16 }
  0xd3   : > { %v743_v55 = vsel %vm719_vm1, %v738_v34, %v742_v17  ;;  %v761_v0 = vrot.slane %v759_v20, 1  ;;  %v769_v15 = vshrl.u32 %v11073_v27, 16  ;;  %v776_v10 = vshll.u32 %v11084_v8, 16 }
  0xd4   : > { %1936 = vmatmul.mubr.bf16.gmra.mrb[56].mxu0 %v10694_v52  ;;  %v10998_v52 = vld [vmem:[#allocation2] sm:$0xff]  }
  0xd5   : > { %1943 = vmatprep.mubr.bf16.mxu0 %v1483_v16  ;;  %v721_v9 = vshrl.u32 %v10998_v52, 16  ;;  %v2887_v16 = vshll.u32 %v11026_v25, 16  ;;  %v762_v23 = vor.u32 %v761_v0, %v757_v56 }
  0xd6   : > { %2442 = vmatmul.mubr.bf16.gmra.mrb[72].mxu1 %v10941_v60  ;;  %v723_v60 = vshll.u32 %v10998_v52, 16 }
  0xd7   : > { %2449 = vmatprep.mubr.bf16.mxu1 %v923_v28  ;;  %v2885_v28 = vshrl.u32 %v11026_v25, 16  ;;  %v2889_v14 = vrot.slane %v2887_v16, 1  ;;  %v11097_v16 = vld [vmem:[#allocation2 + $0x3c] sm:$0xff]  }
  0xd8   : > { %v725_v46 = vrot.slane %v723_v60, 1  ;;  %v2894_v60 = vrot.slane %v2892_v45, 1  ;;  %v11108_v45 = vld [vmem:[#allocation2 + $0x44] ss:$0 sps:$4 sm:$0xff]  }
  0xd9   : > { %v2890_v32 = vor.u32 %v2889_v14, %v2885_v28  ;;  %v778_v28 = vrot.slane %v776_v10, 1  ;;  %v10041_v14 = vld [vmem:[%s13431_s1 + $0xb0] sm:$0xff]   ;;  %v958_v10 = vrot.slane %v11006_v42, 1 }
  0xda   : > { %v726_v22 = vor.u32 %v725_v46, %v721_v9  ;;  %v2901_v9 = vrot.slane %v2899_v49, 1  ;;  %v2904_v46 = vshll.u32 %v10058_v12, 16  ;;  %v788_v49 = vshll.u32 %v11108_v45, 16 }
  0xdc   : > { %1944 = vmatmul.mubr.bf16.gmra.mrb[60].mxu0 %v10719_v29  ;;  %v728_v29 = vshll.u32 %v11003_v39, 16  ;;  %v2902_v50 = vor.u32 %v2901_v9, %v2897_v47  ;;  %v2906_v37 = vrot.slane %v2904_v46, 1  ;;  %v790_v9 = vrot.slane %v788_v49, 1  ;;  %v11130_v46 = vld [vmem:[%s13431_s1 + $0x200] sm:$0xff]  }
  0xdd   : > { %1951 = vmatprep.mubr.bf16.mxu0 %v1495_v54  ;;  %v752_v54 = vshll.u32 %v11039_v13, 16 }
  0xde   : > { %2450 = vmatmul.mubr.bf16.gmra.mrb[76].mxu1 %v10961_v3  ;;  %v730_v3 = vrot.slane %v728_v29, 1  ;;  %v2895_v29 = vsel %vm719_vm1, %v2890_v32, %v2894_v60  ;;  %v2907_v11 = vsel %vm719_vm1, %v2902_v50, %v2906_v37  ;;  %v781_v32 = vshrl.u32 %v11097_v16, 16  ;;  %v11138_v50 = vld [vmem:[#allocation2 + $0x74] ss:$0 sps:$4 sm:$0xff]  }
  0xdf   : > { %2457 = vmatprep.mubr.bf16.mxu1 %v935_v24  ;;  %v10027_v24 = vld [vmem:[%s13431_s1 + $0x90] sm:$0xff]   ;;  %v754_v44 = vrot.slane %v752_v54, 1 }
  0xe0   : > { %v731_v58 = vsel %vm719_vm1, %v726_v22, %v730_v3 }
  0xe4   : > { %1952 = vmatmul.mubr.bf16.gmra.mrb[64].mxu0 %v10260_v57  ;;  %v11076_v57 = vld [vmem:[#allocation2 + $0x50] ss:$0 sps:$4 sm:$0xff]  }
  0xe5   : > { %1959 = vmatprep.mubr.bf16.mxu0 %v1507_v26  ;;  %v11066_v26 = vld [vmem:[#allocation2 + $0x48] sm:$0xff]   ;;  %v2916_v6 = vshll.u32 %v11076_v57, 16 }
  0xe6   : > { %2458 = vmatmul.mubr.bf16.gmra.mrb[80].mxu1 %v10982_v19  ;;  %v10261_v19 = vld [vmem:[#allocation2 + $0xd8] sm:$0xff]   ;;  %v2911_v2 = vshll.u32 %v11066_v26, 16  ;;  %v2909_v41 = vshrl.u32 %v11066_v26, 16 }
  0xe7   : > { %3391 = vmatprep.mubr.bf16.mxu1 %v2871_v35  ;;  %v10035_v35 = vld [vmem:[%s13431_s1 + $0xa0] sm:$0xff]   ;;  %v2918_v34 = vrot.slane %v2916_v6, 1  ;;  %v11149_v6 = vld [vmem:[#allocation2 + $0x78] sm:$0xff]  }
  0xe8   : > { %v2913_v51 = vrot.slane %v2911_v2, 1 }
  0xea   : > { %v2914_v18 = vor.u32 %v2913_v51, %v2909_v41  ;;  %v2952_v51 = vshll.u32 %v11138_v50, 16 }
  0xec   : > { %1960 = vmatmul.mubr.bf16.gmra.mrb[68].mxu0 %v10261_v19  ;;  %v11100_v19 = vld [vmem:[#allocation2 + $0x5c] ss:$0 sps:$4 sm:$0xff]  }
  0xed   : > { %2321 = vmatprep.mubr.bf16.mxu0 %v731_v58  ;;  %v11090_v58 = vld [vmem:[#allocation2 + $0x54] sm:$0xff]   ;;  %v2928_v12 = vshll.u32 %v11100_v19, 16 }
  0xee   : > { %3392 = vmatmul.mubr.bf16.vlgmr.msra.gmra.mrb[84].mxu1 %v10994_v36  ;;  %v750_v36 = vor.u32 %v749_v5, %v745_v38  ;;  %v2919_v38 = vsel %vm719_vm1, %v2914_v18, %v2918_v34  ;;  %v2921_v5 = vshrl.u32 %v11090_v58, 16  ;;  %v959_v18 = vrot.slane %v11014_v59, 1  ;;  %v11175_v59 = vld [vmem:[#allocation2 + $0x8c] ss:$0 sps:$4 sm:$0xff]  }
  0xef   : > { %3399 = vmatprep.mubr.bf16.mxu1 %v2883_v21  ;;  %v2923_v21 = vshll.u32 %v11090_v58, 16  ;;  %v961_v34 = vrot.slane %v11022_v61, 1 }
  0xf0   : > { %v755_v3 = vsel %vm719_vm1, %v750_v36, %v754_v44  ;;  %v11122_v44 = vld [vmem:[#allocation2 + $0x68] ss:$0 sps:$4 sm:$0xff]  }
  0xf1   : > { %v2925_v54 = vrot.slane %v2923_v21, 1  ;;  %v962_v21 = vrot.slane %v11039_v13, 1  ;;  %v964_v13 = vrot.slane %v11051_v31, 1 }
  0xf3   : > { %v2926_v36 = vor.u32 %v2925_v54, %v2921_v5  ;;  %v11172_v54 = vld [vmem:[#allocation2 + $0x84] sm:$0xff]  }
  0xf4   : > { %2322 = vmatmul.mubr.bf16.vlgmr.msra.gmra.mrb[72].mxu0 %v10998_v52 }
  0xf5   : > { %9448 = vmatpush3.bf16.msra.mxu0 %v10869_v63  ;;  %2329 = vmatprep.mubr.bf16.mxu0 %v743_v55  ;;  %v764_v63 = vshll.u32 %v11060_v4, 16  ;;  %v11114_v55 = vld [vmem:[#allocation2 + $0x60] sm:$0xff]  }
  0xf6   : > { %9449 = vmatprep.subr.bf16.mxu0 %v10023_v40  ;;  %3400 = vmatmul.mubr.bf16.gmra.mrb[88].mxu1 %v11010_v53  ;;  %v771_v53 = vshll.u32 %v11073_v27, 16  ;;  %v2935_v47 = vshll.u32 %v11114_v55, 16  ;;  %v2933_v56 = vshrl.u32 %v11114_v55, 16 }
  0xf7   : > { %3407 = vmatprep.mubr.bf16.mxu1 %v2895_v29  ;;  %v766_v22 = vrot.slane %v764_v63, 1  ;;  %v2930_v29 = vrot.slane %v2928_v12, 1  ;;  %v2940_v63 = vshll.u32 %v11122_v44, 16  ;;  %v10053_v12 = vld [vmem:[%s13431_s1 + $0x208] sm:$0xff]  }
  0xf8   : > { %v773_v62 = vrot.slane %v771_v53, 1  ;;  %v2937_v0 = vrot.slane %v2935_v47, 1  ;;  %v955_v53 = vrot.slane %v10998_v52, 1 }
  0xf9   : > { %9450 = vmatpush3.bf16.msra.mxu0 %v10023_v40  ;;  %v767_v17 = vsel %vm719_vm1, %v762_v23, %v766_v22  ;;  %v2942_v22 = vrot.slane %v2940_v63, 1  ;;  %v956_v23 = vrot.slane %v11003_v39, 1  ;;  %v2959_v39 = vshll.u32 %v11149_v6, 16  ;;  %v11208_v63 = vld [vmem:[#allocation2 + $0x98] ss:$0 sps:$4 sm:$0xff]  }
  0xfa   : > { %9451 = vmatprep.subr.bf16.mxu0 %v10027_v24  ;;  %v774_v40 = vor.u32 %v773_v62, %v769_v15  ;;  %v2938_v2 = vor.u32 %v2937_v0, %v2933_v56  ;;  %v2954_v62 = vrot.slane %v2952_v51, 1  ;;  %v10262_v51 = vld [vmem:[#allocation2 + $0x48] sm:$0xff]  }
  0xfb   : > { %v957_v15 = vsel %vm954_vm0, %v955_v53, %v956_v23 }
  0xfc   : > { %2330 = vmatmul.mubr.bf16.gmra.mrb[76].mxu0 %v11006_v42  ;;  %v779_v20 = vsel %vm719_vm1, %v774_v40, %v778_v28 }
  0xfd   : > { %9452 = vmatpush3.bf16.msra.mxu0 %v10027_v24  ;;  %2337 = vmatprep.mubr.bf16.mxu0 %v755_v3  ;;  %v10046_v24 = vld [vmem:[%s13431_s1 + $0xb8] sm:$0xff]   ;;  %v11135_v3 = vld [vmem:[#allocation2 + $0x6c] sm:$0xff]  }
  0xfe   : > { %9453 = vmatprep.subr.bf16.mxu0 %v10031_v48  ;;  %3408 = vmatmul.mubr.bf16.gmra.mrb[92].mxu1 %v11026_v25  ;;  %v783_v25 = vshll.u32 %v11097_v16, 16 }
  0xff   : > { %3415 = vmatprep.mubr.bf16.mxu1 %v2907_v11  ;;  %v2945_v11 = vshrl.u32 %v11135_v3, 16 }
 0x100   : > { %v785_v60 = vrot.slane %v783_v25, 1  ;;  %v2957_v25 = vshrl.u32 %v11149_v6, 16 }
 0x101   : > { %9454 = vmatpush3.bf16.msra.mxu0 %v10031_v48  ;;  %v2931_v48 = vsel %vm719_vm1, %v2926_v36, %v2930_v29  ;;  %v967_v29 = vrot.slane %v11073_v27, 1 }
 0x102   : > { %9455 = vmatprep.subr.bf16.mxu0 %v10035_v35 }
 0x104   : > { %2338 = vmatmul.mubr.bf16.gmra.mrb[80].mxu0 %v11022_v61  ;;  %v960_v61 = vsel %vm954_vm0, %v958_v10, %v959_v18  ;;  %v10062_v10 = vld [vmem:[%s13431_s1 + $0x220] sm:$0xff]  }
 0x105   : > { %2345 = vmatprep.mubr.bf16.mxu0 %v767_v17  ;;  %9456 = vmatpush3.bf16.msra.mxu0 %v10035_v35  ;;  %v2947_v35 = vshll.u32 %v11135_v3, 16 }
 0x106   : > { %9457 = vmatprep.subr.bf16.mxu0 %v10037_v7  ;;  %3416 = vmatmul.mubr.bf16.gmra.mrb[96].mxu1 %v11044_v43  ;;  %v786_v43 = vor.u32 %v785_v60, %v781_v32  ;;  %v963_v32 = vsel %vm954_vm0, %v961_v34, %v962_v21 }
 0x107   : > { %3423 = vmatprep.mubr.bf16.mxu1 %v2919_v38  ;;  %v2949_v41 = vrot.slane %v2947_v35, 1  ;;  %v2961_v38 = vrot.slane %v2959_v39, 1 }
 0x108   : > { %v791_v37 = vsel %vm719_vm1, %v786_v43, %v790_v9  ;;  %v2976_v9 = vshll.u32 %v11175_v59, 16 }
 0x109   : > { %9458 = vmatpush3.bf16.msra.mxu0 %v10037_v7  ;;  %v11152_v7 = vld [vmem:[#allocation2 + $0x80] ss:$0 sps:$4 sm:$0xff]   ;;  %v2950_v52 = vor.u32 %v2949_v41, %v2945_v11  ;;  %v2962_v60 = vor.u32 %v2961_v38, %v2957_v25  ;;  %v970_v11 = vrot.slane %v11097_v16, 1  ;;  %v971_v41 = vrot.slane %v11108_v45, 1 }
 0x10a   : > { %9459 = vmatprep.subr.bf16.mxu0 %v10041_v14  ;;  %v2964_v5 = vshll.u32 %v11152_v7, 16  ;;  %v2988_v45 = vshll.u32 %v11208_v63, 16  ;;  %v11229_v25 = vld [vmem:[#allocation2 + $0x9c] sm:$0xff]  }
 0x10b   : > { %v2955_v42 = vsel %vm719_vm1, %v2950_v52, %v2954_v62  ;;  %v10263_v52 = vld [vmem:[#allocation2 + $0x50] ss:$0 sps:$4 sm:$0xff]  }
 0x10c   : > { %2346 = vmatmul.mubr.bf16.gmra.mrb[84].mxu0 %v11051_v31  ;;  %v2966_v49 = vrot.slane %v2964_v5, 1  ;;  %v968_v31 = vrot.slane %v11084_v8, 1  ;;  %v2969_v8 = vshrl.u32 %v11172_v54, 16  ;;  %v974_v62 = vrot.slane %v10263_v52, 1  ;;  %v10065_v5 = vld [vmem:[%s13431_s1 + $0x228] sm:$0xff]  }
 0x10d   : > { %2353 = vmatprep.mubr.bf16.mxu0 %v779_v20  ;;  %9460 = vmatpush3.bf16.msra.mxu0 %v10041_v14  ;;  %v965_v20 = vrot.slane %v11060_v4, 1  ;;  %v10056_v4 = vld [vmem:[%s13431_s1 + $0x210] sm:$0xff]  }
 0x10e   : > { %9461 = vmatprep.subr.bf16.mxu0 %v10046_v24  ;;  %3424 = vmatmul.mubr.bf16.gmra.mrb[100].mxu1 %v11066_v26  ;;  %v2943_v26 = vsel %vm719_vm1, %v2938_v2, %v2942_v22  ;;  %v2978_v2 = vrot.slane %v2976_v9, 1  ;;  %v969_v35 = vsel %vm954_vm0, %v967_v29, %v968_v31  ;;  %v10265_v29 = vld [vmem:[#allocation2 + $0x5c] ss:$0 sps:$4 sm:$0xff]   ;;  %v10266_v9 = vld [vmem:[#allocation2 + $0x60] sm:$0xff]  }
 0x10f   : > { %3431 = vmatprep.mubr.bf16.mxu1 %v2931_v48  ;;  %v11195_v48 = vld [vmem:[#allocation2 + $0x90] sm:$0xff]   ;;  %v977_v31 = vrot.slane %v10265_v29, 1 }
 0x110   : > { %v2983_v22 = vshll.u32 %v11195_v48, 16 }
 0x111   : > { %9462 = vmatpush3.bf16.msra.mxu0 %v10046_v24  ;;  %v2971_v24 = vshll.u32 %v11172_v54, 16 }
 0x112   : > { %9499 = vmatprep.subr.bf16.mxu0 %v11130_v46  ;;  %v2985_v21 = vrot.slane %v2983_v22, 1  ;;  %v2993_v22 = vshrl.u32 %v11229_v25, 16 }
 0x113   : > { %v2973_v0 = vrot.slane %v2971_v24, 1  ;;  %v10264_v24 = vld [vmem:[#allocation2 + $0x54] sm:$0xff]  }
 0x114   : > { %2354 = vmatmul.mubr.bf16.gmra.mrb[88].mxu0 %v11073_v27  ;;  %v2967_v27 = vsel %vm719_vm1, %v2962_v60, %v2966_v49 }
 0x115   : > { %2361 = vmatprep.mubr.bf16.mxu0 %v791_v37  ;;  %v966_v37 = vsel %vm954_vm0, %v964_v13, %v965_v20  ;;  %v2974_v53 = vor.u32 %v2973_v0, %v2969_v8  ;;  %v2990_v13 = vrot.slane %v2988_v45, 1  ;;  %v976_v20 = vrot.slane %v10264_v24, 1 }
 0x116   : > { %3432 = vmatmul.mubr.bf16.gmra.mrb[104].mxu1 %v11090_v58 }
 0x117   : > { %3439 = vmatprep.mubr.bf16.mxu1 %v2943_v26  ;;  %v2979_v34 = vsel %vm719_vm1, %v2974_v53, %v2978_v2 }
 0x118   : > { %v11157_v17 = vpop.f32.mrb[0].mxu1 }
 0x119   : > { %v11163_v28 = vpop.f32.mrb[1].mxu1 }
 0x11a   : > { %v11165_v14 = vpop.f32.mrb[2].mxu1 }
 0x11b   : > { %v11168_v40 = vpop.f32.mrb[3].mxu1 }
 0x11c   : > { %2362 = vmatmul.mubr.bf16.gmra.mrb[92].mxu0 %v11097_v16  ;;  %v2981_v16 = vshrl.u32 %v11195_v48, 16 }
 0x11d   : > { %9463 = vmatprep.mubr.bf16.mxu0 %v957_v15  ;;  %v973_v15 = vrot.slane %v10262_v51, 1 }
 0x11e   : > { %3440 = vmatmul.mubr.bf16.gmra.mrb[108].mxu1 %v11114_v55 }
 0x11f   : > { %3447 = vmatprep.mubr.bf16.mxu1 %v2955_v42  ;;  %v972_v42 = vsel %vm954_vm0, %v970_v11, %v971_v41  ;;  %v975_v38 = vsel %vm954_vm0, %v973_v15, %v974_v62  ;;  %v11254_v11 = vld [vmem:[#allocation2 + $0xa8] sm:$0xff]   ;;  %v978_v62 = vsel %vm954_vm0, %v976_v20, %v977_v31  ;;  %v10270_v20 = vld [vmem:[#allocation2 + $0x78] sm:$0xff]   ;;  %v10271_v31 = vld [vmem:[#allocation2 + $0x80] ss:$0 sps:$4 sm:$0xff]  }
 0x120   : > { %v11185_v36 = vpop.f32.mrb[4].mxu1  ;;  %v985_v29 = vrot.slane %v10270_v20, 1 }
 0x121   : > { %v11189_v47 = vpop.f32.mrb[5].mxu1 }
 0x122   : > { %v11193_v43 = vpop.f32.mrb[6].mxu1 }
 0x123   : > { %v11200_v56 = vpop.f32.mrb[7].mxu1 }
 0x124   : > { %9464 = vmatmul.mubr.bf16.vlgmr.msra.gmra.mrb[96].mxu0 %v960_v61  ;;  %v2986_v61 = vor.u32 %v2985_v21, %v2981_v16 }
 0x125   : > { %9500 = vmatpush3.bf16.msra.mxu0 %v11130_v46  ;;  %9467 = vmatprep.mubr.bf16.mxu0 %v963_v32  ;;  %v10059_v46 = vld [vmem:[%s13431_s1 + $0x218] sm:$0xff]   ;;  %v2995_v32 = vshll.u32 %v11229_v25, 16 }
 0x126   : > { %9501 = vmatprep.subr.bf16.mxu0 %v10053_v12  ;;  %3448 = vmatmul.mubr.bf16.gmra.mrb[112].mxu1 %v11135_v3  ;;  %v2991_v2 = vsel %vm719_vm1, %v2986_v61, %v2990_v13 }
 0x127   : > { %3455 = vmatprep.mubr.bf16.mxu1 %v2967_v27  ;;  %v10267_v27 = vld [vmem:[#allocation2 + $0x68] ss:$0 sps:$4 sm:$0xff]  }
 0x128   : > { %v11213_v23 = vpop.f32.mrb[8].mxu1  ;;  %v980_v8 = vrot.slane %v10267_v27, 1 }
 0x129   : > { %9502 = vmatpush3.bf16.msra.mxu0 %v10053_v12  ;;  %v11215_v26 = vpop.f32.mrb[9].mxu1  ;;  %v11237_v12 = vld [vmem:[#allocation2 + $0xa4] ss:$0 sps:$4 sm:$0xff]  }
 0x12a   : > { %9503 = vmatprep.subr.bf16.mxu0 %v10056_v4  ;;  %v11219_v39 = vpop.f32.mrb[10].mxu1  ;;  %v3000_v53 = vshll.u32 %v11237_v12, 16 }
 0x12b   : > { %v11224_v18 = vpop.f32.mrb[11].mxu1 }
 0x12c   : > { %9468 = vmatmul.mubr.bf16.gmra.mrb[100].mxu0 %v966_v37  ;;  %v10068_v37 = vld [vmem:[%s13431_s1 + $0x230] sm:$0xff]   ;;  %v3002_v45 = vrot.slane %v3000_v53, 1 }
 0x12d   : > { %9471 = vmatprep.mubr.bf16.mxu0 %v969_v35  ;;  %9504 = vmatpush3.bf16.msra.mxu0 %v10056_v4  ;;  %v979_v4 = vrot.slane %v10266_v9, 1  ;;  %v2997_v35 = vrot.slane %v2995_v32, 1  ;;  %v10269_v32 = vld [vmem:[#allocation2 + $0x74] ss:$0 sps:$4 sm:$0xff]   ;;  %v986_v9 = vrot.slane %v10271_v31, 1 }
 0x12e   : > { %9505 = vmatprep.subr.bf16.mxu0 %v10059_v46  ;;  %3456 = vmatmul.mubr.bf16.gmra.mrb[116].mxu1 %v11149_v6  ;;  %v983_v24 = vrot.slane %v10269_v32, 1  ;;  %v11282_v53 = vld [vmem:[#allocation2 + $0xb4] sm:$0xff]  }
 0x12f   : > { %3463 = vmatprep.mubr.bf16.mxu1 %v2979_v34  ;;  %v2998_v21 = vor.u32 %v2997_v35, %v2993_v22  ;;  %v10274_v31 = vld [vmem:[#allocation2 + $0x90] sm:$0xff]  }
 0x130   : > { %v11240_v60 = vpop.f32.mrb[12].mxu1 }
 0x131   : > { %9506 = vmatpush3.bf16.msra.mxu0 %v10059_v46  ;;  %v11242_v49 = vpop.f32.mrb[13].mxu1 }
 0x132   : > { %9507 = vmatprep.subr.bf16.mxu0 %v10062_v10  ;;  %v11244_v0 = vpop.f32.mrb[14].mxu1 }
 0x133   : > { %v11246_v46 = vpop.f32.mrb[15].mxu1 }
 0x134   : > { %9472 = vmatmul.mubr.bf16.gmra.mrb[104].mxu0 %v972_v42  ;;  %v11268_v42 = vld [vmem:[#allocation2 + $0xb0] ss:$0 sps:$4 sm:$0xff]  }
 0x135   : > { %9475 = vmatprep.mubr.bf16.mxu0 %v975_v38  ;;  %9508 = vmatpush3.bf16.msra.mxu0 %v10062_v10  ;;  %v981_v10 = vsel %vm954_vm0, %v979_v4, %v980_v8  ;;  %v3007_v38 = vshll.u32 %v11254_v11, 16  ;;  %v3003_v8 = vsel %vm719_vm1, %v2998_v21, %v3002_v45  ;;  %v3012_v35 = vshll.u32 %v11268_v42, 16 }
 0x136   : > { %9509 = vmatprep.subr.bf16.mxu0 %v10065_v5  ;;  %3464 = vmatmul.mubr.bf16.gmra.mrb[120].mxu1 %v11172_v54 }
 0x137   : > { %v1825_v41 = vpop.f32.mrb[0].mxu0  ;;  %3471 = vmatprep.mubr.bf16.mxu1 %v2991_v2  ;;  %v3005_v2 = vshrl.u32 %v11254_v11, 16  ;;  %v3009_v22 = vrot.slane %v3007_v38, 1  ;;  %v3014_v45 = vrot.slane %v3012_v35, 1  ;;  %v11290_v38 = vld [vmem:[#allocation2 + $0xbc] ss:$0 sps:$4 sm:$0xff]  }
 0x138   : > { %v11257_v51 = vadd.f32 %v11163_v28, %v1825_v41  ;;  %v1827_v15 = vpop.f32.mrb[1].mxu0  ;;  %v10073_v28 = vld [vmem:[%s13431_s1 + $0x238] sm:$0xff]  }
 0x139   : > { %v1828_v52 = vpop.f32.mrb[2].mxu0  ;;  %9510 = vmatpush3.bf16.msra.mxu0 %v10065_v5  ;;  %v11271_v61 = vpop.f32.mrb[16].mxu1  ;;  %v3010_v21 = vor.u32 %v3009_v22, %v3005_v2 }
 0x13a   : > { %13442 = vst [vmem:[#allocation8_spill] sm:$0xff] %v11257_v51  ;;  %v11263_v34 = vadd.f32 %v11168_v40, %v1828_v52  ;;  %v1830_v16 = vpop.f32.mrb[3].mxu0  ;;  %9511 = vmatprep.subr.bf16.mxu0 %v10068_v37  ;;  %v11273_v5 = vpop.f32.mrb[17].mxu1  ;;  %v10268_v40 = vld [vmem:[#allocation2 + $0x6c] sm:$0xff]   ;;  %v11340_v51 = vld [vmem:[#allocation2 + $0xd4] ss:$0 sps:$4 sm:$0xff]  }
 0x13b   : > { %v982_v13 = vrot.slane %v10268_v40, 1  ;;  %v11275_v4 = vpop.f32.mrb[18].mxu1  ;;  %v3019_v40 = vshll.u32 %v11282_v53, 16 }
 0x13c   : > { %13443 = vst [vmem:[#allocation9_spill] sm:$0xff] %v11263_v34  ;;  %9476 = vmatmul.mubr.bf16.gmra.mrb[108].mxu0 %v978_v62  ;;  %v11277_v27 = vpop.f32.mrb[19].mxu1 }
 0x13d   : > { %9479 = vmatprep.mubr.bf16.mxu0 %v981_v10  ;;  %9512 = vmatpush3.bf16.msra.mxu0 %v10068_v37  ;;  %v984_v62 = vsel %vm954_vm0, %v982_v13, %v983_v24  ;;  %v987_v10 = vsel %vm954_vm0, %v985_v29, %v986_v9  ;;  %v10272_v13 = vld [vmem:[#allocation2 + $0x84] sm:$0xff]   ;;  %v991_v9 = vrot.slane %v10274_v31, 1 }
 0x13e   : > { %9513 = vmatprep.subr.bf16.mxu0 %v10073_v28  ;;  %3472 = vmatmul.mubr.bf16.gmra.mrb[124].mxu1 %v11195_v48  ;;  %v988_v24 = vrot.slane %v10272_v13, 1 }
 0x13f   : > { %v1833_v41 = vpop.f32.mrb[4].mxu0  ;;  %3479 = vmatprep.mubr.bf16.mxu1 %v3003_v8  ;;  %v10275_v8 = vld [vmem:[#allocation2 + $0x98] ss:$0 sps:$4 sm:$0xff]  }
 0x140   : > { %v1835_v15 = vpop.f32.mrb[5].mxu0  ;;  %v11286_v52 = vadd.f32 %v11157_v17, %v1833_v41  ;;  %v992_v2 = vrot.slane %v10275_v8, 1  ;;  %v3017_v41 = vshrl.u32 %v11282_v53, 16 }
 0x141   : > { %v1836_v37 = vpop.f32.mrb[6].mxu0  ;;  %9514 = vmatpush3.bf16.msra.mxu0 %v10073_v28  ;;  %v11296_v20 = vpop.f32.mrb[20].mxu1  ;;  %v10273_v28 = vld [vmem:[#allocation2 + $0x8c] ss:$0 sps:$4 sm:$0xff]   ;;  %v3021_v15 = vrot.slane %v3019_v40, 1 }
 0x142   : > { %13444 = vst [vmem:[#allocation10_spill] sm:$0xff] %v11286_v52  ;;  %v1838_v16 = vpop.f32.mrb[7].mxu0  ;;  %v11294_v32 = vadd.f32 %v11165_v14, %v1836_v37  ;;  %v11298_v17 = vpop.f32.mrb[21].mxu1  ;;  %v989_v29 = vrot.slane %v10273_v28, 1  ;;  %v3015_v14 = vsel %vm719_vm1, %v3010_v21, %v3014_v45  ;;  %v3024_v37 = vshll.u32 %v11290_v38, 16 }
 0x143   : > { %v11300_v22 = vpop.f32.mrb[22].mxu1  ;;  %v993_v8 = vsel %vm954_vm0, %v991_v9, %v992_v2  ;;  %v3022_v40 = vor.u32 %v3021_v15, %v3017_v41  ;;  %v10277_v9 = vld [vmem:[#allocation2 + $0xa4] ss:$0 sps:$4 sm:$0xff]  }
 0x144   : > { %13445 = vst [vmem:[#allocation11_spill] sm:$0xff] %v11294_v32  ;;  %9480 = vmatmul.mubr.bf16.gmra.mrb[112].mxu0 %v984_v62  ;;  %v11302_v35 = vpop.f32.mrb[23].mxu1  ;;  %v11307_v62 = vld [vmem:[#allocation2 + $0xc0] sm:$0xff]   ;;  %v990_v31 = vsel %vm954_vm0, %v988_v24, %v989_v29  ;;  %v3026_v30 = vrot.slane %v3024_v37, 1  ;;  %v11318_v32 = vld [vmem:[#allocation2 + $0xc8] ss:$0 sps:$4 sm:$0xff]  }
 0x145   : > { %9483 = vmatprep.mubr.bf16.mxu0 %v987_v10  ;;  %v10276_v24 = vld [vmem:[#allocation2 + $0x9c] sm:$0xff]   ;;  %v995_v2 = vrot.slane %v10277_v9, 1 }
 0x146   : > { %3480 = vmatmul.mubr.bf16.gmra.mrb[128].mxu1 %v11229_v25  ;;  %v994_v29 = vrot.slane %v10276_v24, 1  ;;  %v3027_v37 = vsel %vm719_vm1, %v3022_v40, %v3026_v30 }
 0x147   : > { %v1841_v10 = vpop.f32.mrb[8].mxu0  ;;  %3487 = vmatprep.mubr.bf16.mxu1 %v3015_v14  ;;  %v10278_v14 = vld [vmem:[#allocation2 + $0xa8] sm:$0xff]  }
 0x148   : > { %v11310_v16 = vadd.f32 %v11189_v47, %v1841_v10  ;;  %v1843_v13 = vpop.f32.mrb[9].mxu0  ;;  %v3031_v47 = vshll.u32 %v11307_v62, 16 }
 0x149   : > { %v1844_v28 = vpop.f32.mrb[10].mxu0  ;;  %v11321_v10 = vpop.f32.mrb[24].mxu1 }
 0x14a   : > { %13446 = vst [vmem:[#allocation12_spill] sm:$0xff] %v11310_v16  ;;  %v11316_v21 = vadd.f32 %v11200_v56, %v1844_v28  ;;  %v1846_v45 = vpop.f32.mrb[11].mxu0  ;;  %13448 = vst [vmem:[#allocation14_spill] sm:$0xff] %v11321_v10  ;;  %v11323_v13 = vpop.f32.mrb[25].mxu1  ;;  %v997_v56 = vrot.slane %v10278_v14, 1  ;;  %v3036_v16 = vshll.u32 %v11318_v32, 16 }
 0x14b   : > { %v10279_v28 = vld [vmem:[#allocation2 + $0xb0] ss:$0 sps:$4 sm:$0xff]   ;;  %v11325_v41 = vpop.f32.mrb[26].mxu1 }
 0x14c   : > { %13447 = vst [vmem:[#allocation13_spill] sm:$0xff] %v11316_v21  ;;  %9484 = vmatmul.mubr.bf16.gmra.mrb[116].mxu0 %v990_v31  ;;  %v998_v45 = vrot.slane %v10279_v28, 1  ;;  %13449 = vst [vmem:[#allocation15_spill] sm:$0xff] %v11325_v41  ;;  %v11327_v15 = vpop.f32.mrb[27].mxu1  ;;  %v3029_v21 = vshrl.u32 %v11307_v62, 16  ;;  %v3033_v31 = vrot.slane %v3031_v47, 1  ;;  %v996_v28 = vsel %vm954_vm0, %v994_v29, %v995_v2 }
 0x14d   : > { %9487 = vmatprep.mubr.bf16.mxu0 %v993_v8  ;;  %v11332_v8 = vld [vmem:[#allocation2 + $0xcc] sm:$0xff]   ;;  %v3038_v47 = vrot.slane %v3036_v16, 1  ;;  %v10280_v29 = vld [vmem:[#allocation2 + $0xb4] sm:$0xff]   ;;  %v10282_v16 = vld [vmem:[#allocation2 + $0xc0] sm:$0xff]  }
 0x14e   : > { %3488 = vmatmul.mubr.bf16.gmra.mrb[132].mxu1 %v11254_v11  ;;  %v999_v34 = vsel %vm954_vm0, %v997_v56, %v998_v45  ;;  %v3034_v40 = vor.u32 %v3033_v31, %v3029_v21  ;;  %v3043_v41 = vshll.u32 %v11332_v8, 16  ;;  %v1000_v2 = vrot.slane %v10280_v29, 1  ;;  %v10281_v56 = vld [vmem:[#allocation2 + $0xbc] ss:$0 sps:$4 sm:$0xff]   ;;  %v10283_v31 = vld [vmem:[#allocation2 + $0xc8] ss:$0 sps:$4 sm:$0xff]  }
 0x14f   : > { %v1849_v24 = vpop.f32.mrb[12].mxu0  ;;  %3495 = vmatprep.mubr.bf16.mxu1 %v3027_v37  ;;  %v1001_v45 = vrot.slane %v10281_v56, 1  ;;  %v1003_v21 = vrot.slane %v10282_v16, 1 }
 0x150   : > { %v1851_v52 = vpop.f32.mrb[13].mxu0  ;;  %v11336_v9 = vadd.f32 %v11185_v36, %v1849_v24  ;;  %v1004_v24 = vrot.slane %v10283_v31, 1 }
 0x151   : > { %v1852_v14 = vpop.f32.mrb[14].mxu0  ;;  %v11346_v10 = vpop.f32.mrb[28].mxu1  ;;  %v1002_v31 = vsel %vm954_vm0, %v1000_v2, %v1001_v45  ;;  %v10284_v45 = vld [vmem:[#allocation2 + $0xcc] sm:$0xff]  }
 0x152   : > { %13450 = vst [vmem:[#allocation16_spill] sm:$0xff] %v11336_v9  ;;  %v1854_v30 = vpop.f32.mrb[15].mxu0  ;;  %v11344_v52 = vadd.f32 %v11193_v43, %v1852_v14  ;;  %13452 = vst [vmem:[#allocation18_spill] sm:$0xff] %v11346_v10  ;;  %v11348_v36 = vpop.f32.mrb[29].mxu1  ;;  %v3039_v43 = vsel %vm719_vm1, %v3034_v40, %v3038_v47  ;;  %v3041_v14 = vshrl.u32 %v11332_v8, 16 }
 0x153   : > { %v11350_v37 = vpop.f32.mrb[30].mxu1  ;;  %v11365_v10 = vld [vmem:[#allocation2 + $0xe0] ss:$0 sps:$4 sm:$0xff]  }
 0x154   : > { %13451 = vst [vmem:[#allocation17_spill] sm:$0xff] %v11344_v52  ;;  %9488 = vmatmul.mubr.bf16.gmra.mrb[120].mxu0 %v996_v28  ;;  %13453 = vst [vmem:[#allocation19_spill] sm:$0xff] %v11350_v37  ;;  %v11352_v30 = vpop.f32.mrb[31].mxu1  ;;  %v3045_v28 = vrot.slane %v3043_v41, 1  ;;  %v3048_v52 = vshll.u32 %v11340_v51, 16  ;;  %v1005_v37 = vsel %vm954_vm0, %v1003_v21, %v1004_v24 }
 0x155   : > { %9491 = vmatprep.mubr.bf16.mxu0 %v999_v34  ;;  %13454 = vst [vmem:[#allocation20_spill] sm:$0xff] %v11352_v30  ;;  %v11357_v34 = vld [vmem:[#allocation2 + $0xd8] sm:$0xff]   ;;  %v10285_v21 = vld [vmem:[#allocation2 + $0xd4] ss:$0 sps:$4 sm:$0xff]  }
 0x156   : > { %3496 = vmatmul.mubr.bf16.gmra.mrb[136].mxu1 %v11282_v53  ;;  %v3046_v47 = vor.u32 %v3045_v28, %v3041_v14  ;;  %v3050_v41 = vrot.slane %v3048_v52, 1  ;;  %v3055_v30 = vshll.u32 %v11357_v34, 16  ;;  %v1006_v52 = vrot.slane %v10284_v45, 1 }
 0x157   : > { %v1857_v29 = vpop.f32.mrb[16].mxu0  ;;  %3503 = vmatprep.mubr.bf16.mxu1 %v3039_v43  ;;  %v1007_v24 = vrot.slane %v10285_v21, 1 }
 0x158   : > { %v1859_v9 = vpop.f32.mrb[17].mxu0  ;;  %v11361_v56 = vadd.f32 %v11215_v26, %v1857_v29  ;;  %v3051_v28 = vsel %vm719_vm1, %v3046_v47, %v3050_v41 }
 0x159   : > { %v1860_v16 = vpop.f32.mrb[18].mxu0  ;;  %v10092_v9 = vld [vmem:[%s13434_s4 + $0x140] sm:$0xff]   ;;  %v11374_v29 = vpop.f32.mrb[32].mxu1 }
 0x15a   : > { %13455 = vst [vmem:[#allocation21_spill] sm:$0xff] %v11361_v56  ;;  %v1862_v40 = vpop.f32.mrb[19].mxu0  ;;  %v11372_v26 = vadd.f32 %v11224_v18, %v1860_v16  ;;  %13457 = vst [vmem:[#allocation23_spill] sm:$0xff] %v11374_v29  ;;  %v11376_v2 = vpop.f32.mrb[33].mxu1  ;;  %9551 = vmatprep.subr.bf16.mxu1 %v10092_v9  ;;  %v3053_v18 = vshrl.u32 %v11357_v34, 16  ;;  %v3057_v16 = vrot.slane %v3055_v30, 1 }
 0x15b   : > { %13458 = vst [vmem:[#allocation24_spill] sm:$0xff] %v11376_v2  ;;  %v11378_v43 = vpop.f32.mrb[34].mxu1  ;;  %9552 = vmatpush3.bf16.msra.mxu1 %v10092_v9  ;;  %v11385_v40 = vld [vmem:[#allocation2 + $0xe4] sm:$0xff]   ;;  %v1008_v9 = vsel %vm954_vm0, %v1006_v52, %v1007_v24  ;;  %v10287_v52 = vld [vmem:[#allocation2 + $0x38] ss:$0 sps:$4 sm:$0xff]  }
 0x15c   : > { %13456 = vst [vmem:[#allocation22_spill] sm:$0xff] %v11372_v26  ;;  %9492 = vmatmul.mubr.bf16.gmra.mrb[124].mxu0 %v1002_v31  ;;  %13459 = vst [vmem:[#allocation25_spill] sm:$0xff] %v11378_v43  ;;  %v11380_v14 = vpop.f32.mrb[35].mxu1  ;;  %v3060_v31 = vshll.u32 %v11365_v10, 16  ;;  %v3058_v47 = vor.u32 %v3057_v16, %v3053_v18  ;;  %v11392_v43 = vld [vmem:[#allocation2 + $0xec] ss:$0 sps:$4 sm:$0xff]  }
 0x15d   : > { %9495 = vmatprep.mubr.bf16.mxu0 %v1005_v37  ;;  %13460 = vst [vmem:[#allocation26_spill] sm:$0xff] %v11380_v14  ;;  %v3067_v30 = vshll.u32 %v11385_v40, 16  ;;  %v3101_v24 = vrot.slane %v10287_v52, 1  ;;  %v3065_v18 = vshrl.u32 %v11385_v40, 16 }
 0x15e   : > { %3504 = vmatmul.mubr.bf16.gmra.mrb[140].mxu1 %v11307_v62  ;;  %v3062_v41 = vrot.slane %v3060_v31, 1  ;;  %v3072_v31 = vshll.u32 %v11392_v43, 16 }
 0x15f   : > { %v1865_v26 = vpop.f32.mrb[20].mxu0  ;;  %3511 = vmatprep.mubr.bf16.mxu1 %v3051_v28  ;;  %v3069_v16 = vrot.slane %v3067_v30, 1  ;;  %v10093_v30 = vld [vmem:[%s13434_s4 + $0x148] sm:$0xff]  }
 0x160   : > { %v1867_v37 = vpop.f32.mrb[21].mxu0  ;;  %v11389_v45 = vadd.f32 %v11213_v23, %v1865_v26  ;;  %v10286_v23 = vld [vmem:[#allocation2 + $0x30] sm:$0xff]   ;;  %v3063_v28 = vsel %vm719_vm1, %v3058_v47, %v3062_v41  ;;  %9553 = vmatprep.subr.bf16.mxu1 %v10093_v30 }
 0x161   : > { %v1868_v21 = vpop.f32.mrb[22].mxu0  ;;  %v2371_v37 = vpop.f32.mrb[36].mxu1  ;;  %v3100_v26 = vrot.slane %v10286_v23, 1  ;;  %v3070_v41 = vor.u32 %v3069_v16, %v3065_v18  ;;  %9554 = vmatpush3.bf16.msra.mxu1 %v10093_v30  ;;  %v10290_v18 = vld [vmem:[#allocation2 + $0x48] sm:$0xff]  }
 0x162   : > { %v1870_v56 = vpop.f32.mrb[23].mxu0  ;;  %v11396_v29 = vadd.f32 %v11219_v39, %v1868_v21  ;;  %v2373_v14 = vpop.f32.mrb[37].mxu1  ;;  %v3106_v16 = vrot.slane %v10290_v18, 1 }
 0x163   : > { %v2374_v2 = vpop.f32.mrb[38].mxu1 }
 0x164   : > { %13461 = vst [vmem:[#allocation27_spill] sm:$0xff] %v11396_v29  ;;  %9496 = vmatmul.mubr.bf16.gmra.mrb[128].mxu0 %v1008_v9  ;;  %v2376_v56 = vpop.f32.mrb[39].mxu1 }
 0x165   : > { %9515 = vmatprep.mubr.bf16.mxu0 %v11034_v1  ;;  %v3102_v1 = vsel %vm954_vm0, %v3100_v26, %v3101_v24  ;;  %v3074_v56 = vrot.slane %v3072_v31, 1  ;;  %v3107_v31 = vrot.slane %v11076_v57, 1 }
 0x166   : > { %3512 = vmatmul.mubr.bf16.gmra.mrb[144].mxu1 %v11332_v8 }
 0x167   : > { %v1873_v39 = vpop.f32.mrb[24].mxu0  ;;  %3519 = vmatprep.mubr.bf16.mxu1 %v3063_v28  ;;  %v10289_v28 = vld [vmem:[#allocation2 + $0x44] ss:$0 sps:$4 sm:$0xff]  }
 0x168   : > { %v1875_v21 = vpop.f32.mrb[25].mxu0  ;;  %v2051_v9 = vadd.f32 %v11242_v49, %v1873_v39  ;;  %v3104_v39 = vrot.slane %v10289_v28, 1 }
 0x169   : > { %v1876_v14 = vpop.f32.mrb[26].mxu0  ;;  %v2379_v21 = vpop.f32.mrb[40].mxu1 }
 0x16a   : > { %v11405_v23 = vadd.f32 %v2371_v37, %v2051_v9  ;;  %v1878_v52 = vpop.f32.mrb[27].mxu0  ;;  %v2054_v47 = vadd.f32 %v11246_v46, %v1876_v14  ;;  %v2381_v49 = vpop.f32.mrb[41].mxu1  ;;  %v10288_v37 = vld [vmem:[#allocation2 + $0x3c] sm:$0xff]   ;;  %v3075_v9 = vsel %vm719_vm1, %v3070_v41, %v3074_v56 }
 0x16b   : > { %v2382_v26 = vpop.f32.mrb[42].mxu1  ;;  %v3103_v24 = vrot.slane %v10288_v37, 1  ;;  %v3108_v37 = vsel %vm954_vm0, %v3106_v16, %v3107_v31 }
 0x16c   : > { %v11411_v29 = vadd.f32 %v2374_v2, %v2054_v47  ;;  %9516 = vmatmul.mubr.bf16.vlgmr.msra.gmra.mrb[132].mxu0 %v11037_v33  ;;  %v2384_v46 = vpop.f32.mrb[43].mxu1 }
 0x16d   : > { %9519 = vmatprep.mubr.bf16.mxu0 %v3102_v1  ;;  %v3105_v1 = vsel %vm954_vm0, %v3103_v24, %v3104_v39  ;;  %v3110_v46 = vrot.slane %v11100_v19, 1  ;;  %v3113_v39 = vrot.slane %v11122_v44, 1 }
 0x16e   : > { %3520 = vmatmul.mubr.bf16.gmra.mrb[148].mxu1 %v11357_v34 }
 0x16f   : > { %v1881_v2 = vpop.f32.mrb[28].mxu0  ;;  %3527 = vmatprep.mubr.bf16.mxu1 %v3075_v9 }
 0x170   : > { %v1883_v14 = vpop.f32.mrb[29].mxu0  ;;  %v2059_v33 = vadd.f32 %v11240_v60, %v1881_v2  ;;  %v3109_v60 = vrot.slane %v11090_v58, 1 }
 0x171   : > { %v1884_v52 = vpop.f32.mrb[30].mxu0  ;;  %v2387_v57 = vpop.f32.mrb[44].mxu1 }
 0x172   : > { %v11419_v47 = vadd.f32 %v2379_v21, %v2059_v33  ;;  %v1886_v30 = vpop.f32.mrb[31].mxu0  ;;  %v2062_v49 = vadd.f32 %v11244_v0, %v1884_v52  ;;  %v2389_v41 = vpop.f32.mrb[45].mxu1  ;;  %v3112_v21 = vrot.slane %v11114_v55, 1  ;;  %v3111_v31 = vsel %vm954_vm0, %v3109_v60, %v3110_v46 }
 0x173   : > { %v2390_v56 = vpop.f32.mrb[46].mxu1  ;;  %v3116_v52 = vrot.slane %v11138_v50, 1  ;;  %v3118_v30 = vrot.slane %v11149_v6, 1  ;;  %v10094_v41 = vld [vmem:[%s13434_s4 + $0x150] sm:$0xff]  }
 0x174   : > { %v11423_v28 = vadd.f32 %v2382_v26, %v2062_v49  ;;  %9520 = vmatmul.mubr.bf16.gmra.mrb[136].mxu0 %v3105_v1  ;;  %v2392_v24 = vpop.f32.mrb[47].mxu1  ;;  %v3114_v19 = vsel %vm954_vm0, %v3112_v21, %v3113_v39  ;;  %v3119_v49 = vrot.slane %v11152_v7, 1  ;;  %9555 = vmatprep.subr.bf16.mxu1 %v10094_v41  ;;  %v3121_v39 = vrot.slane %v11172_v54, 1 }
 0x175   : > { %9523 = vmatprep.mubr.bf16.mxu0 %v3108_v37  ;;  %9556 = vmatpush3.bf16.msra.mxu1 %v10094_v41 }
 0x176   : > { %3528 = vmatmul.mubr.bf16.gmra.mrb[152].mxu1 %v11385_v40  ;;  %v3120_v6 = vsel %vm954_vm0, %v3118_v30, %v3119_v49  ;;  %v3130_v30 = vrot.slane %v11254_v11, 1 }
 0x177   : > { %v1889_v18 = vpop.f32.mrb[32].mxu0 }
 0x178   : > { %v1891_v0 = vpop.f32.mrb[33].mxu0  ;;  %v2067_v16 = vadd.f32 %v11273_v5, %v1889_v18  ;;  %v3115_v5 = vrot.slane %v11135_v3, 1  ;;  %v3122_v18 = vrot.slane %v11175_v59, 1 }
 0x179   : > { %v1892_v26 = vpop.f32.mrb[34].mxu0  ;;  %v2395_v14 = vpop.f32.mrb[48].mxu1 }
 0x17a   : > { %v11432_v9 = vadd.f32 %v2387_v57, %v2067_v16  ;;  %v1894_v2 = vpop.f32.mrb[35].mxu0  ;;  %v2070_v58 = vadd.f32 %v11277_v27, %v1892_v26  ;;  %v2397_v44 = vpop.f32.mrb[49].mxu1  ;;  %v3117_v60 = vsel %vm954_vm0, %v3115_v5, %v3116_v52  ;;  %v3124_v16 = vrot.slane %v11195_v48, 1 }
 0x17b   : > { %v2398_v33 = vpop.f32.mrb[50].mxu1  ;;  %v3128_v52 = vrot.slane %v11237_v12, 1  ;;  %v10095_v12 = vld [vmem:[%s13434_s4 + $0x158] sm:$0xff]  }
 0x17c   : > { %v11436_v55 = vadd.f32 %v2390_v56, %v2070_v58  ;;  %9524 = vmatmul.mubr.bf16.gmra.mrb[140].mxu0 %v3111_v31  ;;  %v2400_v1 = vpop.f32.mrb[51].mxu1  ;;  %9557 = vmatprep.subr.bf16.mxu1 %v10095_v12 }
 0x17d   : > { %9527 = vmatprep.mubr.bf16.mxu0 %v3114_v19  ;;  %v3123_v19 = vsel %vm954_vm0, %v3121_v39, %v3122_v18  ;;  %9558 = vmatpush3.bf16.msra.mxu1 %v10095_v12 }
 0x17f   : > { %v1897_v37 = vpop.f32.mrb[36].mxu0 }
 0x180   : > { %v1899_v27 = vpop.f32.mrb[37].mxu0  ;;  %v2075_v57 = vadd.f32 %v11271_v61, %v1897_v37 }
 0x181   : > { %v1900_v56 = vpop.f32.mrb[38].mxu0  ;;  %v2403_v7 = vpop.f32.mrb[52].mxu1 }
 0x182   : > { %v11447_v46 = vadd.f32 %v2395_v14, %v2075_v57  ;;  %v1902_v3 = vpop.f32.mrb[39].mxu0  ;;  %v2078_v50 = vadd.f32 %v11275_v4, %v1900_v56  ;;  %v2405_v61 = vpop.f32.mrb[53].mxu1  ;;  %v3125_v4 = vrot.slane %v11208_v63, 1 }
 0x183   : > { %v2406_v21 = vpop.f32.mrb[54].mxu1  ;;  %v3136_v61 = vrot.slane %v11307_v62, 1 }
 0x184   : > { %v11451_v24 = vadd.f32 %v2398_v33, %v2078_v50  ;;  %9528 = vmatmul.mubr.bf16.gmra.mrb[144].mxu0 %v3117_v60  ;;  %v2408_v0 = vpop.f32.mrb[55].mxu1  ;;  %v3126_v54 = vsel %vm954_vm0, %v3124_v16, %v3125_v4 }
 0x185   : > { %9531 = vmatprep.mubr.bf16.mxu0 %v3120_v6  ;;  %v3133_v6 = vrot.slane %v11282_v53, 1 }
 0x187   : > { %v1905_v26 = vpop.f32.mrb[40].mxu0 }
 0x188   : > { %v2083_v31 = vadd.f32 %v11298_v17, %v1905_v26  ;;  %v1907_v2 = vpop.f32.mrb[41].mxu0  ;;  %v3127_v17 = vrot.slane %v11229_v25, 1 }
 0x189   : > { %v1908_v58 = vpop.f32.mrb[42].mxu0  ;;  %v2411_v59 = vpop.f32.mrb[56].mxu1 }
 0x18a   : > { %v2086_v14 = vadd.f32 %v11302_v35, %v1908_v58  ;;  %v11460_v44 = vadd.f32 %v2403_v7, %v2083_v31  ;;  %v1910_v33 = vpop.f32.mrb[43].mxu0  ;;  %v2413_v48 = vpop.f32.mrb[57].mxu1  ;;  %v3131_v35 = vrot.slane %v11268_v42, 1  ;;  %v3129_v41 = vsel %vm954_vm0, %v3127_v17, %v3128_v52 }
 0x18b   : > { %v2414_v63 = vpop.f32.mrb[58].mxu1  ;;  %v3142_v33 = vrot.slane %v11357_v34, 1  ;;  %v10096_v34 = vld [vmem:[%s13434_s4 + $0x160] sm:$0xff]  }
 0x18c   : > { %v11463_v5 = vadd.f32 %v2406_v21, %v2086_v14  ;;  %9532 = vmatmul.mubr.bf16.gmra.mrb[148].mxu0 %v3123_v19  ;;  %v2416_v1 = vpop.f32.mrb[59].mxu1  ;;  %v3132_v25 = vsel %vm954_vm0, %v3130_v30, %v3131_v35  ;;  %v3137_v21 = vrot.slane %v11318_v32, 1  ;;  %v3140_v19 = vrot.slane %v11340_v51, 1  ;;  %9559 = vmatprep.subr.bf16.mxu1 %v10096_v34 }
 0x18d   : > { %9535 = vmatprep.mubr.bf16.mxu0 %v3126_v54  ;;  %v13463_v1 = vld [vmem:[#allocation15_spill] sm:$0xff]  ;;  %9560 = vmatpush3.bf16.msra.mxu1 %v10096_v34 }
 0x18f   : > { %v1913_v49 = vpop.f32.mrb[44].mxu0 }
 0x190   : > { %v2091_v37 = vadd.f32 %v11296_v20, %v1913_v49  ;;  %v1915_v27 = vpop.f32.mrb[45].mxu0 }
 0x191   : > { %v1916_v57 = vpop.f32.mrb[46].mxu0  ;;  %v2419_v11 = vpop.f32.mrb[60].mxu1 }
 0x192   : > { %v2094_v56 = vadd.f32 %v11300_v22, %v1916_v57  ;;  %v11472_v60 = vadd.f32 %v2411_v59, %v2091_v37  ;;  %v1918_v3 = vpop.f32.mrb[47].mxu0  ;;  %v2421_v20 = vpop.f32.mrb[61].mxu1  ;;  %v3134_v22 = vrot.slane %v11290_v38, 1  ;;  %v3138_v38 = vsel %vm954_vm0, %v3136_v61, %v3137_v21  ;;  %v13462_v59 = vld [vmem:[#allocation14_spill] sm:$0xff] }
 0x193   : > { %v2422_v50 = vpop.f32.mrb[62].mxu1  ;;  %v3145_v57 = vrot.slane %v11385_v40, 1 }
 0x194   : > { %v11478_v42 = vadd.f32 %v2414_v63, %v2094_v56  ;;  %9536 = vmatmul.mubr.bf16.gmra.mrb[152].mxu0 %v3129_v41  ;;  %v2424_v7 = vpop.f32.mrb[63].mxu1  ;;  %v3135_v4 = vsel %vm954_vm0, %v3133_v6, %v3134_v22  ;;  %v3146_v41 = vrot.slane %v11392_v43, 1 }
 0x195   : > { %9539 = vmatprep.mubr.bf16.mxu0 %v3132_v25 }
 0x196   : > { %v3147_v20 = vsel %vm954_vm0, %v3145_v57, %v3146_v41  ;;  %v13469_v57 = vld [vmem:[#allocation23_spill] sm:$0xff] }
 0x197   : > { %v1921_v39 = vpop.f32.mrb[48].mxu0 }
 0x198   : > { %v2099_v18 = vadd.f32 %v11323_v13, %v1921_v39  ;;  %v1923_v0 = vpop.f32.mrb[49].mxu0  ;;  %v3139_v13 = vrot.slane %v11332_v8, 1 }
 0x199   : > { %v1924_v16 = vpop.f32.mrb[50].mxu0  ;;  %v2427_v2 = vpop.f32.mrb[64].mxu1  ;;  %v13465_v0 = vld [vmem:[#allocation18_spill] sm:$0xff] }
 0x19a   : > { %v2102_v26 = vadd.f32 %v11327_v15, %v1924_v16  ;;  %v11487_v31 = vadd.f32 %v2419_v11, %v2099_v18  ;;  %v1926_v53 = vpop.f32.mrb[51].mxu0  ;;  %v2429_v62 = vpop.f32.mrb[65].mxu1  ;;  %v3143_v15 = vrot.slane %v11365_v10, 1  ;;  %v3141_v52 = vsel %vm954_vm0, %v3139_v13, %v3140_v19 }
 0x19b   : > { %v2430_v32 = vpop.f32.mrb[66].mxu1 }
 0x19c   : > { %v11490_v58 = vadd.f32 %v2422_v50, %v2102_v26  ;;  %9540 = vmatmul.mubr.bf16.gmra.mrb[156].mxu0 %v3135_v4  ;;  %v2432_v14 = vpop.f32.mrb[67].mxu1  ;;  %v3144_v8 = vsel %vm954_vm0, %v3142_v33, %v3143_v15  ;;  %v13464_v50 = vld [vmem:[#allocation20_spill] sm:$0xff]  ;;  %v13466_v26 = vld [vmem:[#allocation19_spill] sm:$0xff] }
 0x19d   : > { %9543 = vmatprep.mubr.bf16.mxu0 %v3138_v38 }
 0x19f   : > { %v1929_v54 = vpop.f32.mrb[52].mxu0 }
 0x1a0   : > { %v2107_v48 = vadd.f32 %v13462_v59, %v1929_v54  ;;  %v1931_v63 = vpop.f32.mrb[53].mxu0  ;;  %v13467_v54 = vld [vmem:[#allocation24_spill] sm:$0xff] }
 0x1a1   : > { %v1932_v17 = vpop.f32.mrb[54].mxu0  ;;  %v2435_v51 = vpop.f32.mrb[68].mxu1 }
 0x1a2   : > { %v2110_v30 = vadd.f32 %v13463_v1, %v1932_v17  ;;  %v11499_v35 = vadd.f32 %v2427_v2, %v2107_v48  ;;  %v1934_v49 = vpop.f32.mrb[55].mxu0  ;;  %v2437_v37 = vpop.f32.mrb[69].mxu1  ;;  %v13468_v17 = vld [vmem:[#allocation26_spill] sm:$0xff] }
 0x1a3   : > { %v2438_v27 = vpop.f32.mrb[70].mxu1 }
 0x1a4   : > { %v11505_v10 = vadd.f32 %v2430_v32, %v2110_v30  ;;  %9544 = vmatmul.mubr.bf16.gmra.mrb[160].mxu0 %v3141_v52  ;;  %v2440_v56 = vpop.f32.mrb[71].mxu1  ;;  %v10097_v32 = vld [vmem:[%s13434_s4 + $0x168] sm:$0xff]  }
 0x1a5   : > { %9547 = vmatprep.mubr.bf16.mxu0 %v3144_v8  ;;  %9561 = vmatprep.subr.bf16.mxu1 %v10097_v32 }
 0x1a6   : > { %9562 = vmatpush3.bf16.msra.mxu1 %v10097_v32  ;;  %v13474_v32 = vld [vmem:[#allocation9_spill] sm:$0xff] }
 0x1a7   : > { %v1937_v3 = vpop.f32.mrb[56].mxu0 }
 0x1a8   : > { %v2115_v25 = vadd.f32 %v11348_v36, %v1937_v3  ;;  %v1939_v12 = vpop.f32.mrb[57].mxu0 }
 0x1a9   : > { %v1940_v11 = vpop.f32.mrb[58].mxu0  ;;  %v2443_v61 = vpop.f32.mrb[72].mxu1 }
 0x1aa   : > { %v2118_v6 = vadd.f32 %v13464_v50, %v1940_v11  ;;  %v11512_v22 = vadd.f32 %v2435_v51, %v2115_v25  ;;  %v1942_v7 = vpop.f32.mrb[59].mxu0  ;;  %v2445_v43 = vpop.f32.mrb[73].mxu1  ;;  %v13470_v25 = vld [vmem:[#allocation25_spill] sm:$0xff] }
 0x1ab   : > { %v2446_v40 = vpop.f32.mrb[74].mxu1 }
 0x1ac   : > { %v11514_v21 = vadd.f32 %v2438_v27, %v2118_v6  ;;  %9548 = vmatmul.mubr.bf16.gmra.mrb[164].mxu0 %v3147_v20  ;;  %v2448_v39 = vpop.f32.mrb[75].mxu1 }
 0x1af   : > { %v1945_v18 = vpop.f32.mrb[60].mxu0 }
 0x1b0   : > { %v2123_v16 = vadd.f32 %v13465_v0, %v1945_v18  ;;  %v1947_v36 = vpop.f32.mrb[61].mxu0  ;;  %v13471_v0 = vld [vmem:[#allocation8_spill] sm:$0xff] }
 0x1b1   : > { %v1948_v4 = vpop.f32.mrb[62].mxu0  ;;  %v2451_v62 = vpop.f32.mrb[76].mxu1 }
 0x1b2   : > { %v2126_v53 = vadd.f32 %v13466_v26, %v1948_v4  ;;  %v11518_v38 = vadd.f32 %v2443_v61, %v2123_v16  ;;  %v1950_v2 = vpop.f32.mrb[63].mxu0  ;;  %v2453_v19 = vpop.f32.mrb[77].mxu1  ;;  %v10098_v61 = vld [vmem:[%s13434_s4 + $0x100] sm:$0xff]   ;;  %v3895_v26 = vld [vmem:[#allocation3 + $0xc] sm:$0x1] }
 0x1b3   : > { %v2454_v14 = vpop.f32.mrb[78].mxu1  ;;  %8987 = vmatprep.subr.bf16.mxu0 %v10098_v61  ;;  %v3896_v2 = vsel %vm11552_vm4, 0, %v3895_v26  ;;  %v10103_v26 = vld [vmem:[%s13434_s4 + $0x110] sm:$0xff]  }
 0x1b4   : > { %v11523_v13 = vadd.f32 %v2446_v40, %v2126_v53  ;;  %v2456_v33 = vpop.f32.mrb[79].mxu1  ;;  %v10100_v40 = vld [vmem:[%s13434_s4 + $0xc0] sm:$0xff]   ;;  %3897 = vst [vmem:[#allocation3 + $0xc] sm:$0x1] %v3896_v2  ;;  %v10104_v2 = vld [vmem:[%s13434_s4 + $0xd0] sm:$0xff]  }
 0x1b5   : > { %8988 = vmatpush3.bf16.msra.mxu0 %v10100_v40  ;;  %v10101_v40 = vld [vmem:[%s13434_s4 + $0x108] sm:$0xff]  }
 0x1b6   : > { %8989 = vmatprep.subr.bf16.mxu0 %v10101_v40  ;;  %v13482_v40 = vld [vmem:[#allocation16_spill] sm:$0xff] }
 0x1b7   : > { %v1953_v15 = vpop.f32.mrb[64].mxu0 }
 0x1b8   : > { %v2131_v59 = vadd.f32 %v13467_v54, %v1953_v15  ;;  %v1955_v48 = vpop.f32.mrb[65].mxu0  ;;  %v13475_v15 = vmov 0  ;;  %v3951_v54 = vld [vmem:[#allocation3 + $0x14] sm:$0x1] }
 0x1b9   : > { %v1956_v63 = vpop.f32.mrb[66].mxu0  ;;  %v2459_v49 = vpop.f32.mrb[80].mxu1  ;;  %v13476_v15 = vsel %vm11565_vm6, 4294967295, %v13475_v15  ;;  %v3952_v48 = vsel %vm11565_vm6, 0, %v3951_v54  ;;  %v13481_v54 = vld [vmem:[#allocation13_spill] sm:$0xff] }
 0x1ba   : > { %v2134_v52 = vadd.f32 %v13468_v17, %v1956_v63  ;;  %v11527_v1 = vadd.f32 %v2451_v62, %v2131_v59  ;;  %v1958_v30 = vpop.f32.mrb[67].mxu0  ;;  %v2461_v51 = vpop.f32.mrb[81].mxu1  ;;  %v3892_v62 = vld [vmem:[#allocation3] sm:$0x1]  ;;  %13477 = vst [vmem:[#allocation14_spill] sm:$0xff] %v13476_v15 }
 0x1bb   : > { %v2462_v34 = vpop.f32.mrb[82].mxu1  ;;  %v3893_v33 = vsel %vm11552_vm4, 0, %v3892_v62  ;;  %v3948_v63 = vld [vmem:[#allocation3 + $0x8] sm:$0x1]  ;;  %3953 = vst [vmem:[#allocation3 + $0x14] sm:$0x1] %v3952_v48 }
 0x1bc   : > { %v11529_v8 = vadd.f32 %v2454_v14, %v2134_v52  ;;  %v2464_v37 = vpop.f32.mrb[83].mxu1  ;;  %3894 = vst [vmem:[#allocation3] sm:$0x1] %v3893_v33  ;;  %v3949_v52 = vsel %vm11565_vm6, 0, %v3948_v63  ;;  %v13480_v62 = vld [vmem:[#allocation12_spill] sm:$0xff] }
 0x1bd   : > { %3950 = vst [vmem:[#allocation3 + $0x8] sm:$0x1] %v3949_v52 }
 0x1bf   : > { %v1961_v27 = vpop.f32.mrb[68].mxu0 }
 0x1c0   : > { %v2139_v41 = vadd.f32 %v13469_v57, %v1961_v27  ;;  %v1963_v56 = vpop.f32.mrb[69].mxu0  ;;  %v3901_v57 = vld [vmem:[#allocation3 + $0x24] sm:$0x1] }
 0x1c1   : > { %v1964_v3 = vpop.f32.mrb[70].mxu0  ;;  %v11535_v50 = vpop.f32.mrb[84].mxu1  ;;  %v3902_v56 = vsel %vm11552_vm4, 0, %v3901_v57 }
 0x1c2   : > { %v2142_v12 = vadd.f32 %v13470_v25, %v1964_v3  ;;  %v11533_v11 = vadd.f32 %v2459_v49, %v2139_v41  ;;  %v1966_v20 = vpop.f32.mrb[71].mxu0  ;;  %v3395_v7 = vpop.f32.mrb[85].mxu1  ;;  %v3898_v3 = vld [vmem:[#allocation3 + $0x18] sm:$0x1]  ;;  %v13479_v25 = vld [vmem:[#allocation11_spill] sm:$0xff] }
 0x1c3   : > { %v11542_v43 = vpop.f32.mrb[86].mxu1  ;;  %3903 = vst [vmem:[#allocation3 + $0x24] sm:$0x1] %v3902_v56  ;;  %v3899_v7 = vsel %vm11552_vm4, 0, %v3898_v3  ;;  %v3954_v56 = vld [vmem:[#allocation3 + $0x20] sm:$0x1] }
 0x1c4   : > { %v11537_v6 = vadd.f32 %v2462_v34, %v2142_v12  ;;  %v3398_v39 = vpop.f32.mrb[87].mxu1  ;;  %v13478_v34 = vld [vmem:[#allocation10_spill] sm:$0xff]  ;;  %3900 = vst [vmem:[#allocation3 + $0x18] sm:$0x1] %v3899_v7  ;;  %v10107_v7 = vld [vmem:[%s13434_s4 + $0x120] sm:$0xff]  }
 0x1c7   : > { %v2323_v18 = vpop.f32.mrb[72].mxu0 }
 0x1c8   : > { %v11548_v16 = vadd.f32 %v2323_v18, %v13471_v0  ;;  %v2325_v36 = vpop.f32.mrb[73].mxu0  ;;  %v10102_v18 = vld [vmem:[%s13434_s4 + $0xc8] sm:$0xff]  }
 0x1c9   : > { %v2326_v53 = vpop.f32.mrb[74].mxu0  ;;  %v11569_v59 = vpop.f32.mrb[88].mxu1  ;;  %8990 = vmatpush3.bf16.msra.mxu0 %v10102_v18 }
 0x1ca   : > { %v11559_v19 = vadd.f32 %v2326_v53, %v13474_v32  ;;  %v2328_v14 = vpop.f32.mrb[75].mxu0  ;;  %v3403_v17 = vpop.f32.mrb[89].mxu1  ;;  %8991 = vmatprep.subr.bf16.mxu0 %v10103_v26 }
 0x1cb   : > { %v11575_v30 = vpop.f32.mrb[90].mxu1  ;;  %v10105_v17 = vld [vmem:[%s13434_s4 + $0x118] sm:$0xff]  }
 0x1cc   : > { %v3406_v49 = vpop.f32.mrb[91].mxu1 }
 0x1cd   : > { %8992 = vmatpush3.bf16.msra.mxu0 %v10104_v2  ;;  %v10099_v49 = vld [vmem:[%s13434_s4 + $0x170] sm:$0xff]  }
 0x1ce   : > { %8993 = vmatprep.subr.bf16.mxu0 %v10105_v17  ;;  %9563 = vmatprep.subr.bf16.mxu1 %v10099_v49 }
 0x1cf   : > { %v2331_v51 = vpop.f32.mrb[76].mxu0  ;;  %9564 = vmatpush3.bf16.msra.mxu1 %v10099_v49 }
 0x1d0   : > { %v11578_v37 = vadd.f32 %v2331_v51, %v13478_v34  ;;  %v2333_v27 = vpop.f32.mrb[77].mxu0  ;;  %v10106_v51 = vld [vmem:[%s13434_s4 + $0xd8] sm:$0xff]  }
 0x1d1   : > { %v2334_v41 = vpop.f32.mrb[78].mxu0  ;;  %v11587_v61 = vpop.f32.mrb[92].mxu1  ;;  %v3957_v27 = vld [vmem:[#allocation3 + $0x2c] sm:$0x1]  ;;  %8994 = vmatpush3.bf16.msra.mxu0 %v10106_v51  ;;  %v3963_v51 = vld [vmem:[#allocation3 + $0x44] sm:$0x1] }
 0x1d2   : > { %v11583_v12 = vadd.f32 %v2334_v41, %v13479_v25  ;;  %v2336_v20 = vpop.f32.mrb[79].mxu0  ;;  %v3411_v39 = vpop.f32.mrb[93].mxu1  ;;  %v3958_v41 = vsel %vm11565_vm6, 0, %v3957_v27  ;;  %v3955_v25 = vsel %vm11565_vm6, 0, %v3954_v56  ;;  %8995 = vmatprep.subr.bf16.mxu0 %v10107_v7  ;;  %v3964_v27 = vsel %vm11565_vm6, 0, %v3963_v51 }
 0x1d3   : > { %v11595_v0 = vpop.f32.mrb[94].mxu1  ;;  %3959 = vst [vmem:[#allocation3 + $0x2c] sm:$0x1] %v3958_v41  ;;  %3956 = vst [vmem:[#allocation3 + $0x20] sm:$0x1] %v3955_v25 }
 0x1d4   : > { %v3414_v36 = vpop.f32.mrb[95].mxu1  ;;  %v3960_v41 = vld [vmem:[#allocation3 + $0x38] sm:$0x1]  ;;  %3965 = vst [vmem:[#allocation3 + $0x44] sm:$0x1] %v3964_v27 }
 0x1d5   : > { %v10108_v36 = vld [vmem:[%s13434_s4 + $0xe0] sm:$0xff]   ;;  %v3910_v51 = vld [vmem:[#allocation3 + $0x48] sm:$0x1] }
 0x1d6   : > { %8996 = vmatpush3.bf16.msra.mxu0 %v10108_v36  ;;  %v13486_v36 = vld [vmem:[#allocation22_spill] sm:$0xff] }
 0x1d7   : > { %v2339_v53 = vpop.f32.mrb[80].mxu0 }
 0x1d8   : > { %v11604_v32 = vadd.f32 %v2339_v53, %v13480_v62  ;;  %v2341_v14 = vpop.f32.mrb[81].mxu0  ;;  %v13483_v53 = vld [vmem:[#allocation17_spill] sm:$0xff] }
 0x1d9   : > { %v2342_v33 = vpop.f32.mrb[82].mxu0  ;;  %v11612_v52 = vpop.f32.mrb[96].mxu1  ;;  %v3907_v14 = vld [vmem:[#allocation3 + $0x3c] sm:$0x1] }
 0x1da   : > { %v11607_v48 = vadd.f32 %v2342_v33, %v13481_v54  ;;  %v2344_v63 = vpop.f32.mrb[83].mxu0  ;;  %v3419_v34 = vpop.f32.mrb[97].mxu1  ;;  %v3908_v54 = vsel %vm11552_vm4, 0, %v3907_v14 }
 0x1db   : > { %v11620_v57 = vpop.f32.mrb[98].mxu1  ;;  %v3904_v63 = vld [vmem:[#allocation3 + $0x30] sm:$0x1]  ;;  %3909 = vst [vmem:[#allocation3 + $0x3c] sm:$0x1] %v3908_v54 }
 0x1dc   : > { %v3422_v3 = vpop.f32.mrb[99].mxu1  ;;  %v3905_v49 = vsel %vm11552_vm4, 0, %v3904_v63  ;;  %v3913_v54 = vld [vmem:[#allocation3 + $0x54] sm:$0x1]  ;;  %v10111_v63 = vld [vmem:[%s13434_s4 + $0xe8] sm:$0xff]  }
 0x1dd   : > { %3906 = vst [vmem:[#allocation3 + $0x30] sm:$0x1] %v3905_v49  ;;  %v3961_v3 = vsel %vm11565_vm6, 0, %v3960_v41  ;;  %v3914_v49 = vsel %vm11552_vm4, 0, %v3913_v54  ;;  %v3911_v41 = vsel %vm11552_vm4, 0, %v3910_v51 }
 0x1de   : > { %3962 = vst [vmem:[#allocation3 + $0x38] sm:$0x1] %v3961_v3  ;;  %3915 = vst [vmem:[#allocation3 + $0x54] sm:$0x1] %v3914_v49  ;;  %v10112_v3 = vld [vmem:[%s13434_s4 + $0x130] sm:$0xff]  }
 0x1df   : > { %v2347_v20 = vpop.f32.mrb[84].mxu0  ;;  %3912 = vst [vmem:[#allocation3 + $0x48] sm:$0x1] %v3911_v41  ;;  %v3969_v49 = vld [vmem:[#allocation3 + $0x5c] sm:$0x1] }
 0x1e0   : > { %v11630_v39 = vadd.f32 %v2347_v20, %v13482_v40  ;;  %v2349_v18 = vpop.f32.mrb[85].mxu0  ;;  %v13485_v20 = vld [vmem:[#allocation21_spill] sm:$0xff]  ;;  %v3970_v41 = vsel %vm11565_vm6, 0, %v3969_v49  ;;  %v10116_v49 = vld [vmem:[%s13434_s4 + $0x138] sm:$0xff]  }
 0x1e1   : > { %v2350_v26 = vpop.f32.mrb[86].mxu0  ;;  %v11638_v33 = vpop.f32.mrb[100].mxu1  ;;  %3971 = vst [vmem:[#allocation3 + $0x5c] sm:$0x1] %v3970_v41 }
 0x1e2   : > { %v11636_v2 = vadd.f32 %v2350_v26, %v13483_v53  ;;  %v2352_v62 = vpop.f32.mrb[87].mxu0  ;;  %v3427_v17 = vpop.f32.mrb[101].mxu1 }
 0x1e3   : > { %v11644_v34 = vpop.f32.mrb[102].mxu1  ;;  %v10110_v62 = vld [vmem:[%s13434_s4 + $0x128] sm:$0xff]  }
 0x1e4   : > { %13484 = vst [vmem:[#allocation15_spill] sm:$0xff] %v11644_v34  ;;  %v3430_v56 = vpop.f32.mrb[103].mxu1  ;;  %8997 = vmatprep.subr.bf16.mxu0 %v10110_v62 }
 0x1e5   : > { %8998 = vmatpush3.bf16.msra.mxu0 %v10111_v63 }
 0x1e6   : > { %8999 = vmatprep.subr.bf16.mxu0 %v10112_v3 }
 0x1e7   : > { %v2355_v25 = vpop.f32.mrb[88].mxu0 }
 0x1e8   : > { %v11651_v7 = vadd.f32 %v2355_v25, %v13485_v20  ;;  %v2357_v40 = vpop.f32.mrb[89].mxu0  ;;  %v10113_v20 = vld [vmem:[%s13434_s4 + $0xf0] sm:$0xff]  }
 0x1e9   : > { %v2358_v18 = vpop.f32.mrb[90].mxu0  ;;  %v11659_v14 = vpop.f32.mrb[104].mxu1  ;;  %9000 = vmatpush3.bf16.msra.mxu0 %v10113_v20 }
 0x1ea   : > { %v11654_v26 = vadd.f32 %v2358_v18, %v13486_v36  ;;  %v2360_v53 = vpop.f32.mrb[91].mxu0  ;;  %v3435_v17 = vpop.f32.mrb[105].mxu1  ;;  %9001 = vmatprep.subr.bf16.mxu0 %v10116_v49 }
 0x1eb   : > { %v11666_v27 = vpop.f32.mrb[106].mxu1  ;;  %v13487_v53 = vld [vmem:[#allocation27_spill] sm:$0xff] }
 0x1ec   : > { %v3438_v56 = vpop.f32.mrb[107].mxu1 }
 0x1ed   : > { %v3966_v56 = vld [vmem:[#allocation3 + $0x50] sm:$0x1] }
 0x1ee   : > { %v3967_v3 = vsel %vm11565_vm6, 0, %v3966_v56  ;;  %v3916_v56 = vld [vmem:[#allocation3 + $0x60] sm:$0x1] }
 0x1ef   : > { %v2363_v25 = vpop.f32.mrb[92].mxu0  ;;  %3968 = vst [vmem:[#allocation3 + $0x50] sm:$0x1] %v3967_v3  ;;  %v3917_v3 = vsel %vm11552_vm4, 0, %v3916_v56 }
 0x1f0   : > { %v2364_v40 = vadd.f32 %v2363_v25, %v11389_v45  ;;  %v2365_v18 = vpop.f32.mrb[93].mxu0  ;;  %v10109_v45 = vld [vmem:[%s13434_s4 + $0x178] sm:$0xff]   ;;  %3918 = vst [vmem:[#allocation3 + $0x60] sm:$0x1] %v3917_v3 }
 0x1f1   : > { %v2366_v36 = vpop.f32.mrb[94].mxu0  ;;  %v11678_v63 = vpop.f32.mrb[108].mxu1  ;;  %9565 = vmatprep.subr.bf16.mxu1 %v10109_v45 }
 0x1f2   : > { %v2367_v62 = vadd.f32 %v2366_v36, %v13487_v53  ;;  %v2368_v54 = vpop.f32.mrb[95].mxu0  ;;  %13488 = vst [vmem:[#allocation20_spill] sm:$0xff] %v11678_v63  ;;  %v3443_v17 = vpop.f32.mrb[109].mxu1  ;;  %9566 = vmatpush3.bf16.msra.mxu1 %v10109_v45 }
 0x1f3   : > { %v11680_v51 = vpop.f32.mrb[110].mxu1  ;;  %v3919_v17 = vld [vmem:[#allocation3 + $0x6c] sm:$0x1] }
 0x1f4   : > { %13489 = vst [vmem:[#allocation18_spill] sm:$0xff] %v11680_v51  ;;  %v3446_v34 = vpop.f32.mrb[111].mxu1 }
 0x1f7   : > { %v9465_v25 = vpop.f32.mrb[96].mxu0 }
 0x1f8   : > { %v11690_v20 = vadd.f32 %v9465_v25, %v11578_v37  ;;  %v2500_v18 = vpop.f32.mrb[97].mxu0 }
 0x1f9   : > { %v11693_v36 = vadd.f32 %v2500_v18, %v11548_v16  ;;  %v9466_v53 = vpop.f32.mrb[98].mxu0  ;;  %v11704_v37 = vpop.f32.mrb[112].mxu1  ;;  %v3920_v16 = vsel %vm11552_vm4, 0, %v3919_v17  ;;  %v3972_v17 = vld [vmem:[#allocation3 + $0x68] sm:$0x1] }
 0x1fa   : > { %v11696_v34 = vadd.f32 %v9466_v53, %v11583_v12  ;;  %v2503_v54 = vpop.f32.mrb[99].mxu0  ;;  %v10117_v12 = vld [vmem:[%s13434_s4 + $0xf8] sm:$0xff]   ;;  %v3451_v45 = vpop.f32.mrb[113].mxu1  ;;  %3921 = vst [vmem:[#allocation3 + $0x6c] sm:$0x1] %v3920_v16  ;;  %v3973_v56 = vsel %vm11565_vm6, 0, %v3972_v17 }
 0x1fb   : > { %v11702_v41 = vadd.f32 %v2503_v54, %v11559_v19  ;;  %v11713_v25 = vpop.f32.mrb[114].mxu1  ;;  %v3975_v19 = vld [vmem:[#allocation3 + $0x74] sm:$0x1]  ;;  %9002 = vmatpush3.bf16.msra.mxu0 %v10117_v12  ;;  %3974 = vst [vmem:[#allocation3 + $0x68] sm:$0x1] %v3973_v56 }
 0x1fc   : > { %13490 = vst [vmem:[#allocation19_spill] sm:$0xff] %v11713_v25  ;;  %v3454_v18 = vpop.f32.mrb[115].mxu1  ;;  %v3976_v53 = vsel %vm11565_vm6, 0, %v3975_v19 }
 0x1fd   : > { %3977 = vst [vmem:[#allocation3 + $0x74] sm:$0x1] %v3976_v53 }
 0x1ff   : > { %v9469_v54 = vpop.f32.mrb[100].mxu0 }
 0x200   : > { %v11718_v51 = vadd.f32 %v9469_v54, %v11630_v39  ;;  %v2516_v16 = vpop.f32.mrb[101].mxu0 }
 0x201   : > { %v11723_v49 = vadd.f32 %v2516_v16, %v11604_v32  ;;  %v9470_v45 = vpop.f32.mrb[102].mxu0  ;;  %v11731_v18 = vpop.f32.mrb[116].mxu1 }
 0x202   : > { %v11726_v12 = vadd.f32 %v9470_v45, %v11636_v2  ;;  %v2519_v3 = vpop.f32.mrb[103].mxu0  ;;  %13491 = vst [vmem:[#allocation24_spill] sm:$0xff] %v11731_v18  ;;  %v3459_v39 = vpop.f32.mrb[117].mxu1  ;;  %v3925_v2 = vld [vmem:[#allocation3 + $0x84] sm:$0x1] }
 0x203   : > { %v11729_v19 = vadd.f32 %v2519_v3, %v11607_v48  ;;  %v11733_v53 = vpop.f32.mrb[118].mxu1  ;;  %v3926_v48 = vsel %vm11552_vm4, 0, %v3925_v2 }
 0x204   : > { %13492 = vst [vmem:[#allocation26_spill] sm:$0xff] %v11733_v53  ;;  %v3462_v54 = vpop.f32.mrb[119].mxu1  ;;  %3927 = vst [vmem:[#allocation3 + $0x84] sm:$0x1] %v3926_v48 }
 0x207   : > { %v9473_v25 = vpop.f32.mrb[104].mxu0 }
 0x208   : > { %v11735_v17 = vadd.f32 %v9473_v25, %v2364_v40  ;;  %v2532_v32 = vpop.f32.mrb[105].mxu0 }
 0x209   : > { %v11738_v16 = vadd.f32 %v2532_v32, %v11651_v7  ;;  %v9474_v56 = vpop.f32.mrb[106].mxu0  ;;  %v11747_v39 = vpop.f32.mrb[120].mxu1 }
 0x20a   : > { %v11740_v45 = vadd.f32 %v9474_v56, %v2367_v62  ;;  %v2535_v63 = vpop.f32.mrb[107].mxu0  ;;  %v3467_v40 = vpop.f32.mrb[121].mxu1 }
 0x20b   : > { %v11745_v3 = vadd.f32 %v2535_v63, %v11654_v26  ;;  %v11749_v25 = vpop.f32.mrb[122].mxu1 }
 0x20c   : > { %13493 = vst [vmem:[#allocation23_spill] sm:$0xff] %v11749_v25  ;;  %v3470_v54 = vpop.f32.mrb[123].mxu1  ;;  %v3981_v25 = vld [vmem:[#allocation3 + $0x8c] sm:$0x1] }
 0x20d   : > { %v3922_v54 = vld [vmem:[#allocation3 + $0x78] sm:$0x1] }
 0x20f   : > { %v9477_v7 = vpop.f32.mrb[108].mxu0 }
 0x210   : > { %v11752_v32 = vadd.f32 %v9477_v7, %v11419_v47  ;;  %v2548_v62 = vpop.f32.mrb[109].mxu0  ;;  %v3923_v47 = vsel %vm11552_vm4, 0, %v3922_v54 }
 0x211   : > { %v11755_v56 = vadd.f32 %v2548_v62, %v11405_v23  ;;  %v9478_v53 = vpop.f32.mrb[110].mxu0  ;;  %v11763_v48 = vpop.f32.mrb[124].mxu1  ;;  %v3982_v23 = vsel %vm11565_vm6, 0, %v3981_v25  ;;  %3924 = vst [vmem:[#allocation3 + $0x78] sm:$0x1] %v3923_v47 }
 0x212   : > { %v11758_v2 = vadd.f32 %v9478_v53, %v11423_v28  ;;  %v2551_v26 = vpop.f32.mrb[111].mxu0  ;;  %13494 = vst [vmem:[#allocation25_spill] sm:$0xff] %v11763_v48  ;;  %v3475_v40 = vpop.f32.mrb[125].mxu1  ;;  %3983 = vst [vmem:[#allocation3 + $0x8c] sm:$0x1] %v3982_v23 }
 0x213   : > { %v11761_v63 = vadd.f32 %v2551_v26, %v11411_v29  ;;  %v11765_v18 = vpop.f32.mrb[126].mxu1  ;;  %v3978_v28 = vld [vmem:[#allocation3 + $0x80] sm:$0x1] }
 0x214   : > { %13495 = vst [vmem:[#allocation8_spill] sm:$0xff] %v11765_v18  ;;  %v3478_v7 = vpop.f32.mrb[127].mxu1  ;;  %v3979_v29 = vsel %vm11565_vm6, 0, %v3978_v28 }
 0x215   : > { %3980 = vst [vmem:[#allocation3 + $0x80] sm:$0x1] %v3979_v29  ;;  %v3931_v7 = vld [vmem:[#allocation3 + $0x9c] sm:$0x1]  ;;  %v3928_v29 = vld [vmem:[#allocation3 + $0x90] sm:$0x1] }
 0x217   : > { %v9481_v53 = vpop.f32.mrb[112].mxu0 }
 0x218   : > { %v11774_v62 = vadd.f32 %v9481_v53, %v11447_v46  ;;  %v2564_v26 = vpop.f32.mrb[113].mxu0  ;;  %v10120_v46 = vld [vmem:[%s13434_s4 + $0x40] sm:$0xff]  }
 0x219   : > { %v11777_v40 = vadd.f32 %v2564_v26, %v11432_v9  ;;  %v9482_v54 = vpop.f32.mrb[114].mxu0  ;;  %v11785_v23 = vpop.f32.mrb[128].mxu1  ;;  %v3932_v9 = vsel %vm11552_vm4, 0, %v3931_v7  ;;  %9123 = vmatprep.subr.bf16.mxu1 %v10120_v46 }
 0x21a   : > { %v11780_v18 = vadd.f32 %v9482_v54, %v11451_v24  ;;  %v2567_v25 = vpop.f32.mrb[115].mxu0  ;;  %13496 = vst [vmem:[#allocation9_spill] sm:$0xff] %v11785_v23  ;;  %v3483_v28 = vpop.f32.mrb[129].mxu1  ;;  %3933 = vst [vmem:[#allocation3 + $0x9c] sm:$0x1] %v3932_v9 }
 0x21b   : > { %v11783_v47 = vadd.f32 %v2567_v25, %v11436_v55  ;;  %v11792_v53 = vpop.f32.mrb[130].mxu1  ;;  %v3929_v55 = vsel %vm11552_vm4, 0, %v3928_v29  ;;  %v3987_v29 = vld [vmem:[#allocation3 + $0xa4] sm:$0x1] }
 0x21c   : > { %13497 = vst [vmem:[#allocation10_spill] sm:$0xff] %v11792_v53  ;;  %v3486_v24 = vpop.f32.mrb[131].mxu1  ;;  %3930 = vst [vmem:[#allocation3 + $0x90] sm:$0x1] %v3929_v55 }
 0x21f   : > { %v9485_v26 = vpop.f32.mrb[116].mxu0 }
 0x220   : > { %v11797_v54 = vadd.f32 %v9485_v26, %v11472_v60  ;;  %v2580_v25 = vpop.f32.mrb[117].mxu0  ;;  %v3988_v60 = vsel %vm11565_vm6, 0, %v3987_v29 }
 0x221   : > { %v11800_v28 = vadd.f32 %v2580_v25, %v11460_v44  ;;  %v9486_v48 = vpop.f32.mrb[118].mxu0  ;;  %v11808_v24 = vpop.f32.mrb[132].mxu1  ;;  %3989 = vst [vmem:[#allocation3 + $0xa4] sm:$0x1] %v3988_v60 }
 0x222   : > { %v11803_v7 = vadd.f32 %v9486_v48, %v11478_v42  ;;  %v2583_v46 = vpop.f32.mrb[119].mxu0  ;;  %v3491_v53 = vpop.f32.mrb[133].mxu1  ;;  %v3984_v48 = vld [vmem:[#allocation3 + $0x98] sm:$0x1] }
 0x223   : > { %v11806_v9 = vadd.f32 %v2583_v46, %v11463_v5  ;;  %v11810_v23 = vpop.f32.mrb[134].mxu1  ;;  %v3985_v53 = vsel %vm11565_vm6, 0, %v3984_v48 }
 0x224   : > { %13498 = vst [vmem:[#allocation11_spill] sm:$0xff] %v11810_v23  ;;  %v3494_v26 = vpop.f32.mrb[135].mxu1  ;;  %3986 = vst [vmem:[#allocation3 + $0x98] sm:$0x1] %v3985_v53 }
 0x227   : > { %v9489_v44 = vpop.f32.mrb[120].mxu0 }
 0x228   : > { %v11815_v55 = vadd.f32 %v9489_v44, %v11499_v35  ;;  %v2596_v42 = vpop.f32.mrb[121].mxu0 }
 0x229   : > { %v11818_v5 = vadd.f32 %v2596_v42, %v11487_v31  ;;  %v9490_v25 = vpop.f32.mrb[122].mxu0  ;;  %v11828_v60 = vpop.f32.mrb[136].mxu1  ;;  %v3937_v31 = vld [vmem:[#allocation3 + $0xb4] sm:$0x1] }
 0x22a   : > { %v11823_v46 = vadd.f32 %v9490_v25, %v11505_v10  ;;  %v2599_v23 = vpop.f32.mrb[123].mxu0  ;;  %v3499_v35 = vpop.f32.mrb[137].mxu1 }
 0x22b   : > { %13499 = vst [vmem:[#allocation12_spill] sm:$0xff] %v11818_v5  ;;  %v11826_v29 = vadd.f32 %v2599_v23, %v11490_v58  ;;  %v11830_v26 = vpop.f32.mrb[138].mxu1  ;;  %v3938_v5 = vsel %vm11552_vm4, 0, %v3937_v31 }
 0x22c   : > { %v3502_v44 = vpop.f32.mrb[139].mxu1  ;;  %3939 = vst [vmem:[#allocation3 + $0xb4] sm:$0x1] %v3938_v5  ;;  %v3990_v5 = vld [vmem:[#allocation3 + $0xb0] sm:$0x1] }
 0x22d   : > { %13500 = vst [vmem:[#allocation13_spill] sm:$0xff] %v11826_v29  ;;  %v3934_v29 = vld [vmem:[#allocation3 + $0xa8] sm:$0x1] }
 0x22f   : > { %v9493_v42 = vpop.f32.mrb[124].mxu0 }
 0x230   : > { %v11835_v48 = vadd.f32 %v9493_v42, %v11518_v38  ;;  %v2612_v10 = vpop.f32.mrb[125].mxu0  ;;  %v3935_v38 = vsel %vm11552_vm4, 0, %v3934_v29  ;;  %v3993_v42 = vld [vmem:[#allocation3 + $0xbc] sm:$0x1] }
 0x231   : > { %v11838_v25 = vadd.f32 %v2612_v10, %v11512_v22  ;;  %v9494_v58 = vpop.f32.mrb[126].mxu0  ;;  %v11846_v44 = vpop.f32.mrb[140].mxu1  ;;  %3936 = vst [vmem:[#allocation3 + $0xa8] sm:$0x1] %v3935_v38  ;;  %v3994_v22 = vsel %vm11565_vm6, 0, %v3993_v42 }
 0x232   : > { %13501 = vst [vmem:[#allocation16_spill] sm:$0xff] %v11835_v48  ;;  %v11841_v23 = vadd.f32 %v9494_v58, %v11523_v13  ;;  %v2615_v53 = vpop.f32.mrb[127].mxu0  ;;  %13505 = vst [vmem:[#allocation27_spill] sm:$0xff] %v11846_v44  ;;  %v3507_v31 = vpop.f32.mrb[141].mxu1  ;;  %v3991_v13 = vsel %vm11565_vm6, 0, %v3990_v5 }
 0x233   : > { %13502 = vst [vmem:[#allocation17_spill] sm:$0xff] %v11838_v25  ;;  %v11844_v35 = vadd.f32 %v2615_v53, %v11514_v21  ;;  %v11850_v48 = vpop.f32.mrb[142].mxu1  ;;  %3995 = vst [vmem:[#allocation3 + $0xbc] sm:$0x1] %v3994_v22 }
 0x234   : > { %13503 = vst [vmem:[#allocation21_spill] sm:$0xff] %v11841_v23  ;;  %13506 = vst [vmem:[#allocation28_spill] sm:$0xff] %v11850_v48  ;;  %v3510_v21 = vpop.f32.mrb[143].mxu1 }
 0x235   : > { %13504 = vst [vmem:[#allocation22_spill] sm:$0xff] %v11844_v35  ;;  %3992 = vst [vmem:[#allocation3 + $0xb0] sm:$0x1] %v3991_v13 }
 0x237   : > { %v9497_v10 = vpop.f32.mrb[128].mxu0 }
 0x238   : > { %v11857_v58 = vadd.f32 %v9497_v10, %v11533_v11  ;;  %v2628_v53 = vpop.f32.mrb[129].mxu0  ;;  %v3943_v11 = vld [vmem:[#allocation3 + $0xcc] sm:$0x1] }
 0x239   : > { %v11860_v29 = vadd.f32 %v2628_v53, %v11527_v1  ;;  %v9498_v31 = vpop.f32.mrb[130].mxu0  ;;  %v11868_v5 = vpop.f32.mrb[144].mxu1  ;;  %v3944_v1 = vsel %vm11552_vm4, 0, %v3943_v11  ;;  %v11886_v11 = vld [vmem:[%s13433_s3] ss:$0 sm:$0xff] }
 0x23a   : > { %13507 = vst [vmem:[#allocation29_spill] sm:$0xff] %v11857_v58  ;;  %v11863_v38 = vadd.f32 %v9498_v31, %v11537_v6  ;;  %v2631_v35 = vpop.f32.mrb[131].mxu0  ;;  %v3515_v22 = vpop.f32.mrb[145].mxu1  ;;  %3945 = vst [vmem:[#allocation3 + $0xcc] sm:$0x1] %v3944_v1 }
 0x23b   : > { %13508 = vst [vmem:[#allocation30_spill] sm:$0xff] %v11860_v29  ;;  %v11866_v42 = vadd.f32 %v2631_v35, %v11529_v8  ;;  %v11870_v13 = vpop.f32.mrb[146].mxu1  ;;  %v11878_v8 = vld [vmem:[%s13432_s2] ss:$0 sm:$0xff] }
 0x23c   : > { %13509 = vst [vmem:[#allocation31_spill] sm:$0xff] %v11863_v38  ;;  %13511 = vst [vmem:[#allocation33_spill] sm:$0xff] %v11870_v13  ;;  %v3518_v21 = vpop.f32.mrb[147].mxu1 }
 0x23d   : > { %13510 = vst [vmem:[#allocation32_spill] sm:$0xff] %v11866_v42  ;;  %v3940_v42 = vld [vmem:[#allocation3 + $0xc0] sm:$0x1] }
 0x23f   : > { %v9517_v10 = vpop.f32.mrb[132].mxu0 }
 0x240   : > { %v3579_v53 = vadd.f32 %v9517_v10, %v11569_v59  ;;  %v3570_v29 = vpop.f32.mrb[133].mxu0 }
 0x241   : > { %v3571_v6 = vadd.f32 %v3570_v29, %v11535_v50  ;;  %v9518_v35 = vpop.f32.mrb[134].mxu0  ;;  %v11890_v1 = vpop.f32.mrb[148].mxu1 }
 0x242   : > { %v3715_v31 = vadd.f32 %v3579_v53, %v11690_v20  ;;  %v3582_v22 = vadd.f32 %v9518_v35, %v11575_v30  ;;  %v3573_v21 = vpop.f32.mrb[135].mxu0  ;;  %13512 = vst [vmem:[#allocation34_spill] sm:$0xff] %v11890_v1  ;;  %v3523_v20 = vpop.f32.mrb[149].mxu1  ;;  %v3941_v30 = vsel %vm11552_vm4, 0, %v3940_v42  ;;  %v3999_v53 = vld [vmem:[#allocation3 + $0xd4] sm:$0x1] }
 0x243   : > { %v3713_v59 = vadd.f32 %v3571_v6, %v11693_v36  ;;  %v3574_v10 = vadd.f32 %v3573_v21, %v11542_v43  ;;  %v11898_v58 = vpop.f32.mrb[150].mxu1  ;;  %3942 = vst [vmem:[#allocation3 + $0xc0] sm:$0x1] %v3941_v30  ;;  %v4000_v43 = vsel %vm11565_vm6, 0, %v3999_v53 }
 0x244   : > { %v3758_v50 = vmul.f32 %v11878_v8, %v3715_v31  ;;  %v3716_v29 = vadd.f32 %v3582_v22, %v11696_v34  ;;  %13513 = vst [vmem:[#allocation35_spill] sm:$0xff] %v11898_v58  ;;  %v3526_v34 = vpop.f32.mrb[151].mxu1  ;;  %4001 = vst [vmem:[#allocation3 + $0xd4] sm:$0x1] %v4000_v43  ;;  %v4456_v58 = vld [vmem:[#allocation3] sm:$0xf] }
 0x245   : > { %v3756_v35 = vmul.f32 %v11878_v8, %v3713_v59  ;;  %v3714_v38 = vadd.f32 %v3574_v10, %v11702_v41 }
 0x246   : > { %v3801_v36 = vadd.f32 %v11886_v11, %v3758_v50  ;;  %v3759_v6 = vmul.f32 %v11878_v8, %v3716_v29 }
 0x247   : > { %v3799_v31 = vadd.f32 %v11886_v11, %v3756_v35  ;;  %v3757_v42 = vmul.f32 %v11878_v8, %v3714_v38  ;;  %v9521_v22 = vpop.f32.mrb[136].mxu0 }
 0x248   : > { %v3837_v21 = vmax.f32 %v3801_v36, 0.0  ;;  %v3802_v41 = vadd.f32 %v11886_v11, %v3759_v6  ;;  %v3595_v59 = vadd.f32 %v9521_v22, %v11612_v52  ;;  %v3586_v10 = vpop.f32.mrb[137].mxu0 }
 0x249   : > { %v3835_v20 = vmax.f32 %v3799_v31, 0.0  ;;  %v3800_v50 = vadd.f32 %v11886_v11, %v3757_v42  ;;  %v3587_v29 = vadd.f32 %v3586_v10, %v11587_v61  ;;  %v9522_v30 = vpop.f32.mrb[138].mxu0  ;;  %v11918_v22 = vpop.f32.mrb[152].mxu1 }
 0x24a   : > { %v8748_v53 = vpack.c.bf16 %v3837_v21, %v3837_v21  ;;  %v3838_v43 = vmax.f32 %v3802_v41, 0.0  ;;  %v3719_v35 = vadd.f32 %v3595_v59, %v11718_v51  ;;  %v11912_v38 = vadd.f32 %v9522_v30, %v11620_v57  ;;  %v3589_v36 = vpop.f32.mrb[139].mxu0  ;;  %13514 = vst [vmem:[#allocation36_spill] sm:$0xff] %v11918_v22  ;;  %v3531_v41 = vpop.f32.mrb[153].mxu1 }
 0x24b   : > { %v8746_v34 = vpack.c.bf16 %v3835_v20, %v3835_v20  ;;  %v3836_v6 = vmax.f32 %v3800_v50, 0.0  ;;  %v3717_v52 = vadd.f32 %v3587_v29, %v11723_v49  ;;  %v11916_v31 = vadd.f32 %v3589_v36, %v11595_v0  ;;  %v11922_v20 = vpop.f32.mrb[154].mxu1 }
 0x24c   : > { %v4112_v42 = vshrl.u32 %v8748_v53, 16  ;;  %v4115_v61 = vshll.u32 %v8748_v53, 16  ;;  %v8749_v10 = vpack.c.bf16 %v3838_v43, %v3838_v43  ;;  %v3762_v21 = vmul.f32 %v11878_v8, %v3719_v35  ;;  %13515 = vst [vmem:[#allocation37_spill] sm:$0xff] %v11922_v20  ;;  %v3534_v36 = vpop.f32.mrb[155].mxu1  ;;  %v4463_v43 = vld [vmem:[#allocation3 + $0xc] sm:$0xf] }
 0x24d   : > { %v4095_v51 = vshrl.u32 %v8746_v34, 16  ;;  %v4098_v59 = vshll.u32 %v8746_v34, 16  ;;  %v8747_v57 = vpack.c.bf16 %v3836_v6, %v3836_v6  ;;  %v3760_v30 = vmul.f32 %v11878_v8, %v3717_v52 }
 0x24e   : > { %v4114_v50 = vrot.slane %v4112_v42, 7  ;;  %v4120_v49 = vshrl.u32 %v8749_v10, 16  ;;  %v4123_v29 = vshll.u32 %v8749_v10, 16  ;;  %v3805_v0 = vadd.f32 %v11886_v11, %v3762_v21 }
 0x24f   : > { %v4097_v35 = vrot.slane %v4095_v51, 7  ;;  %v4103_v34 = vshrl.u32 %v8747_v57, 16  ;;  %v4106_v6 = vshll.u32 %v8747_v57, 16  ;;  %v3803_v52 = vadd.f32 %v11886_v11, %v3760_v30  ;;  %v9525_v41 = vpop.f32.mrb[140].mxu0  ;;  %v4467_v51 = vld [vmem:[#allocation3 + $0x14] sm:$0x1] }
 0x250   : > { %v4117_v15 = vor.u32 %v4115_v61, %v4114_v50  ;;  %v4118_v42 = vrot.slane %v4114_v50, 4  ;;  %v4122_v10 = vrot.slane %v4120_v49, 7  ;;  %v3841_v20 = vmax.f32 %v3805_v0, 0.0  ;;  %v3602_v21 = vpop.f32.mrb[141].mxu0  ;;  %v4460_v49 = vld [vmem:[#allocation3 + $0x8] sm:$0x1] }
 0x251   : > { %v4100_v36 = vor.u32 %v4098_v59, %v4097_v35  ;;  %v4101_v1 = vrot.slane %v4097_v35, 4  ;;  %v4105_v48 = vrot.slane %v4103_v34, 7  ;;  %v3839_v57 = vmax.f32 %v3803_v52, 0.0  ;;  %v9526_v23 = vpop.f32.mrb[142].mxu0 }
 0x252   : > { %v4464_v61 = vsel %vm11927_vm9, %v4117_v15, %v4463_v43  ;;  %v4125_v30 = vor.u32 %v4123_v29, %v4122_v10  ;;  %v4127_v50 = vrot.slane %v4122_v10, 4  ;;  %v8752_v0 = vpack.c.bf16 %v3841_v20, %v3841_v20  ;;  %v3605_v25 = vpop.f32.mrb[143].mxu0 }
 0x253   : > { %4465 = vst [vmem:[#allocation3 + $0xc] sm:$0xf] %v4464_v61  ;;  %v4457_v59 = vsel %vm11927_vm9, %v4100_v36, %v4456_v58  ;;  %v4108_v35 = vor.u32 %v4106_v6, %v4105_v48  ;;  %v4110_v13 = vrot.slane %v4105_v48, 4  ;;  %v8750_v44 = vpack.c.bf16 %v3839_v57, %v3839_v57  ;;  %v13521_v61 = vld [vmem:[#allocation15_spill] sm:$0xff] }
 0x254   : > { %4458 = vst [vmem:[#allocation3] sm:$0xf] %v4457_v59  ;;  %v4126_v34 = vsel %vm11934_vm10, %v4118_v42, %v4125_v30  ;;  %v4468_v52 = vsel %vm11552_vm4, %v4127_v50, %v4467_v51  ;;  %v4146_v15 = vshrl.u32 %v8752_v0, 16  ;;  %v4149_v29 = vshll.u32 %v8752_v0, 16 }
 0x255   : > { %v13520_v43 = vmov 0   ;;  %4466 = vst [vmem:[#allocation3 + $0x10] sm:$0xf] %v4126_v34  ;;  %4469 = vst [vmem:[#allocation3 + $0x14] sm:$0x1] %v4468_v52  ;;  %v4109_v20 = vsel %vm11934_vm10, %v4101_v1, %v4108_v35  ;;  %v4461_v48 = vsel %vm11552_vm4, %v4110_v13, %v4460_v49  ;;  %v4129_v58 = vshrl.u32 %v8750_v44, 16 }
 0x256   : > { %4585 = vst [vmem:[#allocation3] sm:$0xf] %v13520_v43  ;;  %v4132_v6 = vshll.u32 %v8750_v44, 16  ;;  %4459 = vst [vmem:[#allocation3 + $0x4] sm:$0xf] %v4109_v20  ;;  %v11951_v42 = vrot.slane %v4146_v15, 7  ;;  %v3720_v10 = vadd.f32 %v11912_v38, %v11726_v12  ;;  %v3718_v36 = vadd.f32 %v11916_v31, %v11729_v19 }
 0x257   : > { %4462 = vst [vmem:[#allocation3 + $0x8] sm:$0x1] %v4461_v48  ;;  %v3611_v51 = vadd.f32 %v9525_v41, %v11659_v14  ;;  %4586 = vst [vmem:[#allocation3 + $0x4] sm:$0xf] %v13520_v43  ;;  %v4477_v1 = vld [vmem:[#allocation3 + $0x24] sm:$0xf]  ;;  %v3603_v44 = vadd.f32 %v3602_v21, %v11638_v33  ;;  %v3614_v57 = vadd.f32 %v9526_v23, %v11666_v27 }
 0x258   : > { %4587 = vst [vmem:[#allocation3 + $0x8] sm:$0xf] %v13520_v43  ;;  %v11960_v13 = vrot.slane %v4129_v58, 7  ;;  %v3606_v30 = vadd.f32 %v3605_v25, %v13521_v61  ;;  %v9529_v50 = vpop.f32.mrb[144].mxu0  ;;  %v4151_v12 = vor.u32 %v4149_v29, %v11951_v42  ;;  %v4152_v19 = vrot.slane %v11951_v42, 4 }
 0x259   : > { %v4470_v38 = vld [vmem:[#allocation3 + $0x18] sm:$0xf]  ;;  %v3763_v14 = vmul.f32 %v11878_v8, %v3720_v10  ;;  %v3761_v31 = vmul.f32 %v11878_v8, %v3718_v36  ;;  %v3618_v41 = vpop.f32.mrb[145].mxu0  ;;  %v3723_v33 = vadd.f32 %v3611_v51, %v11735_v17  ;;  %v3721_v27 = vadd.f32 %v3603_v44, %v11738_v16 }
 0x25a   : > { %v4134_v49 = vor.u32 %v4132_v6, %v11960_v13  ;;  %v4135_v0 = vrot.slane %v11960_v13, 4  ;;  %v11973_v25 = vpop.f32.mrb[146].mxu0  ;;  %v4478_v23 = vsel %vm11927_vm9, %v4151_v12, %v4477_v1  ;;  %v3724_v35 = vadd.f32 %v3614_v57, %v11740_v45  ;;  %v13522_v36 = vld [vmem:[#allocation20_spill] sm:$0xff] }
 0x25b   : > { %v3806_v21 = vadd.f32 %v11886_v11, %v3763_v14  ;;  %v3804_v59 = vadd.f32 %v11886_v11, %v3761_v31  ;;  %v11980_v34 = vpop.f32.mrb[147].mxu0  ;;  %4479 = vst [vmem:[#allocation3 + $0x24] sm:$0xf] %v4478_v23  ;;  %v3766_v17 = vmul.f32 %v11878_v8, %v3723_v33  ;;  %v3764_v16 = vmul.f32 %v11878_v8, %v3721_v27  ;;  %v4481_v27 = vld [vmem:[#allocation3 + $0x2c] sm:$0x1] }
 0x25c   : > { %v4471_v52 = vsel %vm11927_vm9, %v4134_v49, %v4470_v38  ;;  %v3722_v15 = vadd.f32 %v3606_v30, %v11745_v3  ;;  %v3767_v48 = vmul.f32 %v11878_v8, %v3724_v35  ;;  %v3627_v58 = vadd.f32 %v9529_v50, %v11704_v37  ;;  %v10164_v38 = vld [vmem:[%s13434_s4 + $0x1c0] sm:$0xff]  }
 0x25d   : > { %4472 = vst [vmem:[#allocation3 + $0x18] sm:$0xf] %v4471_v52  ;;  %v3842_v29 = vmax.f32 %v3806_v21, 0.0  ;;  %v3840_v20 = vmax.f32 %v3804_v59, 0.0  ;;  %v3809_v45 = vadd.f32 %v11886_v11, %v3766_v17  ;;  %v3807_v6 = vadd.f32 %v11886_v11, %v3764_v16  ;;  %9259 = vmatprep.subr.bf16.mxu0 %v10164_v38 }
 0x25e   : > { %v3765_v10 = vmul.f32 %v11878_v8, %v3722_v15  ;;  %v3619_v51 = vadd.f32 %v3618_v41, %v13522_v36  ;;  %v3810_v57 = vadd.f32 %v11886_v11, %v3767_v48  ;;  %v3727_v3 = vadd.f32 %v3627_v58, %v11752_v32  ;;  %v4474_v32 = vld [vmem:[#allocation3 + $0x20] sm:$0x1] }
 0x25f   : > { %v8753_v1 = vpack.c.bf16 %v3842_v29, %v3842_v29  ;;  %v8751_v44 = vpack.c.bf16 %v3840_v20, %v3840_v20  ;;  %v3845_v61 = vmax.f32 %v3809_v45, 0.0  ;;  %v3843_v30 = vmax.f32 %v3807_v6, 0.0  ;;  %v11997_v50 = vpop.f32.mrb[148].mxu0 }
 0x260   : > { %v3808_v12 = vadd.f32 %v11886_v11, %v3765_v10  ;;  %v3725_v37 = vadd.f32 %v3619_v51, %v11755_v56  ;;  %v12002_v33 = vpop.f32.mrb[149].mxu0  ;;  %v3846_v59 = vmax.f32 %v3810_v57, 0.0  ;;  %v3770_v16 = vmul.f32 %v11878_v8, %v3727_v3 }
 0x261   : > { %v4154_v14 = vshrl.u32 %v8753_v1, 16  ;;  %v4157_v31 = vshll.u32 %v8753_v1, 16  ;;  %v4137_v41 = vshrl.u32 %v8751_v44, 16  ;;  %v4140_v49 = vshll.u32 %v8751_v44, 16  ;;  %v12004_v52 = vpop.f32.mrb[150].mxu0 }
 0x262   : > { %v8756_v23 = vpack.c.bf16 %v3845_v61, %v3845_v61  ;;  %v8754_v21 = vpack.c.bf16 %v3843_v30, %v3843_v30  ;;  %v3844_v35 = vmax.f32 %v3808_v12, 0.0  ;;  %v3768_v15 = vmul.f32 %v11878_v8, %v3725_v37  ;;  %v12008_v29 = vpop.f32.mrb[151].mxu0  ;;  %v4491_v1 = vld [vmem:[#allocation3 + $0x3c] sm:$0xf] }
 0x263   : > { %v4156_v56 = vrot.slane %v4154_v14, 7  ;;  %v4139_v17 = vrot.slane %v4137_v41, 7  ;;  %v8757_v61 = vpack.c.bf16 %v3846_v59, %v3846_v59  ;;  %v4484_v14 = vld [vmem:[#allocation3 + $0x30] sm:$0xf] }
 0x264   : > { %v4180_v20 = vshrl.u32 %v8756_v23, 16  ;;  %v4183_v48 = vshll.u32 %v8756_v23, 16  ;;  %v4163_v58 = vshrl.u32 %v8754_v21, 16  ;;  %v4166_v45 = vshll.u32 %v8754_v21, 16 }
 0x265   : > { %v4159_v6 = vor.u32 %v4157_v31, %v4156_v56  ;;  %v4161_v10 = vrot.slane %v4156_v56, 4  ;;  %v4142_v36 = vor.u32 %v4140_v49, %v4139_v17  ;;  %v4144_v51 = vrot.slane %v4139_v17, 4 }
 0x266   : > { %v4182_v44 = vrot.slane %v4180_v20, 7  ;;  %v4165_v57 = vrot.slane %v4163_v58, 7  ;;  %v8755_v30 = vpack.c.bf16 %v3844_v35, %v3844_v35  ;;  %v4191_v23 = vshll.u32 %v8757_v61, 16  ;;  %v13523_v58 = vld [vmem:[#allocation19_spill] sm:$0xff] }
 0x267   : > { %v4160_v3 = vsel %vm11934_vm10, %v4152_v19, %v4159_v6  ;;  %v4482_v12 = vsel %vm11552_vm4, %v4161_v10, %v4481_v27  ;;  %v4143_v37 = vsel %vm11934_vm10, %v4135_v0, %v4142_v36  ;;  %v4475_v38 = vsel %vm11552_vm4, %v4144_v51, %v4474_v32  ;;  %v12022_v49 = vpop.f32.mrb[152].mxu0  ;;  %v13524_v6 = vld [vmem:[#allocation18_spill] sm:$0xff]  ;;  %v4495_v51 = vld [vmem:[#allocation3 + $0x44] sm:$0x1] }
 0x268   : > { %4480 = vst [vmem:[#allocation3 + $0x28] sm:$0xf] %v4160_v3  ;;  %4483 = vst [vmem:[#allocation3 + $0x2c] sm:$0x1] %v4482_v12  ;;  %v4185_v42 = vor.u32 %v4183_v48, %v4182_v44  ;;  %v4186_v31 = vrot.slane %v4182_v44, 4  ;;  %v4168_v41 = vor.u32 %v4166_v45, %v4165_v57  ;;  %v4169_v19 = vrot.slane %v4165_v57, 4 }
 0x269   : > { %4473 = vst [vmem:[#allocation3 + $0x1c] sm:$0xf] %v4143_v37  ;;  %4476 = vst [vmem:[#allocation3 + $0x20] sm:$0x1] %v4475_v38  ;;  %v4188_v27 = vshrl.u32 %v8757_v61, 16  ;;  %v4171_v13 = vshrl.u32 %v8755_v30, 16  ;;  %v3813_v35 = vadd.f32 %v11886_v11, %v3770_v16  ;;  %v3811_v56 = vadd.f32 %v11886_v11, %v3768_v15 }
 0x26a   : > { %v4174_v21 = vshll.u32 %v8755_v30, 16  ;;  %v12024_v59 = vpop.f32.mrb[153].mxu0  ;;  %v4492_v0 = vsel %vm11927_vm9, %v4185_v42, %v4491_v1  ;;  %v4485_v32 = vsel %vm11927_vm9, %v4168_v41, %v4484_v14  ;;  %v3630_v45 = vadd.f32 %v11973_v25, %v13523_v58  ;;  %v4488_v1 = vld [vmem:[#allocation3 + $0x38] sm:$0x1]  ;;  %v13527_v58 = vld [vmem:[#allocation26_spill] sm:$0xff] }
 0x26b   : > { %v12032_v17 = vpop.f32.mrb[154].mxu0  ;;  %4493 = vst [vmem:[#allocation3 + $0x3c] sm:$0xf] %v4492_v0  ;;  %4486 = vst [vmem:[#allocation3 + $0x30] sm:$0xf] %v4485_v32  ;;  %v4190_v20 = vrot.slane %v4188_v27, 7  ;;  %v3622_v10 = vadd.f32 %v11980_v34, %v13524_v6  ;;  %v3643_v15 = vadd.f32 %v11997_v50, %v11747_v39 }
 0x26c   : > { %v4173_v48 = vrot.slane %v4171_v13, 7  ;;  %v12038_v36 = vpop.f32.mrb[155].mxu0  ;;  %v3849_v44 = vmax.f32 %v3813_v35, 0.0  ;;  %v3847_v16 = vmax.f32 %v3811_v56, 0.0  ;;  %v13525_v57 = vld [vmem:[#allocation24_spill] sm:$0xff]  ;;  %v3728_v34 = vadd.f32 %v3630_v45, %v11758_v2 }
 0x26d   : > { %v3635_v61 = vadd.f32 %v12002_v33, %v13525_v57  ;;  %v4193_v30 = vor.u32 %v4191_v23, %v4190_v20  ;;  %v4195_v3 = vrot.slane %v4190_v20, 4  ;;  %v3726_v14 = vadd.f32 %v3622_v10, %v11761_v63  ;;  %v4505_v23 = vld [vmem:[#allocation3 + $0x54] sm:$0xf]  ;;  %v4498_v13 = vld [vmem:[#allocation3 + $0x48] sm:$0xf]  ;;  %v12082_v57 = vld [vmem:[#allocation3 + $0xc] sm:$0xff]  }
 0x26e   : > { %v4176_v12 = vor.u32 %v4174_v21, %v4173_v48  ;;  %v4178_v37 = vrot.slane %v4173_v48, 4  ;;  %v8760_v25 = vpack.c.bf16 %v3849_v44, %v3849_v44  ;;  %v8758_v38 = vpack.c.bf16 %v3847_v16, %v3847_v16  ;;  %v13526_v20 = vld [vmem:[#allocation23_spill] sm:$0xff] }
 0x26f   : > { %v4194_v42 = vsel %vm11934_vm10, %v4186_v31, %v4193_v30  ;;  %v4496_v41 = vsel %vm11552_vm4, %v4195_v3, %v4495_v51  ;;  %v3771_v31 = vmul.f32 %v11878_v8, %v3728_v34  ;;  %v3769_v21 = vmul.f32 %v11878_v8, %v3726_v14  ;;  %v12058_v32 = vpop.f32.mrb[156].mxu0  ;;  %v12068_v6 = vld [vmem:[#allocation3 + $0x14] ss:$0 sps:$4 sm:$0xff]  }
 0x270   : > { %v4177_v39 = vsel %vm11934_vm10, %v4169_v19, %v4176_v12  ;;  %v4489_v50 = vsel %vm11552_vm4, %v4178_v37, %v4488_v1  ;;  %4494 = vst [vmem:[#allocation3 + $0x40] sm:$0xf] %v4194_v42  ;;  %4497 = vst [vmem:[#allocation3 + $0x44] sm:$0x1] %v4496_v41  ;;  %v4214_v33 = vshrl.u32 %v8760_v25, 16  ;;  %v4217_v2 = vshll.u32 %v8760_v25, 16 }
 0x271   : > { %4487 = vst [vmem:[#allocation3 + $0x34] sm:$0xf] %v4177_v39  ;;  %4490 = vst [vmem:[#allocation3 + $0x38] sm:$0x1] %v4489_v50  ;;  %v4197_v27 = vshrl.u32 %v8758_v38, 16  ;;  %v4200_v63 = vshll.u32 %v8758_v38, 16  ;;  %v3731_v0 = vadd.f32 %v3643_v15, %v11774_v62  ;;  %v3729_v19 = vadd.f32 %v3635_v61, %v11777_v40 }
 0x272   : > { %v12060_v35 = vrot.slane %v4214_v33, 7  ;;  %v3646_v48 = vadd.f32 %v12004_v52, %v13526_v20  ;;  %v3638_v45 = vadd.f32 %v12008_v29, %v13527_v58  ;;  %v12070_v10 = vpop.f32.mrb[157].mxu0  ;;  %v3814_v62 = vadd.f32 %v11886_v11, %v3771_v31  ;;  %v4502_v58 = vld [vmem:[#allocation3 + $0x50] sm:$0x1] }
 0x273   : > { %v12062_v56 = vrot.slane %v4197_v27, 7  ;;  %v3812_v40 = vadd.f32 %v11886_v11, %v3769_v21  ;;  %v3774_v51 = vmul.f32 %v11878_v8, %v3731_v0  ;;  %v3772_v1 = vmul.f32 %v11878_v8, %v3729_v19  ;;  %v12076_v44 = vpop.f32.mrb[158].mxu0  ;;  %v4509_v21 = vld [vmem:[#allocation3 + $0x5c] sm:$0x1] }
 0x274   : > { %v4219_v16 = vor.u32 %v4217_v2, %v12060_v35  ;;  %v4220_v52 = vrot.slane %v12060_v35, 4  ;;  %v12084_v61 = vpop.f32.mrb[159].mxu0  ;;  %v3850_v30 = vmax.f32 %v3814_v62, 0.0  ;;  %v3732_v34 = vadd.f32 %v3646_v48, %v11780_v18 }
 0x275   : > { %v4202_v29 = vor.u32 %v4200_v63, %v12062_v56  ;;  %v4203_v15 = vrot.slane %v12062_v56, 4  ;;  %v3848_v3 = vmax.f32 %v3812_v40, 0.0  ;;  %v3817_v12 = vadd.f32 %v11886_v11, %v3774_v51 }
 0x276   : > { %v3815_v37 = vadd.f32 %v11886_v11, %v3772_v1  ;;  %v4506_v25 = vsel %vm11927_vm9, %v4219_v16, %v4505_v23  ;;  %v3730_v14 = vadd.f32 %v3638_v45, %v11783_v47  ;;  %v8761_v42 = vpack.c.bf16 %v3850_v30, %v3850_v30 }
 0x277   : > { %v4499_v38 = vsel %vm11927_vm9, %v4202_v29, %v4498_v13  ;;  %4507 = vst [vmem:[#allocation3 + $0x54] sm:$0xf] %v4506_v25  ;;  %v8759_v41 = vpack.c.bf16 %v3848_v3, %v3848_v3  ;;  %v3853_v39 = vmax.f32 %v3817_v12, 0.0  ;;  %v3775_v33 = vmul.f32 %v11878_v8, %v3732_v34  ;;  %v12100_v56 = vpop.f32.mrb[160].mxu0  ;;  %v4512_v34 = vld [vmem:[#allocation3 + $0x60] sm:$0xf] }
 0x278   : > { %4500 = vst [vmem:[#allocation3 + $0x48] sm:$0xf] %v4499_v38  ;;  %v3851_v50 = vmax.f32 %v3815_v37, 0.0  ;;  %v3773_v2 = vmul.f32 %v11878_v8, %v3730_v14  ;;  %v5505_v27 = vrot.slane %v12082_v57, 1  ;;  %v5506_v63 = vrot.slane %v12068_v6, 1  ;;  %v12104_v40 = vpop.f32.mrb[161].mxu0 }
 0x279   : > { %v4222_v23 = vshrl.u32 %v8761_v42, 16  ;;  %v4225_v13 = vshll.u32 %v8761_v42, 16  ;;  %v4205_v31 = vshrl.u32 %v8759_v41, 16  ;;  %v4208_v18 = vshll.u32 %v8759_v41, 16  ;;  %v12106_v30 = vpop.f32.mrb[162].mxu0 }
 0x27a   : > { %v8764_v47 = vpack.c.bf16 %v3853_v39, %v3853_v39  ;;  %v8762_v0 = vpack.c.bf16 %v3851_v50, %v3851_v50  ;;  %v3818_v19 = vadd.f32 %v11886_v11, %v3775_v33  ;;  %v3816_v35 = vadd.f32 %v11886_v11, %v3773_v2  ;;  %v4519_v38 = vld [vmem:[#allocation3 + $0x6c] sm:$0xf]  ;;  %v12108_v14 = vpop.f32.mrb[163].mxu0 }
 0x27b   : > { %v4224_v20 = vrot.slane %v4222_v23, 7  ;;  %v4207_v48 = vrot.slane %v4205_v31, 7  ;;  %v5507_v45 = vsel %vm954_vm0, %v5505_v27, %v5506_v63  ;;  %v5298_v62 = vshrl.u32 %v12082_v57, 16 }
 0x27c   : > { %v4248_v51 = vshrl.u32 %v8764_v47, 16  ;;  %v4251_v1 = vshll.u32 %v8764_v47, 16  ;;  %v4231_v16 = vshrl.u32 %v8762_v0, 16  ;;  %v4234_v29 = vshll.u32 %v8762_v0, 16  ;;  %9567 = vmatprep.mubr.bf16.mxu1 %v5507_v45  ;;  %v13529_v45 = vld [vmem:[#allocation25_spill] sm:$0xff] }
 0x27d   : > { %v4227_v3 = vor.u32 %v4225_v13, %v4224_v20  ;;  %v4229_v12 = vrot.slane %v4224_v20, 4  ;;  %v4210_v37 = vor.u32 %v4208_v18, %v4207_v48  ;;  %v4212_v25 = vrot.slane %v4207_v48, 4  ;;  %v13528_v48 = vld [vmem:[#allocation9_spill] sm:$0xff] }
 0x27e   : > { %v12110_v42 = vrot.slane %v4248_v51, 7  ;;  %v12112_v41 = vrot.slane %v4231_v16, 7  ;;  %v3854_v39 = vmax.f32 %v3818_v19, 0.0  ;;  %v3852_v50 = vmax.f32 %v3816_v35, 0.0 }
 0x27f   : > { %v4228_v33 = vsel %vm11934_vm10, %v4220_v52, %v4227_v3  ;;  %v4510_v2 = vsel %vm11552_vm4, %v4229_v12, %v4509_v21  ;;  %v4211_v27 = vsel %vm11934_vm10, %v4203_v15, %v4210_v37  ;;  %v4503_v63 = vsel %vm11552_vm4, %v4212_v25, %v4502_v58  ;;  %v12126_v18 = vpop.f32.mrb[164].mxu0  ;;  %v4523_v25 = vld [vmem:[#allocation3 + $0x74] sm:$0x1] }
 0x280   : > { %4508 = vst [vmem:[#allocation3 + $0x58] sm:$0xf] %v4228_v33  ;;  %4511 = vst [vmem:[#allocation3 + $0x5c] sm:$0x1] %v4510_v2  ;;  %v4253_v23 = vor.u32 %v4251_v1, %v12110_v42  ;;  %v4254_v13 = vrot.slane %v12110_v42, 4  ;;  %v4236_v31 = vor.u32 %v4234_v29, %v12112_v41  ;;  %v4237_v52 = vrot.slane %v12112_v41, 4 }
 0x281   : > { %4501 = vst [vmem:[#allocation3 + $0x4c] sm:$0xf] %v4211_v27  ;;  %4504 = vst [vmem:[#allocation3 + $0x50] sm:$0x1] %v4503_v63  ;;  %v8765_v21 = vpack.c.bf16 %v3854_v39, %v3854_v39  ;;  %v8763_v47 = vpack.c.bf16 %v3852_v50, %v3852_v50  ;;  %v5300_v15 = vshll.u32 %v12082_v57, 16  ;;  %v5305_v0 = vshll.u32 %v12068_v6, 16 }
 0x282   : > { %v12130_v19 = vpop.f32.mrb[165].mxu0  ;;  %v4520_v35 = vsel %vm11927_vm9, %v4253_v23, %v4519_v38  ;;  %v4513_v20 = vsel %vm11927_vm9, %v4236_v31, %v4512_v34  ;;  %v3659_v58 = vadd.f32 %v12022_v49, %v13528_v48  ;;  %v3651_v51 = vadd.f32 %v12024_v59, %v13529_v45  ;;  %v12140_v1 = vld [vmem:[#allocation3 + $0x18] sm:$0xff]   ;;  %v4516_v38 = vld [vmem:[#allocation3 + $0x68] sm:$0x1]  ;;  %v12152_v63 = vld [vmem:[#allocation3 + $0x20] ss:$0 sps:$4 sm:$0xff]  }
 0x283   : > { %v12142_v16 = vpop.f32.mrb[166].mxu0  ;;  %4521 = vst [vmem:[#allocation3 + $0x6c] sm:$0xf] %v4520_v35  ;;  %4514 = vst [vmem:[#allocation3 + $0x60] sm:$0xf] %v4513_v20  ;;  %v4256_v6 = vshrl.u32 %v8765_v21, 16 }
 0x284   : > { %v4259_v29 = vshll.u32 %v8765_v21, 16  ;;  %v4239_v3 = vshrl.u32 %v8763_v47, 16  ;;  %v4242_v12 = vshll.u32 %v8763_v47, 16  ;;  %v12144_v37 = vpop.f32.mrb[167].mxu0  ;;  %v5302_v34 = vrot.slane %v5300_v15, 1  ;;  %v13530_v50 = vld [vmem:[#allocation10_spill] sm:$0xff] }
 0x285   : > { %v5307_v42 = vrot.slane %v5305_v0, 1  ;;  %v3735_v49 = vadd.f32 %v3659_v58, %v11797_v54  ;;  %v3733_v59 = vadd.f32 %v3651_v51, %v11800_v28  ;;  %v4258_v41 = vrot.slane %v4256_v6, 7  ;;  %v13531_v2 = vld [vmem:[#allocation8_spill] sm:$0xff]  ;;  %v10165_v23 = vld [vmem:[%s13434_s4 + $0x180] sm:$0xff]   ;;  %v12162_v15 = vld [vmem:[#allocation3 + $0x2c] ss:$0 sps:$4 sm:$0xff]  }
 0x286   : > { %v4241_v39 = vrot.slane %v4239_v3, 7  ;;  %v3662_v33 = vadd.f32 %v12032_v17, %v13530_v50  ;;  %v3654_v27 = vadd.f32 %v12038_v36, %v13531_v2  ;;  %v5303_v31 = vor.u32 %v5302_v34, %v5298_v62  ;;  %v12160_v47 = vld [vmem:[#allocation3 + $0x24] sm:$0xff]  }
 0x287   : > { %v3778_v21 = vmul.f32 %v11878_v8, %v3735_v49  ;;  %v3776_v54 = vmul.f32 %v11878_v8, %v3733_v59  ;;  %v5508_v28 = vrot.slane %v12140_v1, 1  ;;  %v4261_v17 = vor.u32 %v4259_v29, %v4258_v41  ;;  %v10173_v45 = vld [vmem:[%s13434_s4 + $0x1c8] sm:$0xff]  }
 0x288   : > { %v4263_v0 = vrot.slane %v4258_v41, 4  ;;  %v4244_v36 = vor.u32 %v4242_v12, %v4241_v39  ;;  %v4246_v35 = vrot.slane %v4241_v39, 4  ;;  %v5308_v20 = vsel %vm719_vm1, %v5303_v31, %v5307_v42  ;;  %v10126_v39 = vld [vmem:[%s13434_s4 + $0x48] sm:$0xff]  }
 0x289   : > { %v3821_v48 = vadd.f32 %v11886_v11, %v3778_v21  ;;  %v3819_v62 = vadd.f32 %v11886_v11, %v3776_v54  ;;  %v3736_v58 = vadd.f32 %v3662_v33, %v11803_v7  ;;  %v4262_v51 = vsel %vm11934_vm10, %v4254_v13, %v4261_v17  ;;  %5794 = vmatprep.mubr.bf16.mxu0 %v5308_v20  ;;  %v10174_v50 = vld [vmem:[%s13434_s4 + $0x188] sm:$0xff]  }
 0x28a   : > { %v4524_v6 = vsel %vm11552_vm4, %v4263_v0, %v4523_v25  ;;  %v4245_v29 = vsel %vm11934_vm10, %v4237_v52, %v4244_v36  ;;  %v4517_v3 = vsel %vm11552_vm4, %v4246_v35, %v4516_v38  ;;  %4522 = vst [vmem:[#allocation3 + $0x70] sm:$0xf] %v4262_v51  ;;  %5795 = vmatmul.mubr.bf16.vlgmr.msra.gmra.mrb[168].mxu0 %v12082_v57  ;;  %v5509_v25 = vrot.slane %v12152_v63, 1  ;;  %v10123_v38 = vld [vmem:[%s13434_s4] sm:$0xff]   ;;  %v10129_v17 = vld [vmem:[%s13434_s4 + $0x8] sm:$0xff]  }
 0x28b   : > { %4525 = vst [vmem:[#allocation3 + $0x74] sm:$0x1] %v4524_v6  ;;  %4515 = vst [vmem:[#allocation3 + $0x64] sm:$0xf] %v4245_v29  ;;  %v3857_v7 = vmax.f32 %v3821_v48, 0.0  ;;  %v3855_v12 = vmax.f32 %v3819_v62, 0.0  ;;  %v3779_v13 = vmul.f32 %v11878_v8, %v3736_v58  ;;  %v3734_v34 = vadd.f32 %v3654_v27, %v11806_v9  ;;  %9260 = vmatpush3.bf16.msra.mxu0 %v10165_v23 }
 0x28c   : > { %4518 = vst [vmem:[#allocation3 + $0x68] sm:$0x1] %v4517_v3  ;;  %v5511_v52 = vrot.slane %v12160_v47, 1  ;;  %v5512_v42 = vrot.slane %v12162_v15, 1  ;;  %v3675_v49 = vadd.f32 %v12058_v32, %v11828_v60  ;;  %9261 = vmatprep.subr.bf16.mxu0 %v10173_v45  ;;  %v5510_v33 = vsel %vm954_vm0, %v5508_v28, %v5509_v25  ;;  %v10180_v27 = vld [vmem:[%s13434_s4 + $0x1d0] sm:$0xff]  }
 0x28d   : > { %v8768_v57 = vpack.c.bf16 %v3857_v7, %v3857_v7  ;;  %v8766_v59 = vpack.c.bf16 %v3855_v12, %v3855_v12  ;;  %v3822_v41 = vadd.f32 %v11886_v11, %v3779_v13  ;;  %v3777_v9 = vmul.f32 %v11878_v8, %v3734_v34  ;;  %9568 = vmatmul.mubr.bf16.vlgmr.msra.gmra.mrb[156].mxu1 %v5510_v33  ;;  %v10132_v28 = vld [vmem:[%s13434_s4 + $0x50] sm:$0xff]   ;;  %v4526_v0 = vld [vmem:[#allocation3 + $0x78] sm:$0xf] }
 0x28e   : > { %v5513_v60 = vsel %vm954_vm0, %v5511_v52, %v5512_v42  ;;  %v3739_v32 = vadd.f32 %v3675_v49, %v11815_v55  ;;  %v5310_v2 = vshrl.u32 %v12140_v1, 16  ;;  %v4533_v55 = vld [vmem:[#allocation3 + $0x84] sm:$0xf]  ;;  %9124 = vmatpush3.bf16.msra.mxu1 %v10123_v38  ;;  %v5312_v48 = vshll.u32 %v12140_v1, 16  ;;  %v10181_v6 = vld [vmem:[%s13434_s4 + $0x190] sm:$0xff]  }
 0x28f   : > { %v4282_v23 = vshrl.u32 %v8768_v57, 16  ;;  %v4285_v31 = vshll.u32 %v8768_v57, 16  ;;  %v4265_v21 = vshrl.u32 %v8766_v59, 16  ;;  %v4268_v54 = vshll.u32 %v8766_v59, 16  ;;  %9571 = vmatprep.mubr.bf16.mxu1 %v5513_v60  ;;  %9125 = vmatprep.subr.bf16.mxu1 %v10126_v39  ;;  %v4537_v39 = vld [vmem:[#allocation3 + $0x8c] sm:$0x1] }
 0x290   : > { %v3858_v36 = vmax.f32 %v3822_v41, 0.0  ;;  %v3820_v35 = vadd.f32 %v11886_v11, %v3777_v9  ;;  %v3782_v20 = vmul.f32 %v11878_v8, %v3739_v32  ;;  %v5317_v45 = vshll.u32 %v12152_v63, 16  ;;  %9262 = vmatpush3.bf16.msra.mxu0 %v10174_v50  ;;  %v10138_v41 = vld [vmem:[%s13434_s4 + $0x58] sm:$0xff]  }
 0x291   : > { %v12214_v62 = vrot.slane %v4282_v23, 7  ;;  %v12216_v58 = vrot.slane %v4265_v21, 7  ;;  %v3667_v51 = vadd.f32 %v12070_v10, %v11808_v24  ;;  %v5314_v7 = vrot.slane %v5312_v48, 1  ;;  %9263 = vmatprep.subr.bf16.mxu0 %v10180_v27  ;;  %v10135_v10 = vld [vmem:[%s13434_s4 + $0x10] sm:$0xff]   ;;  %v10188_v32 = vld [vmem:[%s13434_s4 + $0x198] sm:$0xff]  }
 0x292   : > { %v8769_v29 = vpack.c.bf16 %v3858_v36, %v3858_v36  ;;  %v3856_v3 = vmax.f32 %v3820_v35, 0.0  ;;  %v3825_v8 = vadd.f32 %v11886_v11, %v3782_v20  ;;  %9126 = vmatpush3.bf16.msra.mxu1 %v10129_v17  ;;  %v10187_v11 = vld [vmem:[%s13434_s4 + $0x1d8] sm:$0xff]   ;;  %v5319_v59 = vrot.slane %v5317_v45, 1  ;;  %v4530_v35 = vld [vmem:[#allocation3 + $0x80] sm:$0x1]  ;;  %v12265_v45 = vld [vmem:[#allocation3 + $0x30] sm:$0xff]  }
 0x293   : > { %v4287_v12 = vor.u32 %v4285_v31, %v12214_v62  ;;  %v4288_v13 = vrot.slane %v12214_v62, 4  ;;  %v4270_v63 = vor.u32 %v4268_v54, %v12216_v58  ;;  %v4271_v24 = vrot.slane %v12216_v58, 4  ;;  %9127 = vmatprep.subr.bf16.mxu1 %v10132_v28  ;;  %v13532_v27 = vld [vmem:[#allocation12_spill] sm:$0xff]  ;;  %v10189_v54 = vld [vmem:[%s13434_s4 + $0x1e0] sm:$0xff]  }
 0x294   : > { %v4290_v34 = vshrl.u32 %v8769_v29, 16  ;;  %v4293_v25 = vshll.u32 %v8769_v29, 16  ;;  %v8767_v52 = vpack.c.bf16 %v3856_v3, %v3856_v3  ;;  %v3861_v42 = vmax.f32 %v3825_v8, 0.0  ;;  %9264 = vmatpush3.bf16.msra.mxu0 %v10181_v6  ;;  %v10141_v36 = vld [vmem:[%s13434_s4 + $0x18] sm:$0xff]  }
 0x295   : > { %v4534_v38 = vsel %vm11927_vm9, %v4287_v12, %v4533_v55  ;;  %v4527_v49 = vsel %vm11927_vm9, %v4270_v63, %v4526_v0  ;;  %v5315_v57 = vor.u32 %v5314_v7, %v5310_v2  ;;  %9265 = vmatprep.subr.bf16.mxu0 %v10187_v11  ;;  %v3737_v23 = vadd.f32 %v3667_v51, %v13532_v27  ;;  %v10144_v51 = vld [vmem:[%s13434_s4 + $0x60] sm:$0xff]   ;;  %v12274_v7 = vld [vmem:[#allocation3 + $0x38] ss:$0 sps:$4 sm:$0xff]  }
 0x296   : > { %4535 = vst [vmem:[#allocation3 + $0x84] sm:$0xf] %v4534_v38  ;;  %4528 = vst [vmem:[#allocation3 + $0x78] sm:$0xf] %v4527_v49  ;;  %v4292_v9 = vrot.slane %v4290_v34, 7  ;;  %v4273_v50 = vshrl.u32 %v8767_v52, 16  ;;  %v8772_v60 = vpack.c.bf16 %v3861_v42, %v3861_v42  ;;  %v3678_v31 = vadd.f32 %v12076_v44, %v11830_v26  ;;  %9128 = vmatpush3.bf16.msra.mxu1 %v10135_v10 }
 0x297   : > { %v4276_v33 = vshll.u32 %v8767_v52, 16  ;;  %v5320_v2 = vsel %vm719_vm1, %v5315_v57, %v5319_v59  ;;  %v5322_v21 = vshrl.u32 %v12160_v47, 16  ;;  %v12259_v26 = vld [vmem:[%s13432_s2] ss:$0 sm:$0xff]  ;;  %v5324_v62 = vshll.u32 %v12160_v47, 16  ;;  %9129 = vmatprep.subr.bf16.mxu1 %v10138_v41  ;;  %v10150_v52 = vld [vmem:[%s13434_s4 + $0x68] sm:$0xff]  }
 0x298   : > { %v4295_v17 = vor.u32 %v4293_v25, %v4292_v9  ;;  %v4297_v28 = vrot.slane %v4292_v9, 4  ;;  %v4275_v55 = vrot.slane %v4273_v50, 7  ;;  %v4316_v0 = vshrl.u32 %v8772_v60, 16  ;;  %5802 = vmatprep.mubr.bf16.mxu0 %v5320_v2  ;;  %9266 = vmatpush3.bf16.msra.mxu0 %v10188_v32  ;;  %v10190_v12 = vld [vmem:[%s13434_s4 + $0x1a0] sm:$0xff]   ;;  %v10194_v42 = vld [vmem:[%s13434_s4 + $0x1e8] sm:$0xff]   ;;  %v13533_v57 = vld [vmem:[#allocation11_spill] sm:$0xff] }
 0x299   : > { %v4319_v20 = vshll.u32 %v8772_v60, 16  ;;  %v3780_v44 = vmul.f32 %v12259_v26, %v3737_v23  ;;  %5803 = vmatmul.mubr.bf16.gmra.mrb[172].mxu0 %v12140_v1  ;;  %v3740_v48 = vadd.f32 %v3678_v31, %v11823_v46  ;;  %v4547_v1 = vld [vmem:[#allocation3 + $0x9c] sm:$0xf]  ;;  %v10147_v46 = vld [vmem:[%s13434_s4 + $0x20] sm:$0xff]   ;;  %v5326_v25 = vrot.slane %v5324_v62, 1  ;;  %9267 = vmatprep.subr.bf16.mxu0 %v10189_v54  ;;  %v10153_v2 = vld [vmem:[%s13434_s4 + $0x28] sm:$0xff]  }
 0x29a   : > { %v4296_v6 = vsel %vm11934_vm10, %v4288_v13, %v4295_v17  ;;  %v4538_v29 = vsel %vm11552_vm4, %v4297_v28, %v4537_v39  ;;  %v4278_v3 = vor.u32 %v4276_v33, %v4275_v55  ;;  %v4280_v8 = vrot.slane %v4275_v55, 4  ;;  %v12287_v63 = vld [vmem:[%s13433_s3] ss:$0 sm:$0xff]  ;;  %v12308_v9 = vld [vmem:[#allocation3 + $0x44] ss:$0 sps:$4 sm:$0xff]   ;;  %9130 = vmatpush3.bf16.msra.mxu1 %v10141_v36  ;;  %v10195_v17 = vld [vmem:[%s13434_s4 + $0x1a8] sm:$0xff]  }
 0x29b   : > { %4536 = vst [vmem:[#allocation3 + $0x88] sm:$0xf] %v4296_v6  ;;  %4539 = vst [vmem:[#allocation3 + $0x8c] sm:$0x1] %v4538_v29  ;;  %v12282_v13 = vrot.slane %v4316_v0, 7  ;;  %v3823_v10 = vadd.f32 %v12287_v63, %v3780_v44  ;;  %v3783_v34 = vmul.f32 %v12259_v26, %v3740_v48  ;;  %v5329_v49 = vshll.u32 %v12162_v15, 16  ;;  %9131 = vmatprep.subr.bf16.mxu1 %v10144_v51 }
 0x29c   : > { %v4279_v11 = vsel %vm11934_vm10, %v4271_v24, %v4278_v3  ;;  %v4531_v38 = vsel %vm11552_vm4, %v4280_v8, %v4530_v35  ;;  %v3670_v59 = vadd.f32 %v12084_v61, %v13533_v57  ;;  %v12306_v41 = vld [vmem:[#allocation3 + $0x3c] sm:$0xff]   ;;  %v5327_v33 = vor.u32 %v5326_v25, %v5322_v21  ;;  %9268 = vmatpush3.bf16.msra.mxu0 %v10190_v12  ;;  %v10156_v21 = vld [vmem:[%s13434_s4 + $0x70] sm:$0xff]  }
 0x29d   : > { %4529 = vst [vmem:[#allocation3 + $0x7c] sm:$0xf] %v4279_v11  ;;  %4532 = vst [vmem:[#allocation3 + $0x80] sm:$0x1] %v4531_v38  ;;  %v4321_v58 = vor.u32 %v4319_v20, %v12282_v13  ;;  %v4322_v39 = vrot.slane %v12282_v13, 4  ;;  %v3859_v24 = vmax.f32 %v3823_v10, 0.0  ;;  %v3826_v50 = vadd.f32 %v12287_v63, %v3783_v34  ;;  %9269 = vmatprep.subr.bf16.mxu0 %v10194_v42 }
 0x29e   : > { %v5331_v15 = vrot.slane %v5329_v49, 1  ;;  %v13534_v60 = vld [vmem:[#allocation13_spill] sm:$0xff]  ;;  %v5514_v61 = vrot.slane %v12265_v45, 1  ;;  %v5515_v54 = vrot.slane %v12274_v7, 1  ;;  %v10196_v28 = vld [vmem:[%s13434_s4 + $0x1f0] sm:$0xff]   ;;  %v5517_v36 = vrot.slane %v12306_v41, 1  ;;  %9132 = vmatpush3.bf16.msra.mxu1 %v10147_v46 }
 0x29f   : > { %v3738_v32 = vadd.f32 %v3670_v59, %v13534_v60  ;;  %v4548_v27 = vsel %vm11927_vm9, %v4321_v58, %v4547_v1  ;;  %v8770_v23 = vpack.c.bf16 %v3859_v24, %v3859_v24  ;;  %v3862_v31 = vmax.f32 %v3826_v50, 0.0  ;;  %9133 = vmatprep.subr.bf16.mxu1 %v10150_v52  ;;  %v4540_v51 = vld [vmem:[#allocation3 + $0x90] sm:$0xf]  ;;  %v13536_v34 = vld [vmem:[#allocation33_spill] sm:$0xff]  ;;  %v10162_v50 = vld [vmem:[%s13434_s4 + $0x78] sm:$0xff]  }
 0x2a0   : > { %4549 = vst [vmem:[#allocation3 + $0x9c] sm:$0xf] %v4548_v27  ;;  %v5332_v55 = vsel %vm719_vm1, %v5327_v33, %v5331_v15  ;;  %v5518_v35 = vrot.slane %v12308_v9, 1  ;;  %v5516_v62 = vsel %vm954_vm0, %v5514_v61, %v5515_v54  ;;  %v3691_v3 = vadd.f32 %v12100_v56, %v11868_v5  ;;  %v13535_v8 = vld [vmem:[#allocation27_spill] sm:$0xff]  ;;  %v13538_v11 = vld [vmem:[#allocation17_spill] sm:$0xff]  ;;  %9270 = vmatpush3.bf16.msra.mxu0 %v10195_v17  ;;  %v10202_v33 = vld [vmem:[%s13434_s4 + $0x1f8] sm:$0xff]  }
 0x2a1   : > { %v3781_v0 = vmul.f32 %v12259_v26, %v3738_v32  ;;  %v4299_v20 = vshrl.u32 %v8770_v23, 16  ;;  %v4302_v44 = vshll.u32 %v8770_v23, 16  ;;  %v8773_v48 = vpack.c.bf16 %v3862_v31, %v3862_v31  ;;  %5810 = vmatprep.mubr.bf16.mxu0 %v5332_v55  ;;  %9572 = vmatmul.mubr.bf16.gmra.mrb[160].mxu1 %v5516_v62  ;;  %v10159_v52 = vld [vmem:[%s13434_s4 + $0x30] sm:$0xff]   ;;  %v4551_v59 = vld [vmem:[#allocation3 + $0xa4] sm:$0x1]  ;;  %v12370_v54 = vld [vmem:[#allocation3 + $0x48] sm:$0xff]  }
 0x2a2   : > { %v5519_v29 = vsel %vm954_vm0, %v5517_v36, %v5518_v35  ;;  %v3683_v1 = vadd.f32 %v12104_v40, %v13535_v8  ;;  %5811 = vmatmul.mubr.bf16.gmra.mrb[176].mxu0 %v12160_v47  ;;  %v3694_v25 = vadd.f32 %v12106_v30, %v13536_v34  ;;  %v10197_v5 = vld [vmem:[%s13434_s4 + $0x1b0] sm:$0xff]   ;;  %v13537_v40 = vld [vmem:[#allocation16_spill] sm:$0xff]  ;;  %v5334_v49 = vshrl.u32 %v12265_v45, 16  ;;  %9134 = vmatpush3.bf16.msra.mxu1 %v10153_v2  ;;  %v13539_v58 = vld [vmem:[#allocation21_spill] sm:$0xff] }
 0x2a3   : > { %v3824_v6 = vadd.f32 %v12287_v63, %v3781_v0  ;;  %v12341_v46 = vrot.slane %v4299_v20, 7  ;;  %v4324_v12 = vshrl.u32 %v8773_v48, 16  ;;  %v4327_v10 = vshll.u32 %v8773_v48, 16  ;;  %9575 = vmatprep.mubr.bf16.mxu1 %v5519_v29  ;;  %9135 = vmatprep.subr.bf16.mxu1 %v10156_v21  ;;  %v12372_v21 = vld [vmem:[#allocation3 + $0x50] ss:$0 sps:$4 sm:$0xff]   ;;  %v10163_v36 = vld [vmem:[%s13434_s4 + $0x38] sm:$0xff]  }
 0x2a4   : > { %v3743_v42 = vadd.f32 %v3691_v3, %v13537_v40  ;;  %v3741_v38 = vadd.f32 %v3683_v1, %v13538_v11  ;;  %v3744_v24 = vadd.f32 %v3694_v25, %v13539_v58  ;;  %9271 = vmatprep.subr.bf16.mxu0 %v10196_v28  ;;  %v5336_v61 = vshll.u32 %v12265_v45, 16  ;;  %v10203_v35 = vld [vmem:[%s13434_s4 + $0x1b8] sm:$0xff]   ;;  %v4561_v58 = vld [vmem:[#allocation3 + $0xb4] sm:$0xf] }
 0x2a5   : > { %v3860_v56 = vmax.f32 %v3824_v6, 0.0  ;;  %v4304_v47 = vor.u32 %v4302_v44, %v12341_v46  ;;  %v4305_v30 = vrot.slane %v12341_v46, 4  ;;  %v4326_v57 = vrot.slane %v4324_v12, 7  ;;  %9272 = vmatpush3.bf16.msra.mxu0 %v10197_v5  ;;  %v4544_v13 = vld [vmem:[#allocation3 + $0x98] sm:$0x1] }
 0x2a6   : > { %v3786_v60 = vmul.f32 %v12259_v26, %v3743_v42  ;;  %v3784_v32 = vmul.f32 %v12259_v26, %v3741_v38  ;;  %v3787_v31 = vmul.f32 %v12259_v26, %v3744_v24  ;;  %9136 = vmatpush3.bf16.msra.mxu1 %v10159_v52  ;;  %v5338_v62 = vrot.slane %v5336_v61, 1  ;;  %9273 = vmatprep.subr.bf16.mxu0 %v10202_v33  ;;  %v13540_v46 = vld [vmem:[#allocation28_spill] sm:$0xff] }
 0x2a7   : > { %v8771_v15 = vpack.c.bf16 %v3860_v56, %v3860_v56  ;;  %v4541_v2 = vsel %vm11927_vm9, %v4304_v47, %v4540_v51  ;;  %v4329_v27 = vor.u32 %v4327_v10, %v4326_v57  ;;  %v4331_v23 = vrot.slane %v4326_v57, 4  ;;  %9137 = vmatprep.subr.bf16.mxu1 %v10162_v50  ;;  %v12392_v51 = vld [vmem:[%s13434_s4 + $0x80] sm:$0xff]   ;;  %v12398_v56 = vld [vmem:[#allocation3 + $0x54] sm:$0xff]   ;;  %v12400_v40 = vld [vmem:[#allocation3 + $0x5c] ss:$0 sps:$4 sm:$0xff]  }
 0x2a8   : > { %4542 = vst [vmem:[#allocation3 + $0x90] sm:$0xf] %v4541_v2  ;;  %v3829_v55 = vadd.f32 %v12287_v63, %v3786_v60  ;;  %v3827_v0 = vadd.f32 %v12287_v63, %v3784_v32  ;;  %v3830_v48 = vadd.f32 %v12287_v63, %v3787_v31  ;;  %v5339_v1 = vor.u32 %v5338_v62, %v5334_v49  ;;  %v4554_v32 = vld [vmem:[#allocation3 + $0xa8] sm:$0xf] }
 0x2a9   : > { %v4307_v17 = vshrl.u32 %v8771_v15, 16  ;;  %v4310_v28 = vshll.u32 %v8771_v15, 16  ;;  %v4330_v20 = vsel %vm11934_vm10, %v4322_v39, %v4329_v27  ;;  %v4552_v44 = vsel %vm11552_vm4, %v4331_v23, %v4551_v59  ;;  %9274 = vmatpush3.bf16.msra.mxu0 %v10203_v35  ;;  %v13542_v35 = vld [vmem:[#allocation36_spill] sm:$0xff] }
 0x2aa   : > { %4550 = vst [vmem:[#allocation3 + $0xa0] sm:$0xf] %v4330_v20  ;;  %4553 = vst [vmem:[#allocation3 + $0xa4] sm:$0x1] %v4552_v44  ;;  %v3865_v29 = vmax.f32 %v3829_v55, 0.0  ;;  %v3863_v3 = vmax.f32 %v3827_v0, 0.0  ;;  %v3686_v12 = vadd.f32 %v12108_v14, %v13540_v46  ;;  %9138 = vmatpush3.bf16.msra.mxu1 %v10163_v36  ;;  %v3707_v20 = vadd.f32 %v12126_v18, %v13542_v35 }
 0x2ab   : > { %v4309_v6 = vrot.slane %v4307_v17, 7  ;;  %v5341_v39 = vshll.u32 %v12274_v7, 16  ;;  %v3866_v8 = vmax.f32 %v3830_v48, 0.0  ;;  %v5520_v10 = vrot.slane %v12370_v54, 1  ;;  %v13541_v7 = vld [vmem:[#allocation22_spill] sm:$0xff]  ;;  %9599 = vmatprep.subr.bf16.mxu1 %v12392_v51 }
 0x2ac   : > { %v8776_v52 = vpack.c.bf16 %v3865_v29, %v3865_v29  ;;  %v8774_v5 = vpack.c.bf16 %v3863_v3, %v3863_v3  ;;  %v3742_v38 = vadd.f32 %v3686_v12, %v13541_v7  ;;  %v5521_v49 = vrot.slane %v12372_v21, 1  ;;  %v4565_v0 = vld [vmem:[#allocation3 + $0xbc] sm:$0x1]  ;;  %v13544_v46 = vld [vmem:[#allocation34_spill] sm:$0xff] }
 0x2ad   : > { %v4312_v34 = vor.u32 %v4310_v28, %v4309_v6  ;;  %v4314_v25 = vrot.slane %v4309_v6, 4  ;;  %v8777_v42 = vpack.c.bf16 %v3866_v8, %v3866_v8  ;;  %v5343_v11 = vrot.slane %v5341_v39, 1  ;;  %v13543_v39 = vld [vmem:[#allocation29_spill] sm:$0xff] }
 0x2ae   : > { %v4350_v57 = vshrl.u32 %v8776_v52, 16  ;;  %v4353_v59 = vshll.u32 %v8776_v52, 16  ;;  %v4333_v24 = vshrl.u32 %v8774_v5, 16  ;;  %v4336_v50 = vshll.u32 %v8774_v5, 16  ;;  %v13545_v52 = vld [vmem:[#allocation37_spill] sm:$0xff] }
 0x2af   : > { %v4313_v14 = vsel %vm11934_vm10, %v4305_v30, %v4312_v34  ;;  %v4545_v47 = vsel %vm11552_vm4, %v4314_v25, %v4544_v13  ;;  %v4358_v33 = vshrl.u32 %v8777_v42, 16  ;;  %v4361_v15 = vshll.u32 %v8777_v42, 16 }
 0x2b0   : > { %4543 = vst [vmem:[#allocation3 + $0x94] sm:$0xf] %v4313_v14  ;;  %4546 = vst [vmem:[#allocation3 + $0x98] sm:$0x1] %v4545_v47  ;;  %v4352_v60 = vrot.slane %v4350_v57, 7  ;;  %v5344_v61 = vsel %vm719_vm1, %v5339_v1, %v5343_v11  ;;  %v3785_v2 = vmul.f32 %v12259_v26, %v3742_v38  ;;  %v5522_v30 = vsel %vm954_vm0, %v5520_v10, %v5521_v49  ;;  %v13546_v11 = vld [vmem:[#allocation30_spill] sm:$0xff] }
 0x2b1   : > { %v12412_v27 = vrot.slane %v4333_v24, 7  ;;  %v4360_v23 = vrot.slane %v4358_v33, 7  ;;  %5818 = vmatprep.mubr.bf16.mxu0 %v5344_v61  ;;  %9576 = vmatmul.mubr.bf16.gmra.mrb[164].mxu1 %v5522_v30  ;;  %v5523_v31 = vrot.slane %v12398_v56, 1  ;;  %v5524_v17 = vrot.slane %v12400_v40, 1  ;;  %v3996_v10 = vld [vmem:[#allocation3 + $0xc8] sm:$0x1] }
 0x2b2   : > { %v4355_v28 = vor.u32 %v4353_v59, %v4352_v60  ;;  %v4356_v55 = vrot.slane %v4352_v60, 4  ;;  %v3828_v36 = vadd.f32 %v12287_v63, %v3785_v2  ;;  %5819 = vmatmul.mubr.bf16.gmra.mrb[180].mxu0 %v12265_v45  ;;  %v3747_v8 = vadd.f32 %v3707_v20, %v13543_v39  ;;  %v13547_v14 = vld [vmem:[#allocation35_spill] sm:$0xff]  ;;  %v12443_v47 = vld [vmem:[#allocation3 + $0x60] sm:$0xff]   ;;  %v12449_v2 = vld [vmem:[#allocation3 + $0x68] ss:$0 sps:$4 sm:$0xff]  }
 0x2b3   : > { %v4338_v44 = vor.u32 %v4336_v50, %v12412_v27  ;;  %v4339_v48 = vrot.slane %v12412_v27, 4  ;;  %v4363_v62 = vor.u32 %v4361_v15, %v4360_v23  ;;  %v4365_v6 = vrot.slane %v4360_v23, 4  ;;  %v13548_v24 = vld [vmem:[#allocation31_spill] sm:$0xff] }
 0x2b4   : > { %v4562_v13 = vsel %vm11927_vm9, %v4355_v28, %v4561_v58  ;;  %v3864_v29 = vmax.f32 %v3828_v36, 0.0  ;;  %v5525_v3 = vsel %vm954_vm0, %v5523_v31, %v5524_v17  ;;  %v3699_v12 = vadd.f32 %v12130_v19, %v13544_v46 }
 0x2b5   : > { %4563 = vst [vmem:[#allocation3 + $0xb4] sm:$0xf] %v4562_v13  ;;  %v4555_v18 = vsel %vm11927_vm9, %v4338_v44, %v4554_v32  ;;  %v4364_v45 = vsel %vm11934_vm10, %v4356_v55, %v4363_v62  ;;  %v4566_v1 = vsel %vm11552_vm4, %v4365_v6, %v4565_v0  ;;  %9579 = vmatprep.mubr.bf16.mxu1 %v5525_v3  ;;  %v5346_v42 = vshrl.u32 %v12306_v41, 16  ;;  %v13549_v32 = vld [vmem:[#allocation32_spill] sm:$0xff]  ;;  %v12458_v44 = vld [vmem:[#allocation3 + $0x6c] sm:$0xff]  }
 0x2b6   : > { %4556 = vst [vmem:[#allocation3 + $0xa8] sm:$0xf] %v4555_v18  ;;  %4564 = vst [vmem:[#allocation3 + $0xb8] sm:$0xf] %v4364_v45  ;;  %v8775_v34 = vpack.c.bf16 %v3864_v29, %v3864_v29  ;;  %v3790_v25 = vmul.f32 %v12259_v26, %v3747_v8  ;;  %v3710_v5 = vadd.f32 %v12142_v16, %v13545_v52  ;;  %v5348_v38 = vshll.u32 %v12306_v41, 16 }
 0x2b7   : > { %4567 = vst [vmem:[#allocation3 + $0xbc] sm:$0x1] %v4566_v1  ;;  %v3745_v7 = vadd.f32 %v3699_v12, %v13546_v11  ;;  %v5353_v49 = vshll.u32 %v12308_v9, 16  ;;  %v3702_v19 = vadd.f32 %v12144_v37, %v13547_v14  ;;  %v4558_v16 = vld [vmem:[#allocation3 + $0xb0] sm:$0x1]  ;;  %v3997_v23 = vsel %vm11565_vm6, 0, %v3996_v10 }
 0x2b8   : > { %v4341_v57 = vshrl.u32 %v8775_v34, 16  ;;  %v4344_v59 = vshll.u32 %v8775_v34, 16  ;;  %v3833_v58 = vadd.f32 %v12287_v63, %v3790_v25  ;;  %v3748_v50 = vadd.f32 %v3710_v5, %v13548_v24  ;;  %3998 = vst [vmem:[#allocation3 + $0xc8] sm:$0x1] %v3997_v23  ;;  %v12460_v62 = vld [vmem:[#allocation3 + $0x74] ss:$0 sps:$4 sm:$0xff]  }
 0x2b9   : > { %v3788_v33 = vmul.f32 %v12259_v26, %v3745_v7  ;;  %v5350_v15 = vrot.slane %v5348_v38, 1  ;;  %v5355_v60 = vrot.slane %v5353_v49, 1  ;;  %v3746_v61 = vadd.f32 %v3702_v19, %v13549_v32  ;;  %v4575_v45 = vld [vmem:[#allocation3 + $0xcc] sm:$0xf]  ;;  %v4568_v49 = vld [vmem:[#allocation3 + $0xc0] sm:$0xf] }
 0x2ba   : > { %v4343_v9 = vrot.slane %v4341_v57, 7  ;;  %v3869_v30 = vmax.f32 %v3833_v58, 0.0  ;;  %v3791_v37 = vmul.f32 %v12259_v26, %v3748_v50  ;;  %v5526_v55 = vrot.slane %v12443_v47, 1  ;;  %v12478_v57 = vld [vmem:[#allocation3 + $0x80] ss:$0 sps:$4 sm:$0xff]  }
 0x2bb   : > { %v3831_v31 = vadd.f32 %v12287_v63, %v3788_v33  ;;  %v5351_v17 = vor.u32 %v5350_v15, %v5346_v42  ;;  %v3789_v28 = vmul.f32 %v12259_v26, %v3746_v61  ;;  %v5527_v3 = vrot.slane %v12449_v2, 1  ;;  %v4579_v15 = vld [vmem:[#allocation3 + $0xd4] sm:$0x1] }
 0x2bc   : > { %v4346_v0 = vor.u32 %v4344_v59, %v4343_v9  ;;  %v4348_v36 = vrot.slane %v4343_v9, 4  ;;  %v8780_v35 = vpack.c.bf16 %v3869_v30, %v3869_v30  ;;  %v3834_v20 = vadd.f32 %v12287_v63, %v3791_v37  ;;  %v12485_v9 = vld [vmem:[#allocation3 + $0x84] sm:$0xff]  }
 0x2bd   : > { %v3867_v6 = vmax.f32 %v3831_v31, 0.0  ;;  %v5356_v13 = vsel %vm719_vm1, %v5351_v17, %v5355_v60  ;;  %v3832_v29 = vadd.f32 %v12287_v63, %v3789_v28  ;;  %v5528_v10 = vsel %vm954_vm0, %v5526_v55, %v5527_v3  ;;  %v12487_v31 = vld [vmem:[#allocation3 + $0x98] ss:$0 sps:$4 sm:$0xff]  }
 0x2be   : > { %v4347_v26 = vsel %vm11934_vm10, %v4339_v48, %v4346_v0  ;;  %v4559_v39 = vsel %vm11552_vm4, %v4348_v36, %v4558_v16  ;;  %v4384_v8 = vshrl.u32 %v8780_v35, 16  ;;  %v4387_v18 = vshll.u32 %v8780_v35, 16  ;;  %5826 = vmatprep.mubr.bf16.mxu0 %v5356_v13  ;;  %9580 = vmatmul.mubr.bf16.gmra.mrb[168].mxu1 %v5528_v10  ;;  %v12480_v16 = vld [vmem:[#allocation3 + $0x8c] ss:$0 sps:$4 sm:$0xff]   ;;  %v12494_v13 = vld [vmem:[#allocation3 + $0x90] sm:$0xff]  }
 0x2bf   : > { %4557 = vst [vmem:[#allocation3 + $0xac] sm:$0xf] %v4347_v26  ;;  %4560 = vst [vmem:[#allocation3 + $0xb0] sm:$0x1] %v4559_v39  ;;  %v8778_v1 = vpack.c.bf16 %v3867_v6, %v3867_v6  ;;  %v3870_v46 = vmax.f32 %v3834_v20, 0.0  ;;  %v3868_v12 = vmax.f32 %v3832_v29, 0.0  ;;  %5827 = vmatmul.mubr.bf16.gmra.mrb[184].mxu0 %v12306_v41 }
 0x2c0   : > { %v4386_v63 = vrot.slane %v4384_v8, 7  ;;  %v5529_v48 = vrot.slane %v12458_v44, 1  ;;  %v5530_v34 = vrot.slane %v12460_v62, 1  ;;  %v5358_v25 = vshrl.u32 %v12370_v54, 16  ;;  %v12476_v41 = vld [vmem:[#allocation3 + $0x78] sm:$0xff]  }
 0x2c1   : > { %v4367_v52 = vshrl.u32 %v8778_v1, 16  ;;  %v4370_v5 = vshll.u32 %v8778_v1, 16  ;;  %v8781_v42 = vpack.c.bf16 %v3870_v46, %v3870_v46  ;;  %v8779_v11 = vpack.c.bf16 %v3868_v12, %v3868_v12  ;;  %v4572_v6 = vld [vmem:[#allocation3 + $0xc8] sm:$0x1]  ;;  %v12506_v1 = vld [vmem:[#allocation3 + $0x9c] sm:$0xff]  }
 0x2c2   : > { %v4389_v7 = vor.u32 %v4387_v18, %v4386_v63  ;;  %v4390_v38 = vrot.slane %v4386_v63, 4  ;;  %v5531_v14 = vsel %vm954_vm0, %v5529_v48, %v5530_v34  ;;  %v5360_v19 = vshll.u32 %v12370_v54, 16  ;;  %v12508_v46 = vld [vmem:[#allocation3 + $0xa4] ss:$0 sps:$4 sm:$0xff]  }
 0x2c3   : > { %v4369_v59 = vrot.slane %v4367_v52, 7  ;;  %v4392_v58 = vshrl.u32 %v8781_v42, 16  ;;  %v4395_v24 = vshll.u32 %v8781_v42, 16  ;;  %v4375_v50 = vshrl.u32 %v8779_v11, 16  ;;  %9583 = vmatprep.mubr.bf16.mxu1 %v5531_v14 }
 0x2c4   : > { %v4576_v33 = vsel %vm11927_vm9, %v4389_v7, %v4575_v45  ;;  %v4378_v60 = vshll.u32 %v8779_v11, 16  ;;  %v5362_v32 = vrot.slane %v5360_v19, 1  ;;  %v5365_v61 = vshll.u32 %v12372_v21, 16 }
 0x2c5   : > { %4577 = vst [vmem:[#allocation3 + $0xcc] sm:$0xf] %v4576_v33  ;;  %v4372_v30 = vor.u32 %v4370_v5, %v4369_v59  ;;  %v4373_v37 = vrot.slane %v4369_v59, 4  ;;  %v4394_v27 = vrot.slane %v4392_v58, 7  ;;  %v4377_v23 = vrot.slane %v4375_v50, 7  ;;  %v12533_v58 = vld [vmem:[#allocation3] sm:$0xff]  }
 0x2c6   : > { %4589 = vst [vmem:[#allocation3 + $0xcc] sm:$0xf] %v13520_v43  ;;  %v5363_v17 = vor.u32 %v5362_v32, %v5358_v25  ;;  %v5367_v28 = vrot.slane %v5365_v61, 1  ;;  %v5532_v55 = vrot.slane %v12476_v41, 1  ;;  %v5533_v0 = vrot.slane %v12478_v57, 1  ;;  %v12536_v33 = vld [vmem:[#allocation3 + $0xb4] sm:$0xff]  }
 0x2c7   : > { %v4569_v21 = vsel %vm11927_vm9, %v4372_v30, %v4568_v49  ;;  %v4397_v36 = vor.u32 %v4395_v24, %v4394_v27  ;;  %v4399_v35 = vrot.slane %v4394_v27, 4  ;;  %v4380_v20 = vor.u32 %v4378_v60, %v4377_v23 }
 0x2c8   : > { %4570 = vst [vmem:[#allocation3 + $0xc0] sm:$0xf] %v4569_v21  ;;  %v4382_v29 = vrot.slane %v4377_v23, 4  ;;  %v5368_v3 = vsel %vm719_vm1, %v5363_v17, %v5367_v28  ;;  %v5534_v26 = vsel %vm954_vm0, %v5532_v55, %v5533_v0  ;;  %v5535_v39 = vrot.slane %v12485_v9, 1 }
 0x2c9   : > { %v4398_v8 = vsel %vm11934_vm10, %v4390_v38, %v4397_v36  ;;  %v4580_v53 = vsel %vm11552_vm4, %v4399_v35, %v4579_v15  ;;  %v4381_v18 = vsel %vm11934_vm10, %v4373_v37, %v4380_v20  ;;  %5834 = vmatprep.mubr.bf16.mxu0 %v5368_v3  ;;  %9584 = vmatmul.mubr.bf16.gmra.mrb[172].mxu1 %v5534_v26  ;;  %v5536_v45 = vrot.slane %v12480_v16, 1  ;;  %v12528_v38 = vld [vmem:[#allocation3 + $0xa8] sm:$0xff]   ;;  %v12538_v15 = vld [vmem:[#allocation3 + $0xbc] ss:$0 sps:$4 sm:$0xff]  }
 0x2ca   : > { %4578 = vst [vmem:[#allocation3 + $0xd0] sm:$0xf] %v4398_v8  ;;  %4581 = vst [vmem:[#allocation3 + $0xd4] sm:$0x1] %v4580_v53  ;;  %v4573_v12 = vsel %vm11552_vm4, %v4382_v29, %v4572_v6  ;;  %5835 = vmatmul.mubr.bf16.gmra.mrb[188].mxu0 %v12370_v54  ;;  %v5372_v10 = vshll.u32 %v12398_v56, 16  ;;  %v5377_v22 = vshll.u32 %v12400_v40, 16 }
 0x2cb   : > { %4571 = vst [vmem:[#allocation3 + $0xc4] sm:$0xf] %v4381_v18  ;;  %4590 = vst [vmem:[#allocation3 + $0xd0] sm:$0xf] %v13520_v43  ;;  %v5537_v63 = vsel %vm954_vm0, %v5535_v39, %v5536_v45  ;;  %v5538_v48 = vrot.slane %v12494_v13, 1  ;;  %v5539_v34 = vrot.slane %v12487_v31, 1 }
 0x2cc   : > { %4591 = vst [vmem:[#allocation3 + $0xd4] sm:$0xf] %v13520_v43  ;;  %4574 = vst [vmem:[#allocation3 + $0xc8] sm:$0x1] %v4573_v12  ;;  %9587 = vmatprep.mubr.bf16.mxu1 %v5537_v63  ;;  %v5370_v4 = vshrl.u32 %v12398_v56, 16  ;;  %v5374_v25 = vrot.slane %v5372_v10, 1 }
 0x2cd   : > { %v5541_v54 = vrot.slane %v12506_v1, 1  ;;  %v5542_v52 = vrot.slane %v12508_v46, 1  ;;  %v5384_v40 = vshll.u32 %v12443_v47, 16  ;;  %v5389_v5 = vshll.u32 %v12449_v2, 16  ;;  %v12525_v43 = vld [vmem:[#allocation3 + $0xb0] ss:$0 sps:$4 sm:$0xff]  }
 0x2ce   : > { %v5375_v42 = vor.u32 %v5374_v25, %v5370_v4  ;;  %v5379_v11 = vrot.slane %v5377_v22, 1  ;;  %v5540_v7 = vsel %vm954_vm0, %v5538_v48, %v5539_v34  ;;  %v5382_v49 = vshrl.u32 %v12443_v47, 16  ;;  %v12544_v37 = vld [vmem:[#allocation3 + $0x8] ss:$0 sps:$4 sm:$0xff]   ;;  %v12560_v26 = vld [vmem:[#allocation3 + $0xc] sm:$0xff]  }
 0x2cf   : > { %v5386_v14 = vrot.slane %v5384_v40, 1  ;;  %v5396_v59 = vshll.u32 %v12458_v44, 16  ;;  %v5543_v2 = vsel %vm954_vm0, %v5541_v54, %v5542_v52  ;;  %v5391_v50 = vrot.slane %v5389_v5, 1  ;;  %v12571_v4 = vld [vmem:[#allocation3 + $0x14] ss:$0 sps:$4 sm:$0xff]   ;;  %v12574_v40 = vld [vmem:[#allocation3 + $0x18] sm:$0xff]  }
 0x2d0   : > { %v5380_v19 = vsel %vm719_vm1, %v5375_v42, %v5379_v11  ;;  %v5544_v60 = vrot.slane %v12528_v38, 1  ;;  %v5545_v32 = vrot.slane %v12525_v43, 1  ;;  %v5394_v27 = vshrl.u32 %v12458_v44, 16 }
 0x2d1   : > { %5842 = vmatprep.mubr.bf16.mxu0 %v5380_v19  ;;  %9588 = vmatmul.mubr.bf16.gmra.mrb[176].mxu1 %v5540_v7  ;;  %v5387_v24 = vor.u32 %v5386_v14, %v5382_v49  ;;  %v5398_v61 = vrot.slane %v5396_v59, 1  ;;  %v5401_v23 = vshll.u32 %v12460_v62, 16  ;;  %v4787_v17 = vshll.u32 %v12533_v58, 16 }
 0x2d2   : > { %9591 = vmatprep.mubr.bf16.mxu1 %v5543_v2  ;;  %5843 = vmatmul.mubr.bf16.gmra.mrb[192].mxu0 %v12398_v56  ;;  %v5547_v28 = vrot.slane %v12536_v33, 1  ;;  %v5548_v56 = vrot.slane %v12538_v15, 1  ;;  %v5546_v55 = vsel %vm954_vm0, %v5544_v60, %v5545_v32  ;;  %v12552_v21 = vld [vmem:[#allocation3 + $0xc0] sm:$0xff]   ;;  %v5408_v35 = vshll.u32 %v12476_v41, 16 }
 0x2d3   : > { %v5392_v30 = vsel %vm719_vm1, %v5387_v24, %v5391_v50  ;;  %v5399_v0 = vor.u32 %v5398_v61, %v5394_v27  ;;  %v12554_v36 = vld [vmem:[#allocation3 + $0xc8] ss:$0 sps:$4 sm:$0xff]   ;;  %v4785_v20 = vshrl.u32 %v12533_v58, 16  ;;  %v4789_v6 = vrot.slane %v4787_v17, 1  ;;  %v12583_v24 = vld [vmem:[#allocation3 + $0x20] ss:$0 sps:$4 sm:$0xff]  }
 0x2d4   : > { %5850 = vmatprep.mubr.bf16.mxu0 %v5392_v30  ;;  %v4792_v62 = vshll.u32 %v12544_v37, 16  ;;  %v5403_v29 = vrot.slane %v5401_v23, 1  ;;  %v5549_v3 = vsel %vm954_vm0, %v5547_v28, %v5548_v56  ;;  %v5550_v8 = vrot.slane %v12552_v21, 1  ;;  %v10175_v50 = vld [vmem:[%s13434_s4 + $0x88] sm:$0xff]   ;;  %v10182_v28 = vld [vmem:[%s13434_s4 + $0x90] sm:$0xff]  }
 0x2d5   : > { %v5551_v53 = vrot.slane %v12554_v36, 1  ;;  %v5410_v18 = vrot.slane %v5408_v35, 1  ;;  %v4790_v45 = vor.u32 %v4789_v6, %v4785_v20  ;;  %v5406_v10 = vshrl.u32 %v12476_v41, 16  ;;  %v12591_v30 = vld [vmem:[#allocation3 + $0x24] sm:$0xff]   ;;  %v12604_v20 = vld [vmem:[#allocation3 + $0x2c] ss:$0 sps:$4 sm:$0xff]  }
 0x2d6   : > { %v5404_v39 = vsel %vm719_vm1, %v5399_v0, %v5403_v29  ;;  %v4794_v12 = vrot.slane %v4792_v62, 1  ;;  %v5413_v22 = vshll.u32 %v12478_v57, 16  ;;  %v4799_v63 = vshll.u32 %v12560_v26, 16  ;;  %v10191_v62 = vld [vmem:[%s13434_s4 + $0x98] sm:$0xff]  }
 0x2d7   : > { %v5552_v48 = vsel %vm954_vm0, %v5550_v8, %v5551_v53  ;;  %v5411_v34 = vor.u32 %v5410_v18, %v5406_v10  ;;  %v5420_v25 = vshll.u32 %v12485_v9, 16  ;;  %v4797_v5 = vshrl.u32 %v12560_v26, 16 }
 0x2d8   : > { %v5415_v54 = vrot.slane %v5413_v22, 1  ;;  %v4801_v52 = vrot.slane %v4799_v63, 1  ;;  %v4804_v42 = vshll.u32 %v12571_v4, 16  ;;  %v5418_v49 = vshrl.u32 %v12485_v9, 16 }
 0x2d9   : > { %9592 = vmatmul.mubr.bf16.gmra.mrb[180].mxu1 %v5546_v55  ;;  %v5422_v11 = vrot.slane %v5420_v25, 1  ;;  %v5425_v14 = vshll.u32 %v12480_v16, 16  ;;  %v4811_v19 = vshll.u32 %v12574_v40, 16  ;;  %v4809_v27 = vshrl.u32 %v12574_v40, 16 }
 0x2da   : > { %9595 = vmatprep.mubr.bf16.mxu1 %v5549_v3  ;;  %5851 = vmatmul.mubr.bf16.gmra.mrb[196].mxu0 %v12443_v47  ;;  %v4795_v47 = vsel %vm719_vm1, %v4790_v45, %v4794_v12  ;;  %v5416_v57 = vsel %vm719_vm1, %v5411_v34, %v5415_v54  ;;  %v4802_v7 = vor.u32 %v4801_v52, %v4797_v5  ;;  %v4806_v59 = vrot.slane %v4804_v42, 1  ;;  %v10206_v12 = vld [vmem:[%s13434_s4 + $0xa0] sm:$0xff]   ;;  %v10215_v54 = vld [vmem:[%s13434_s4 + $0xa8] sm:$0xff]  }
 0x2db   : > { %5858 = vmatprep.mubr.bf16.mxu0 %v5404_v39  ;;  %v5423_v2 = vor.u32 %v5422_v11, %v5418_v49  ;;  %v5427_v32 = vrot.slane %v5425_v14, 1  ;;  %v4813_v61 = vrot.slane %v4811_v19, 1  ;;  %v4816_v23 = vshll.u32 %v12583_v24, 16  ;;  %v12612_v39 = vld [vmem:[#allocation3 + $0x30] sm:$0xff]   ;;  %v12632_v5 = vld [vmem:[#allocation3 + $0x3c] sm:$0xff]  }
 0x2dc   : > { %v4807_v60 = vsel %vm719_vm1, %v4802_v7, %v4806_v59  ;;  %v5430_v55 = vshrl.u32 %v12494_v13, 16  ;;  %v5444_v6 = vshll.u32 %v12506_v1, 16  ;;  %v4821_v53 = vshrl.u32 %v12591_v30, 16  ;;  %v10224_v14 = vld [vmem:[%s13434_s4 + $0xb0] sm:$0xff]  }
 0x2dd   : > { %v5428_v16 = vsel %vm719_vm1, %v5423_v2, %v5427_v32  ;;  %v4814_v56 = vor.u32 %v4813_v61, %v4809_v27  ;;  %v4818_v0 = vrot.slane %v4816_v23, 1  ;;  %v4828_v18 = vshll.u32 %v12604_v20, 16  ;;  %v10233_v61 = vld [vmem:[%s13434_s4 + $0xb8] sm:$0xff]  }
 0x2de   : > { %v5446_v45 = vrot.slane %v5444_v6, 1  ;;  %v5442_v22 = vshrl.u32 %v12506_v1, 16  ;;  %v5449_v63 = vshll.u32 %v12508_v46, 16  ;;  %v5456_v25 = vshll.u32 %v12528_v38, 16  ;;  %v12666_v6 = vld [vmem:[#allocation3 + $0x50] ss:$0 sps:$4 sm:$0xff]  }
 0x2df   : > { %v4819_v29 = vsel %vm719_vm1, %v4814_v56, %v4818_v0  ;;  %v4833_v11 = vshrl.u32 %v12612_v39, 16  ;;  %v5454_v59 = vshrl.u32 %v12528_v38, 16  ;;  %v5461_v2 = vshll.u32 %v12525_v43, 16 }
 0x2e0   : > { %v5447_v34 = vor.u32 %v5446_v45, %v5442_v22  ;;  %v5458_v49 = vrot.slane %v5456_v25, 1  ;;  %v5468_v32 = vshll.u32 %v12536_v33, 16  ;;  %v4864_v45 = vshll.u32 %v12666_v6, 16 }
 0x2e1   : > { %9596 = vmatmul.mubr.bf16.gmra.mrb[184].mxu1 %v5552_v48  ;;  %v4830_v48 = vrot.slane %v4828_v18, 1  ;;  %v5463_v27 = vrot.slane %v5461_v2, 1  ;;  %v12672_v18 = vld [vmem:[#allocation3 + $0x54] sm:$0xff]   ;;  %v5478_v25 = vshrl.u32 %v12552_v21, 16  ;;  %v12702_v2 = vld [vmem:[#allocation3 + $0x60] sm:$0xff]  }
 0x2e2   : > { %5859 = vmatmul.mubr.bf16.gmra.mrb[200].mxu0 %v12458_v44  ;;  %6260 = vmatprep.mubr.bf16.mxu1 %v4795_v47  ;;  %v5432_v44 = vshll.u32 %v12494_v13, 16  ;;  %v12624_v47 = vld [vmem:[#allocation3 + $0x38] ss:$0 sps:$4 sm:$0xff]  }
 0x2e3   : > { %5866 = vmatprep.mubr.bf16.mxu0 %v5416_v57  ;;  %v5451_v57 = vrot.slane %v5449_v63, 1  ;;  %v4840_v7 = vshll.u32 %v12624_v47, 16 }
 0x2e4   : > { %v5434_v17 = vrot.slane %v5432_v44, 1 }
 0x2e5   : > { %v5452_v42 = vsel %vm719_vm1, %v5447_v34, %v5451_v57  ;;  %v4842_v44 = vrot.slane %v4840_v7, 1  ;;  %v4993_v34 = vrot.slane %v12544_v37, 1  ;;  %v4996_v57 = vrot.slane %v12571_v4, 1 }
 0x2e6   : > { %v5435_v35 = vor.u32 %v5434_v17, %v5430_v55  ;;  %v5470_v55 = vrot.slane %v5468_v32, 1  ;;  %v4999_v7 = vrot.slane %v12583_v24, 1  ;;  %v5001_v4 = vrot.slane %v12591_v30, 1 }
 0x2e7   : > { %v5005_v24 = vrot.slane %v12624_v47, 1  ;;  %v4869_v32 = vshrl.u32 %v12672_v18, 16 }
 0x2e9   : > { %6261 = vmatmul.mubr.bf16.vlgmr.msra.gmra.mrb[188].mxu1 %v12533_v58 }
 0x2ea   : > { %6268 = vmatprep.mubr.bf16.mxu1 %v4807_v60  ;;  %9600 = vmatpush3.bf16.msra.mxu1 %v12392_v51  ;;  %v5437_v51 = vshll.u32 %v12487_v31, 16  ;;  %v12644_v60 = vld [vmem:[#allocation3 + $0x44] ss:$0 sps:$4 sm:$0xff]  }
 0x2eb   : > { %5867 = vmatmul.mubr.bf16.gmra.mrb[204].mxu0 %v12476_v41  ;;  %9601 = vmatprep.subr.bf16.mxu1 %v10175_v50  ;;  %v4823_v41 = vshll.u32 %v12591_v30, 16  ;;  %v4852_v56 = vshll.u32 %v12644_v60, 16 }
 0x2ec   : > { %5874 = vmatprep.mubr.bf16.mxu0 %v5428_v16  ;;  %v5439_v3 = vrot.slane %v5437_v51, 1  ;;  %v12650_v16 = vld [vmem:[#allocation3 + $0x48] sm:$0xff]   ;;  %v12661_v51 = vld [vmem:[%s13434_s4 + $0x200] sm:$0xff]  }
 0x2ed   : > { %v4825_v31 = vrot.slane %v4823_v41, 1  ;;  %v4859_v41 = vshll.u32 %v12650_v16, 16 }
 0x2ee   : > { %9602 = vmatpush3.bf16.msra.mxu1 %v10175_v50  ;;  %v5440_v8 = vsel %vm719_vm1, %v5435_v35, %v5439_v3  ;;  %v5459_v50 = vor.u32 %v5458_v49, %v5454_v59  ;;  %v5466_v35 = vshrl.u32 %v12536_v33, 16  ;;  %v5480_v3 = vshll.u32 %v12552_v21, 16  ;;  %v12700_v59 = vld [vmem:[#allocation3 + $0x20] ss:$0 sps:$4 sm:$0xff]  }
 0x2ef   : > { %9603 = vmatprep.subr.bf16.mxu1 %v10182_v28  ;;  %v4826_v10 = vor.u32 %v4825_v31, %v4821_v53  ;;  %v4861_v31 = vrot.slane %v4859_v41, 1 }
 0x2f0   : > { %v5464_v17 = vsel %vm719_vm1, %v5459_v50, %v5463_v27  ;;  %v5482_v22 = vrot.slane %v5480_v3, 1  ;;  %v10201_v27 = vld [vmem:[#allocation3 + $0x68] ss:$0 sps:$4 sm:$0xff]   ;;  %v5016_v3 = vrot.slane %v12702_v2, 1 }
 0x2f1   : > { %6269 = vmatmul.mubr.bf16.gmra.mrb[192].mxu1 %v12560_v26  ;;  %v4831_v52 = vsel %vm719_vm1, %v4826_v10, %v4830_v48  ;;  %v4992_v48 = vrot.slane %v12533_v58, 1 }
 0x2f2   : > { %6276 = vmatprep.mubr.bf16.mxu1 %v4819_v29  ;;  %9604 = vmatpush3.bf16.msra.mxu1 %v10182_v28  ;;  %v4845_v28 = vshrl.u32 %v12632_v5, 16  ;;  %v5471_v29 = vor.u32 %v5470_v55, %v5466_v35  ;;  %v5483_v58 = vor.u32 %v5482_v22, %v5478_v25  ;;  %v4883_v55 = vshll.u32 %v12702_v2, 16  ;;  %v12727_v35 = vld [vmem:[#allocation3 + $0x6c] sm:$0xff]  }
 0x2f3   : > { %5875 = vmatmul.mubr.bf16.gmra.mrb[208].mxu0 %v12485_v9  ;;  %9605 = vmatprep.subr.bf16.mxu1 %v10191_v62  ;;  %v4835_v9 = vshll.u32 %v12612_v39, 16 }
 0x2f4   : > { %5882 = vmatprep.mubr.bf16.mxu0 %v5440_v8 }
 0x2f5   : > { %v4837_v46 = vrot.slane %v4835_v9, 1  ;;  %v5485_v9 = vshll.u32 %v12554_v36, 16  ;;  %v4998_v36 = vrot.slane %v12574_v40, 1 }
 0x2f6   : > { %9606 = vmatpush3.bf16.msra.mxu1 %v10191_v62  ;;  %v4854_v62 = vrot.slane %v4852_v56, 1  ;;  %v6751_v56 = vshll.u32 %v12700_v59, 16 }
 0x2f7   : > { %9607 = vmatprep.subr.bf16.mxu1 %v10206_v12  ;;  %v4838_v19 = vor.u32 %v4837_v46, %v4833_v11  ;;  %v10193_v46 = vld [vmem:[#allocation3 + $0x5c] ss:$0 sps:$4 sm:$0xff]   ;;  %v12689_v11 = vsel %vm954_vm0, %v4992_v48, %v4993_v34  ;;  %v4888_v34 = vshll.u32 %v10201_v27, 16 }
 0x2f9   : > { %6277 = vmatmul.mubr.bf16.gmra.mrb[196].mxu1 %v12574_v40  ;;  %v4843_v43 = vsel %vm719_vm1, %v4838_v19, %v4842_v44  ;;  %v12705_v40 = vsel %vm954_vm0, %v4998_v36, %v4999_v7  ;;  %v4876_v44 = vshll.u32 %v10193_v46, 16  ;;  %v4890_v36 = vrot.slane %v4888_v34, 1  ;;  %v10210_v7 = vld [vmem:[#allocation3 + $0x38] ss:$0 sps:$4 sm:$0xff]  }
 0x2fa   : > { %6284 = vmatprep.mubr.bf16.mxu1 %v4831_v52  ;;  %9608 = vmatpush3.bf16.msra.mxu1 %v10206_v12  ;;  %v12676_v12 = vld [vmem:[#allocation3 + $0x18] sm:$0xff]   ;;  %v4995_v52 = vrot.slane %v12560_v26, 1  ;;  %v5487_v26 = vrot.slane %v5485_v9, 1 }
 0x2fb   : > { %5883 = vmatmul.mubr.bf16.gmra.mrb[212].mxu0 %v12494_v13  ;;  %9609 = vmatprep.subr.bf16.mxu1 %v10215_v54  ;;  %v4847_v13 = vshll.u32 %v12632_v5, 16  ;;  %v6744_v47 = vshrl.u32 %v12676_v12, 16  ;;  %v4878_v41 = vrot.slane %v4876_v44, 1 }
 0x2fc   : > { %5890 = vmatprep.mubr.bf16.mxu0 %v5452_v42  ;;  %v6746_v42 = vshll.u32 %v12676_v12, 16  ;;  %v12693_v37 = vsel %vm954_vm0, %v4995_v52, %v4996_v57 }
 0x2fd   : > { %v4849_v23 = vrot.slane %v4847_v13, 1  ;;  %v5004_v13 = vrot.slane %v12612_v39, 1 }
 0x2fe   : > { %9610 = vmatpush3.bf16.msra.mxu1 %v10215_v54  ;;  %v4871_v54 = vshll.u32 %v12672_v18, 16  ;;  %v6748_v50 = vrot.slane %v6746_v42, 1  ;;  %v4895_v42 = vshll.u32 %v12727_v35, 16 }
 0x2ff   : > { %9611 = vmatprep.subr.bf16.mxu1 %v10224_v14  ;;  %v4850_v0 = vor.u32 %v4849_v23, %v4845_v28  ;;  %v5008_v23 = vrot.slane %v12644_v60, 1 }
 0x300   : > { %v4873_v19 = vrot.slane %v4871_v54, 1  ;;  %v12750_v54 = vld [vmem:[#allocation3 + $0x30] sm:$0xff]  }
 0x301   : > { %6285 = vmatmul.mubr.bf16.gmra.mrb[200].mxu1 %v12591_v30  ;;  %v4855_v8 = vsel %vm719_vm1, %v4850_v0, %v4854_v62  ;;  %v6749_v0 = vor.u32 %v6748_v50, %v6744_v47 }
 0x302   : > { %6292 = vmatprep.mubr.bf16.mxu1 %v4843_v43  ;;  %9612 = vmatpush3.bf16.msra.mxu1 %v10224_v14  ;;  %v5002_v14 = vrot.slane %v12604_v20, 1  ;;  %v5488_v20 = vsel %vm719_vm1, %v5483_v58, %v5487_v26  ;;  %v12718_v43 = vsel %vm954_vm0, %v5004_v13, %v5005_v24  ;;  %v4874_v28 = vor.u32 %v4873_v19, %v4869_v32 }
 0x303   : > { %5891 = vmatmul.mubr.bf16.gmra.mrb[216].mxu0 %v12506_v1  ;;  %9613 = vmatprep.subr.bf16.mxu1 %v10233_v61  ;;  %v5473_v1 = vshll.u32 %v12538_v15, 16  ;;  %v4857_v15 = vshrl.u32 %v12650_v16, 16  ;;  %v6770_v58 = vshll.u32 %v12750_v54, 16  ;;  %v4893_v19 = vshrl.u32 %v12727_v35, 16 }
 0x304   : > { %5898 = vmatprep.mubr.bf16.mxu0 %v5464_v17  ;;  %v12710_v30 = vsel %vm954_vm0, %v5001_v4, %v5002_v14  ;;  %v5010_v17 = vrot.slane %v12650_v16, 1  ;;  %v4897_v4 = vrot.slane %v4895_v42, 1  ;;  %v12760_v14 = vld [vmem:[#allocation3 + $0x78] sm:$0xff]   ;;  %v6768_v24 = vshrl.u32 %v12750_v54, 16 }
 0x305   : > { %v5475_v53 = vrot.slane %v5473_v1, 1  ;;  %v4862_v63 = vor.u32 %v4861_v31, %v4857_v15  ;;  %v5017_v31 = vrot.slane %v10201_v27, 1  ;;  %v4885_v15 = vrot.slane %v4883_v55, 1 }
 0x306   : > { %9614 = vmatpush3.bf16.msra.mxu1 %v10233_v61  ;;  %v12715_v61 = vld [vmem:[#allocation3 + $0x24] sm:$0xff]   ;;  %v6772_v50 = vrot.slane %v6770_v58, 1  ;;  %v6952_v32 = vrot.slane %v12700_v59, 1  ;;  %v12779_v59 = vld [vmem:[#allocation3 + $0x80] ss:$0 sps:$4 sm:$0xff]  }
 0x307   : > { %9647 = vmatprep.subr.bf16.mxu1 %v12661_v51  ;;  %v5476_v10 = vsel %vm719_vm1, %v5471_v29, %v5475_v53  ;;  %v6758_v60 = vshll.u32 %v12715_v61, 16  ;;  %v5014_v29 = vrot.slane %v10193_v46, 1  ;;  %v6753_v53 = vrot.slane %v6751_v56, 1 }
 0x308   : > { %v12744_v22 = vsel %vm954_vm0, %v5016_v3, %v5017_v31  ;;  %v6954_v47 = vrot.slane %v12715_v61, 1  ;;  %v6958_v56 = vrot.slane %v10210_v7, 1  ;;  %v12787_v3 = vld [vmem:[#allocation3 + $0x44] ss:$0 sps:$4 sm:$0xff]  }
 0x309   : > { %6293 = vmatmul.mubr.bf16.gmra.mrb[204].mxu1 %v12612_v39  ;;  %v5007_v39 = vrot.slane %v12632_v5, 1  ;;  %v6754_v48 = vsel %vm719_vm1, %v6749_v0, %v6753_v53  ;;  %v6760_v25 = vrot.slane %v6758_v60, 1  ;;  %v12789_v31 = vld [vmem:[#allocation3 + $0x84] sm:$0xff]   ;;  %v4905_v53 = vshrl.u32 %v12760_v14, 16 }
 0x30a   : > { %6300 = vmatprep.mubr.bf16.mxu1 %v4855_v8  ;;  %v4879_v8 = vsel %vm719_vm1, %v4874_v28, %v4878_v41  ;;  %v6773_v41 = vor.u32 %v6772_v50, %v6768_v24 }
 0x30b   : > { %5899 = vmatmul.mubr.bf16.gmra.mrb[220].mxu0 %v12528_v38  ;;  %v4866_v38 = vrot.slane %v4864_v45, 1  ;;  %v12730_v1 = vsel %vm954_vm0, %v5007_v39, %v5008_v23  ;;  %v10205_v45 = vld [vmem:[#allocation3 + $0x2c] ss:$0 sps:$4 sm:$0xff]   ;;  %v6775_v39 = vshll.u32 %v10210_v7, 16  ;;  %v6957_v23 = vrot.slane %v12750_v54, 1 }
 0x30c   : > { %5906 = vmatprep.mubr.bf16.mxu0 %v5476_v10  ;;  %v6763_v46 = vshll.u32 %v10205_v45, 16  ;;  %v6955_v27 = vrot.slane %v10205_v45, 1  ;;  %v4917_v7 = vshrl.u32 %v12789_v31, 16 }
 0x30d   : > { %v4867_v49 = vsel %vm719_vm1, %v4862_v63, %v4866_v38  ;;  %v5019_v63 = vrot.slane %v12727_v35, 1  ;;  %v6756_v38 = vshrl.u32 %v12715_v61, 16 }
 0x30e   : > { %v6765_v26 = vrot.slane %v6763_v46, 1  ;;  %v12777_v55 = vsel %vm954_vm0, %v6954_v47, %v6955_v27  ;;  %v12823_v27 = vld [vmem:[#allocation3 + $0x5c] ss:$0 sps:$4 sm:$0xff]  }
 0x311   : > { %6301 = vmatmul.mubr.bf16.gmra.mrb[208].mxu1 %v12632_v5  ;;  %v10208_v5 = vld [vmem:[#allocation3 + $0x74] ss:$0 sps:$4 sm:$0xff]  }
 0x312   : > { %6308 = vmatprep.mubr.bf16.mxu1 %v4867_v49  ;;  %v5020_v9 = vrot.slane %v10208_v5, 1  ;;  %v4900_v13 = vshll.u32 %v10208_v5, 16  ;;  %v12783_v5 = vsel %vm954_vm0, %v6957_v23, %v6958_v56  ;;  %v12825_v23 = vld [vmem:[#allocation3 + $0x9c] sm:$0xff]  }
 0x313   : > { %5907 = vmatmul.mubr.bf16.gmra.mrb[224].mxu0 %v12536_v33  ;;  %v5011_v33 = vrot.slane %v12666_v6, 1  ;;  %v5013_v6 = vrot.slane %v12672_v18, 1 }
 0x314   : > { %5914 = vmatprep.mubr.bf16.mxu0 %v5488_v20  ;;  %v12753_v52 = vsel %vm954_vm0, %v5019_v63, %v5020_v9  ;;  %v12766_v20 = vld [vmem:[#allocation3 + $0x3c] sm:$0xff]   ;;  %v12795_v63 = vld [vmem:[#allocation3 + $0x48] sm:$0xff]  }
 0x315   : > { %v12733_v62 = vsel %vm954_vm0, %v5010_v17, %v5011_v33  ;;  %v12741_v10 = vsel %vm954_vm0, %v5013_v6, %v5014_v29  ;;  %v4898_v17 = vor.u32 %v4897_v4, %v4893_v19  ;;  %v4907_v33 = vshll.u32 %v12760_v14, 16  ;;  %v12813_v4 = vld [vmem:[#allocation3 + $0x54] sm:$0xff]  }
 0x316   : > { %v6782_v0 = vshll.u32 %v12766_v20, 16  ;;  %v6777_v6 = vrot.slane %v6775_v39, 1  ;;  %v6780_v9 = vshrl.u32 %v12766_v20, 16  ;;  %v6792_v19 = vshrl.u32 %v12795_v63, 16 }
 0x317   : > { %v4909_v29 = vrot.slane %v4907_v33, 1 }
 0x318   : > { %v6784_v45 = vrot.slane %v6782_v0, 1 }
 0x319   : > { %6309 = vmatmul.mubr.bf16.gmra.mrb[212].mxu1 %v12650_v16  ;;  %v4881_v16 = vshrl.u32 %v12702_v2, 16 }
 0x31a   : > { %6316 = vmatprep.mubr.bf16.mxu1 %v4879_v8  ;;  %v6778_v8 = vsel %vm719_vm1, %v6773_v41, %v6777_v6  ;;  %v12831_v41 = vld [vmem:[#allocation3 + $0x60] sm:$0xff]   ;;  %v6811_v6 = vshll.u32 %v12823_v27, 16 }
 0x31b   : > { %5915 = vmatmul.mubr.bf16.gmra.mrb[228].mxu0 %v12552_v21  ;;  %v4886_v57 = vor.u32 %v4885_v15, %v4881_v16  ;;  %v6761_v21 = vor.u32 %v6760_v25, %v6756_v38  ;;  %v4912_v15 = vshll.u32 %v12779_v59, 16  ;;  %v4919_v16 = vshll.u32 %v12789_v31, 16 }
 0x31c   : > { %7240 = vmatprep.mubr.bf16.mxu0 %v6754_v48  ;;  %v6787_v48 = vshll.u32 %v12787_v3, 16  ;;  %v6785_v25 = vor.u32 %v6784_v45, %v6780_v9  ;;  %v6818_v45 = vshll.u32 %v12831_v41, 16  ;;  %v6813_v9 = vrot.slane %v6811_v6, 1 }
 0x31d   : > { %v4891_v49 = vsel %vm719_vm1, %v4886_v57, %v4890_v36  ;;  %v6766_v44 = vsel %vm719_vm1, %v6761_v21, %v6765_v26  ;;  %v4914_v34 = vrot.slane %v4912_v15, 1  ;;  %v6794_v57 = vshll.u32 %v12795_v63, 16  ;;  %v12805_v36 = vld [vmem:[#allocation3 + $0x50] ss:$0 sps:$4 sm:$0xff]   ;;  %v12836_v15 = vld [vmem:[#allocation3 + $0xa4] ss:$0 sps:$4 sm:$0xff]  }
 0x31e   : > { %v6789_v46 = vrot.slane %v6787_v48, 1  ;;  %v4921_v42 = vrot.slane %v4919_v16, 1  ;;  %v12807_v21 = vld [vmem:[#allocation3 + $0x90] sm:$0xff]   ;;  %v12841_v16 = vld [vmem:[#allocation3 + $0x68] ss:$0 sps:$4 sm:$0xff]  }
 0x31f   : > { %v6796_v26 = vrot.slane %v6794_v57, 1  ;;  %v4931_v24 = vshll.u32 %v12807_v21, 16  ;;  %v4929_v33 = vshrl.u32 %v12807_v21, 16  ;;  %v4941_v57 = vshrl.u32 %v12825_v23, 16 }
 0x320   : > { %v6790_v58 = vsel %vm719_vm1, %v6785_v25, %v6789_v46  ;;  %v6820_v46 = vrot.slane %v6818_v45, 1  ;;  %v12872_v45 = vld [vmem:[#allocation3 + $0xbc] ss:$0 sps:$4 sm:$0xff]  }
 0x321   : > { %6317 = vmatmul.mubr.bf16.gmra.mrb[216].mxu1 %v12672_v18  ;;  %v6951_v18 = vrot.slane %v12676_v12, 1  ;;  %v6797_v50 = vor.u32 %v6796_v26, %v6792_v19  ;;  %v4933_v47 = vrot.slane %v4931_v24, 1 }
 0x322   : > { %6324 = vmatprep.mubr.bf16.mxu1 %v4891_v49 }
 0x323   : > { %7241 = vmatmul.mubr.bf16.vlgmr.msra.gmra.mrb[232].mxu0 %v12676_v12  ;;  %v12774_v28 = vsel %vm954_vm0, %v6951_v18, %v6952_v32  ;;  %v4902_v12 = vrot.slane %v4900_v13, 1  ;;  %v6799_v13 = vshll.u32 %v12805_v36, 16  ;;  %v6806_v18 = vshll.u32 %v12813_v4, 16 }
 0x324   : > { %7248 = vmatprep.mubr.bf16.mxu0 %v6766_v44  ;;  %v4934_v0 = vor.u32 %v4933_v47, %v4929_v33 }
 0x325   : > { %v4903_v60 = vsel %vm719_vm1, %v4898_v17, %v4902_v12  ;;  %v6801_v39 = vrot.slane %v6799_v13, 1  ;;  %v6808_v12 = vrot.slane %v6806_v18, 1  ;;  %v12854_v13 = vld [vmem:[#allocation3 + $0xb0] ss:$0 sps:$4 sm:$0xff]  }
 0x326   : > { %v4960_v33 = vshll.u32 %v12854_v13, 16 }
 0x327   : > { %v6802_v17 = vsel %vm719_vm1, %v6797_v50, %v6801_v39  ;;  %v12861_v39 = vld [vmem:[#allocation3 + $0xb4] sm:$0xff]  }
 0x329   : > { %6325 = vmatmul.mubr.bf16.gmra.mrb[220].mxu1 %v12702_v2  ;;  %v4910_v2 = vor.u32 %v4909_v29, %v4905_v53  ;;  %v4943_v29 = vshll.u32 %v12825_v23, 16 }
 0x32a   : > { %6332 = vmatprep.mubr.bf16.mxu1 %v4903_v60  ;;  %v6804_v60 = vshrl.u32 %v12813_v4, 16 }
 0x32b   : > { %7249 = vmatmul.mubr.bf16.gmra.mrb[236].mxu0 %v12715_v61  ;;  %v12800_v61 = vld [vmem:[#allocation3 + $0x8c] ss:$0 sps:$4 sm:$0xff]   ;;  %v4915_v38 = vsel %vm719_vm1, %v4910_v2, %v4914_v34  ;;  %v4945_v48 = vrot.slane %v4943_v29, 1  ;;  %v4967_v29 = vshll.u32 %v12861_v39, 16 }
 0x32c   : > { %7256 = vmatprep.mubr.bf16.mxu0 %v6778_v8  ;;  %v4924_v49 = vshll.u32 %v12800_v61, 16  ;;  %v6809_v53 = vor.u32 %v6808_v12, %v6804_v60  ;;  %v12843_v34 = vld [vmem:[#allocation3 + $0xa8] sm:$0xff]   ;;  %v12867_v12 = vld [vmem:[#allocation3 + $0x78] sm:$0xff]  }
 0x32d   : > { %v4955_v26 = vshll.u32 %v12843_v34, 16 }
 0x32e   : > { %v4926_v44 = vrot.slane %v4924_v49, 1  ;;  %v6814_v25 = vsel %vm719_vm1, %v6809_v53, %v6813_v9  ;;  %v6823_v49 = vshll.u32 %v12841_v16, 16 }
 0x32f   : > { %v4957_v18 = vrot.slane %v4955_v26, 1 }
 0x330   : > { %v6825_v50 = vrot.slane %v6823_v49, 1  ;;  %v12883_v49 = vld [vmem:[#allocation3 + $0x84] sm:$0xff]  }
 0x331   : > { %6333 = vmatmul.mubr.bf16.gmra.mrb[224].mxu1 %v12727_v35  ;;  %v4922_v35 = vor.u32 %v4921_v42, %v4917_v7  ;;  %v12849_v42 = vld [vmem:[#allocation3 + $0x6c] sm:$0xff]   ;;  %v6816_v7 = vshrl.u32 %v12831_v41, 16 }
 0x332   : > { %6340 = vmatprep.mubr.bf16.mxu1 %v4915_v38  ;;  %v4948_v38 = vshll.u32 %v12836_v15, 16  ;;  %v6830_v24 = vshll.u32 %v12849_v42, 16  ;;  %v6828_v60 = vshrl.u32 %v12849_v42, 16 }
 0x333   : > { %7257 = vmatmul.mubr.bf16.gmra.mrb[240].mxu0 %v12750_v54  ;;  %v12818_v54 = vld [vmem:[#allocation3 + $0x98] ss:$0 sps:$4 sm:$0xff]   ;;  %v4927_v32 = vsel %vm719_vm1, %v4922_v35, %v4926_v44  ;;  %v6821_v19 = vor.u32 %v6820_v46, %v6816_v7  ;;  %v4965_v46 = vshrl.u32 %v12861_v39, 16 }
 0x334   : > { %7264 = vmatprep.mubr.bf16.mxu0 %v6790_v58  ;;  %v4936_v56 = vshll.u32 %v12818_v54, 16  ;;  %v4946_v58 = vor.u32 %v4945_v48, %v4941_v57  ;;  %v4950_v35 = vrot.slane %v4948_v38, 1  ;;  %v12877_v57 = vld [vmem:[#allocation3 + $0x80] ss:$0 sps:$4 sm:$0xff]  }
 0x335   : > { %v6826_v47 = vsel %vm719_vm1, %v6821_v19, %v6825_v50  ;;  %v6847_v19 = vshll.u32 %v12877_v57, 16  ;;  %v6854_v50 = vshll.u32 %v12883_v49, 16 }
 0x336   : > { %v4938_v8 = vrot.slane %v4936_v56, 1  ;;  %v4951_v44 = vsel %vm719_vm1, %v4946_v58, %v4950_v35  ;;  %v6832_v56 = vrot.slane %v6830_v24, 1  ;;  %v4972_v58 = vshll.u32 %v12872_v45, 16 }
 0x337   : > { %v6840_v35 = vshrl.u32 %v12867_v12, 16 }
 0x338   : > { %v4939_v2 = vsel %vm719_vm1, %v4934_v0, %v4938_v8  ;;  %v4962_v8 = vrot.slane %v4960_v33, 1  ;;  %v6833_v53 = vor.u32 %v6832_v56, %v6828_v60  ;;  %v4974_v24 = vrot.slane %v4972_v58, 1 }
 0x339   : > { %6341 = vmatmul.mubr.bf16.gmra.mrb[228].mxu1 %v12760_v14  ;;  %v6856_v56 = vrot.slane %v6854_v50, 1  ;;  %v6852_v60 = vshrl.u32 %v12883_v49, 16  ;;  %v10243_v50 = vld [vmem:[%s13434_s4 + $0x208] sm:$0xff]  }
 0x33a   : > { %6348 = vmatprep.mubr.bf16.mxu1 %v4927_v32  ;;  %v12859_v32 = vld [vmem:[#allocation3 + $0x74] ss:$0 sps:$4 sm:$0xff]  }
 0x33b   : > { %7265 = vmatmul.mubr.bf16.gmra.mrb[244].mxu0 %v12766_v20  ;;  %v6835_v6 = vshll.u32 %v12859_v32, 16 }
 0x33c   : > { %7272 = vmatprep.mubr.bf16.mxu0 %v6802_v17  ;;  %v4953_v17 = vshrl.u32 %v12843_v34, 16 }
 0x33d   : > { %v6837_v48 = vrot.slane %v6835_v6, 1 }
 0x33e   : > { %v4958_v0 = vor.u32 %v4957_v18, %v4953_v17  ;;  %v12890_v17 = vld [vmem:[#allocation3 + $0x8c] ss:$0 sps:$4 sm:$0xff]  }
 0x33f   : > { %v6838_v38 = vsel %vm719_vm1, %v6833_v53, %v6837_v48  ;;  %v6859_v6 = vshll.u32 %v12890_v17, 16 }
 0x340   : > { %v4963_v9 = vsel %vm719_vm1, %v4958_v0, %v4962_v8  ;;  %v12894_v0 = vld [vmem:[#allocation3 + $0x90] sm:$0xff]   ;;  %v6857_v8 = vor.u32 %v6856_v56, %v6852_v60 }
 0x341   : > { %6349 = vmatmul.mubr.bf16.gmra.mrb[232].mxu1 %v12789_v31  ;;  %v6866_v53 = vshll.u32 %v12894_v0, 16  ;;  %v10246_v60 = vld [vmem:[%s13434_s4 + $0x210] sm:$0xff]  }
 0x342   : > { %6356 = vmatprep.mubr.bf16.mxu1 %v4939_v2  ;;  %v6842_v2 = vshll.u32 %v12867_v12, 16 }
 0x343   : > { %7273 = vmatmul.mubr.bf16.gmra.mrb[248].mxu0 %v12795_v63 }
 0x344   : > { %7280 = vmatprep.mubr.bf16.mxu0 %v6814_v25  ;;  %v4969_v25 = vrot.slane %v4967_v29, 1  ;;  %v6844_v7 = vrot.slane %v6842_v2, 1 }
 0x346   : > { %v4970_v26 = vor.u32 %v4969_v25, %v4965_v46  ;;  %v6861_v25 = vrot.slane %v6859_v6, 1  ;;  %v12927_v6 = vld [vmem:[#allocation3 + $0xa8] sm:$0xff]  }
 0x348   : > { %v4975_v18 = vsel %vm719_vm1, %v4970_v26, %v4974_v24  ;;  %v6868_v26 = vrot.slane %v6866_v53, 1 }
 0x349   : > { %6357 = vmatmul.mubr.bf16.gmra.mrb[236].mxu1 %v12807_v21 }
 0x34a   : > { %6364 = vmatprep.mubr.bf16.mxu1 %v4951_v44  ;;  %v6845_v44 = vor.u32 %v6844_v7, %v6840_v35  ;;  %v6862_v7 = vsel %vm719_vm1, %v6857_v8, %v6861_v25  ;;  %v12909_v35 = vld [vmem:[#allocation3 + $0x9c] sm:$0xff]  }
 0x34b   : > { %7281 = vmatmul.mubr.bf16.gmra.mrb[252].mxu0 %v12813_v4  ;;  %v10249_v25 = vld [vmem:[%s13434_s4 + $0x218] sm:$0xff]  }
 0x34c   : > { %7288 = vmatprep.mubr.bf16.mxu0 %v6826_v47  ;;  %v6849_v47 = vrot.slane %v6847_v19, 1  ;;  %v6864_v19 = vshrl.u32 %v12894_v0, 16 }
 0x34e   : > { %v6850_v33 = vsel %vm719_vm1, %v6845_v44, %v6849_v47  ;;  %v6869_v44 = vor.u32 %v6868_v26, %v6864_v19  ;;  %v12918_v47 = vld [vmem:[#allocation3 + $0xa4] ss:$0 sps:$4 sm:$0xff]   ;;  %v12940_v19 = vld [vmem:[#allocation3 + $0xb0] ss:$0 sps:$4 sm:$0xff]  }
 0x351   : > { %6365 = vmatmul.mubr.bf16.gmra.mrb[240].mxu1 %v12825_v23 }
 0x352   : > { %6372 = vmatprep.mubr.bf16.mxu1 %v4963_v9 }
 0x353   : > { %7289 = vmatmul.mubr.bf16.gmra.mrb[0].mxu0 %v12831_v41 }
 0x354   : > { %7296 = vmatprep.mubr.bf16.mxu0 %v6838_v38  ;;  %v12902_v38 = vld [vmem:[#allocation3 + $0x98] ss:$0 sps:$4 sm:$0xff]  }
 0x355   : > { %v6871_v24 = vshll.u32 %v12902_v38, 16 }
 0x359   : > { %6373 = vmatmul.mubr.bf16.gmra.mrb[244].mxu1 %v12843_v34 }
 0x35a   : > { %6380 = vmatprep.mubr.bf16.mxu1 %v4975_v18  ;;  %v6873_v18 = vrot.slane %v6871_v24, 1 }
 0x35b   : > { %7297 = vmatmul.mubr.bf16.gmra.mrb[4].mxu0 %v12849_v42 }
 0x35c   : > { %7304 = vmatprep.mubr.bf16.mxu0 %v6850_v33  ;;  %v6874_v33 = vsel %vm719_vm1, %v6869_v44, %v6873_v18  ;;  %v6895_v18 = vshll.u32 %v12940_v19, 16 }
 0x35d   : > { %v9003_v29 = vpop.f32.mrb[168].mxu0 }
 0x35e   : > { %v9004_v2 = vpop.f32.mrb[169].mxu0 }
 0x35f   : > { %v12899_v9 = vadd.f32 %v9004_v2, %v9003_v29  ;;  %v9006_v48 = vpop.f32.mrb[170].mxu0  ;;  %v6876_v29 = vshrl.u32 %v12909_v35, 16 }
 0x360   : > { %v9007_v46 = vpop.f32.mrb[171].mxu0 }
 0x361   : > { %6381 = vmatmul.mubr.bf16.gmra.mrb[248].mxu1 %v12861_v39  ;;  %v12905_v58 = vadd.f32 %v9007_v46, %v9006_v48  ;;  %v6890_v48 = vshll.u32 %v12927_v6, 16 }
 0x362   : > { %9615 = vmatprep.mubr.bf16.mxu1 %v12689_v11  ;;  %v6878_v11 = vshll.u32 %v12909_v35, 16 }
 0x363   : > { %7305 = vmatmul.mubr.bf16.gmra.mrb[8].mxu0 %v12867_v12  ;;  %v6892_v44 = vrot.slane %v6890_v48, 1 }
 0x364   : > { %7312 = vmatprep.mubr.bf16.mxu0 %v6862_v7  ;;  %v6880_v56 = vrot.slane %v6878_v11, 1  ;;  %v10252_v11 = vld [vmem:[%s13434_s4 + $0x220] sm:$0xff]  }
 0x366   : > { %v6881_v2 = vor.u32 %v6880_v56, %v6876_v29 }
 0x369   : > { %9616 = vmatmul.mubr.bf16.vlgmr.msra.gmra.mrb[156].mxu1 %v12693_v37 }
 0x36a   : > { %9619 = vmatprep.mubr.bf16.mxu1 %v12705_v40  ;;  %9648 = vmatpush3.bf16.msra.mxu1 %v12661_v51  ;;  %v6883_v40 = vshll.u32 %v12918_v47, 16 }
 0x36b   : > { %7313 = vmatmul.mubr.bf16.gmra.mrb[12].mxu0 %v12883_v49  ;;  %9649 = vmatprep.subr.bf16.mxu1 %v10243_v50 }
 0x36c   : > { %7320 = vmatprep.mubr.bf16.mxu0 %v6874_v33  ;;  %v9009_v37 = vpop.f32.mrb[172].mxu0  ;;  %v6885_v26 = vrot.slane %v6883_v40, 1 }
 0x36d   : > { %v9010_v8 = vpop.f32.mrb[173].mxu0 }
 0x36e   : > { %9650 = vmatpush3.bf16.msra.mxu1 %v10243_v50  ;;  %v12931_v51 = vadd.f32 %v9010_v8, %v9009_v37  ;;  %v9012_v53 = vpop.f32.mrb[174].mxu0  ;;  %v6886_v24 = vsel %vm719_vm1, %v6881_v2, %v6885_v26  ;;  %v12945_v50 = vld [vmem:[#allocation3 + $0xb4] sm:$0xff]   ;;  %v10255_v37 = vld [vmem:[%s13434_s4 + $0x228] sm:$0xff]   ;;  %v6897_v8 = vrot.slane %v6895_v18, 1  ;;  %v12966_v26 = vld [vmem:[#allocation3 + $0xc0] sm:$0xff]  }
 0x36f   : > { %9651 = vmatprep.subr.bf16.mxu1 %v10246_v60  ;;  %v9013_v46 = vpop.f32.mrb[175].mxu0  ;;  %v6902_v56 = vshll.u32 %v12945_v50, 16  ;;  %v12977_v18 = vld [vmem:[#allocation3 + $0xc8] ss:$0 sps:$4 sm:$0xff]  }
 0x370   : > { %v12937_v7 = vadd.f32 %v9013_v46, %v9012_v53  ;;  %v12959_v53 = vld [vmem:[#allocation3 + $0xbc] ss:$0 sps:$4 sm:$0xff]   ;;  %13551 = vst [vmem:[#allocation15_spill] sm:$0xff] %v12977_v18 }
 0x371   : > { %9620 = vmatmul.mubr.bf16.gmra.mrb[160].mxu1 %v12710_v30  ;;  %v6888_v30 = vshrl.u32 %v12927_v6, 16  ;;  %v6904_v46 = vrot.slane %v6902_v56, 1 }
 0x372   : > { %9623 = vmatprep.mubr.bf16.mxu1 %v12718_v43  ;;  %9652 = vmatpush3.bf16.msra.mxu1 %v10246_v60 }
 0x373   : > { %7321 = vmatmul.mubr.bf16.gmra.mrb[16].mxu0 %v12894_v0  ;;  %9653 = vmatprep.subr.bf16.mxu1 %v10249_v25  ;;  %v6893_v33 = vor.u32 %v6892_v44, %v6888_v30  ;;  %v10259_v30 = vld [vmem:[%s13434_s4 + $0x238] sm:$0xff]  }
 0x374   : > { %7328 = vmatprep.mubr.bf16.mxu0 %v6886_v24  ;;  %v6900_v24 = vshrl.u32 %v12945_v50, 16 }
 0x375   : > { %v9015_v43 = vpop.f32.mrb[176].mxu0 }
 0x376   : > { %9654 = vmatpush3.bf16.msra.mxu1 %v10249_v25  ;;  %v9016_v60 = vpop.f32.mrb[177].mxu0  ;;  %v6898_v25 = vsel %vm719_vm1, %v6893_v33, %v6897_v8  ;;  %v6905_v44 = vor.u32 %v6904_v46, %v6900_v24  ;;  %v12980_v33 = vld [vmem:[#allocation3 + $0xcc] sm:$0xff]   ;;  %v6919_v8 = vshll.u32 %v12977_v18, 16 }
 0x377   : > { %9655 = vmatprep.subr.bf16.mxu1 %v10252_v11  ;;  %v12956_v29 = vadd.f32 %v9016_v60, %v9015_v43  ;;  %v9018_v40 = vpop.f32.mrb[178].mxu0 }
 0x378   : > { %v9019_v2 = vpop.f32.mrb[179].mxu0 }
 0x379   : > { %9624 = vmatmul.mubr.bf16.gmra.mrb[164].mxu1 %v12730_v1  ;;  %v12962_v48 = vadd.f32 %v9019_v2, %v9018_v40  ;;  %v10256_v1 = vld [vmem:[%s13434_s4 + $0x230] sm:$0xff]   ;;  %v5023_v40 = vrot.slane %v12779_v59, 1 }
 0x37a   : > { %9627 = vmatprep.mubr.bf16.mxu1 %v12733_v62  ;;  %9656 = vmatpush3.bf16.msra.mxu1 %v10252_v11  ;;  %v6907_v62 = vshll.u32 %v12959_v53, 16  ;;  %v6914_v11 = vshll.u32 %v12966_v26, 16 }
 0x37b   : > { %7329 = vmatmul.mubr.bf16.gmra.mrb[20].mxu0 %v12909_v35  ;;  %9657 = vmatprep.subr.bf16.mxu1 %v10255_v37 }
 0x37c   : > { %7336 = vmatprep.mubr.bf16.mxu0 %v6898_v25  ;;  %v6909_v43 = vrot.slane %v6907_v62, 1  ;;  %v6916_v60 = vrot.slane %v6914_v11, 1  ;;  %v12989_v25 = vld [vmem:[#allocation3 + $0xd4] ss:$0 sps:$4 sm:$0xff]  }
 0x37d   : > { %v6931_v18 = vshll.u32 %v12989_v25, 16 }
 0x37e   : > { %9658 = vmatpush3.bf16.msra.mxu1 %v10255_v37  ;;  %v6910_v56 = vsel %vm719_vm1, %v6905_v44, %v6909_v43  ;;  %v5022_v37 = vrot.slane %v12760_v14, 1  ;;  %v6921_v14 = vrot.slane %v6919_v8, 1  ;;  %v6924_v43 = vshrl.u32 %v12980_v33, 16 }
 0x37f   : > { %9659 = vmatprep.subr.bf16.mxu1 %v10256_v1 }
 0x380   : > { %v5024_v44 = vsel %vm954_vm0, %v5022_v37, %v5023_v40  ;;  %v5026_v37 = vrot.slane %v12800_v61, 1  ;;  %v5028_v40 = vrot.slane %v12807_v21, 1  ;;  %v5031_v61 = vrot.slane %v12825_v23, 1 }
 0x381   : > { %9628 = vmatmul.mubr.bf16.gmra.mrb[168].mxu1 %v12741_v10  ;;  %v6912_v10 = vshrl.u32 %v12966_v26, 16  ;;  %v5032_v21 = vrot.slane %v12836_v15, 1  ;;  %v5037_v23 = vrot.slane %v12861_v39, 1  ;;  %v5038_v15 = vrot.slane %v12872_v45, 1 }
 0x382   : > { %9631 = vmatprep.mubr.bf16.mxu1 %v12744_v22  ;;  %9660 = vmatpush3.bf16.msra.mxu1 %v10256_v1  ;;  %v6926_v22 = vshll.u32 %v12980_v33, 16 }
 0x383   : > { %7337 = vmatmul.mubr.bf16.gmra.mrb[24].mxu0 %v12927_v6  ;;  %9661 = vmatprep.subr.bf16.mxu1 %v10259_v30  ;;  %v6917_v1 = vor.u32 %v6916_v60, %v6912_v10  ;;  %v5025_v60 = vrot.slane %v12789_v31, 1  ;;  %v6933_v10 = vrot.slane %v6931_v18, 1  ;;  %v5034_v18 = vrot.slane %v12843_v34, 1 }
 0x384   : > { %7344 = vmatprep.mubr.bf16.mxu0 %v6910_v56  ;;  %v6928_v56 = vrot.slane %v6926_v22, 1 }
 0x385   : > { %v9021_v2 = vpop.f32.mrb[180].mxu0 }
 0x386   : > { %v9022_v46 = vpop.f32.mrb[181].mxu0  ;;  %9662 = vmatpush3.bf16.msra.mxu1 %v10259_v30  ;;  %v6922_v30 = vsel %vm719_vm1, %v6917_v1, %v6921_v14  ;;  %v6929_v8 = vor.u32 %v6928_v56, %v6924_v43  ;;  %v5033_v43 = vsel %vm954_vm0, %v5031_v61, %v5032_v21  ;;  %v6963_v61 = vrot.slane %v12795_v63, 1 }
 0x387   : > { %v12992_v24 = vadd.f32 %v9022_v46, %v9021_v2  ;;  %v9024_v62 = vpop.f32.mrb[182].mxu0  ;;  %v5027_v2 = vsel %vm954_vm0, %v5025_v60, %v5026_v37  ;;  %v5039_v37 = vsel %vm954_vm0, %v5037_v23, %v5038_v15 }
 0x388   : > { %v9025_v11 = vpop.f32.mrb[183].mxu0  ;;  %v6934_v46 = vsel %vm719_vm1, %v6929_v8, %v6933_v10 }
 0x389   : > { %9632 = vmatmul.mubr.bf16.gmra.mrb[172].mxu1 %v12753_v52  ;;  %v12996_v59 = vadd.f32 %v9025_v11, %v9024_v62  ;;  %v5029_v52 = vrot.slane %v12818_v54, 1 }
 0x38a   : > { %9635 = vmatprep.mubr.bf16.mxu1 %v5024_v44  ;;  %v5035_v44 = vrot.slane %v12854_v13, 1 }
 0x38b   : > { %7345 = vmatmul.mubr.bf16.gmra.mrb[28].mxu0 %v12945_v50  ;;  %v5030_v22 = vsel %vm954_vm0, %v5028_v40, %v5029_v52 }
 0x38c   : > { %7352 = vmatprep.mubr.bf16.mxu0 %v6922_v30  ;;  %v5036_v56 = vsel %vm954_vm0, %v5034_v18, %v5035_v44 }
 0x391   : > { %9636 = vmatmul.mubr.bf16.gmra.mrb[176].mxu1 %v5027_v2 }
 0x392   : > { %9639 = vmatprep.mubr.bf16.mxu1 %v5030_v22  ;;  %v9027_v1 = vpop.f32.mrb[184].mxu0 }
 0x393   : > { %7353 = vmatmul.mubr.bf16.gmra.mrb[32].mxu0 %v12966_v26  ;;  %v9028_v31 = vpop.f32.mrb[185].mxu0 }
 0x394   : > { %v13012_v62 = vadd.f32 %v9028_v31, %v9027_v1  ;;  %v9030_v54 = vpop.f32.mrb[186].mxu0  ;;  %7360 = vmatprep.mubr.bf16.mxu0 %v6934_v46  ;;  %v6960_v46 = vrot.slane %v12766_v20, 1  ;;  %v6961_v1 = vrot.slane %v12787_v3, 1  ;;  %v6966_v20 = vrot.slane %v12813_v4, 1 }
 0x395   : > { %v9031_v14 = vpop.f32.mrb[187].mxu0  ;;  %v6967_v3 = vrot.slane %v12823_v27, 1  ;;  %v6972_v27 = vrot.slane %v12849_v42, 1 }
 0x396   : > { %v13016_v11 = vadd.f32 %v9031_v14, %v9030_v54  ;;  %v6962_v44 = vsel %vm954_vm0, %v6960_v46, %v6961_v1 }
 0x399   : > { %9640 = vmatmul.mubr.bf16.gmra.mrb[180].mxu1 %v5033_v43  ;;  %v6970_v43 = vrot.slane %v12841_v16, 1  ;;  %v6975_v16 = vrot.slane %v12867_v12, 1 }
 0x39a   : > { %9643 = vmatprep.mubr.bf16.mxu1 %v5036_v56 }
 0x39b   : > { %7361 = vmatmul.mubr.bf16.gmra.mrb[36].mxu0 %v12980_v33 }
 0x39d   : > { %v9033_v30 = vpop.f32.mrb[188].mxu0 }
 0x39e   : > { %v9034_v60 = vpop.f32.mrb[189].mxu0 }
 0x39f   : > { %v13023_v34 = vadd.f32 %v9034_v60, %v9033_v30  ;;  %v9036_v13 = vpop.f32.mrb[190].mxu0  ;;  %v6968_v30 = vsel %vm954_vm0, %v6966_v20, %v6967_v3  ;;  %v6981_v20 = vrot.slane %v12894_v0, 1  ;;  %v6982_v3 = vrot.slane %v12902_v38, 1 }
 0x3a0   : > { %v9037_v40 = vpop.f32.mrb[191].mxu0 }
 0x3a1   : > { %9644 = vmatmul.mubr.bf16.gmra.mrb[184].mxu1 %v5039_v37  ;;  %v13026_v52 = vadd.f32 %v9037_v40, %v9036_v13 }
 0x3a2   : > { %9663 = vmatprep.mubr.bf16.mxu1 %v12774_v28  ;;  %v6964_v28 = vrot.slane %v12805_v36, 1  ;;  %v6969_v36 = vrot.slane %v12831_v41, 1  ;;  %v6973_v41 = vrot.slane %v12859_v32, 1 }
 0x3a4   : > { %v6965_v14 = vsel %vm954_vm0, %v6963_v61, %v6964_v28  ;;  %v6971_v13 = vsel %vm954_vm0, %v6969_v36, %v6970_v43  ;;  %v6974_v28 = vsel %vm954_vm0, %v6972_v27, %v6973_v41  ;;  %v6985_v41 = vrot.slane %v12918_v47, 1 }
 0x3a5   : > { %v9039_v8 = vpop.f32.mrb[192].mxu0 }
 0x3a6   : > { %v9040_v10 = vpop.f32.mrb[193].mxu0 }
 0x3a7   : > { %v13029_v2 = vadd.f32 %v9040_v10, %v9039_v8  ;;  %v9042_v39 = vpop.f32.mrb[194].mxu0  ;;  %v6976_v8 = vrot.slane %v12877_v57, 1 }
 0x3a8   : > { %v9043_v22 = vpop.f32.mrb[195].mxu0 }
 0x3a9   : > { %9664 = vmatmul.mubr.bf16.vlgmr.msra.gmra.mrb[156].mxu1 %v12777_v55  ;;  %v13032_v45 = vadd.f32 %v9043_v22, %v9042_v39  ;;  %v6977_v32 = vsel %vm954_vm0, %v6975_v16, %v6976_v8  ;;  %v6987_v16 = vrot.slane %v12927_v6, 1  ;;  %v6988_v8 = vrot.slane %v12940_v19, 1 }
 0x3aa   : > { %9667 = vmatprep.mubr.bf16.mxu1 %v12783_v5 }
 0x3ab   : > { %v6989_v47 = vsel %vm954_vm0, %v6987_v16, %v6988_v8 }
 0x3ad   : > { %v9045_v31 = vpop.f32.mrb[196].mxu0 }
 0x3ae   : > { %v9046_v21 = vpop.f32.mrb[197].mxu0 }
 0x3af   : > { %v13039_v54 = vadd.f32 %v9046_v21, %v9045_v31  ;;  %v9048_v18 = vpop.f32.mrb[198].mxu0 }
 0x3b0   : > { %v9049_v55 = vpop.f32.mrb[199].mxu0 }
 0x3b1   : > { %9668 = vmatmul.mubr.bf16.gmra.mrb[160].mxu1 %v6962_v44  ;;  %v13043_v5 = vadd.f32 %v9049_v55, %v9048_v18  ;;  %v6979_v55 = vrot.slane %v12890_v17, 1  ;;  %v6983_v17 = vsel %vm954_vm0, %v6981_v20, %v6982_v3 }
 0x3b2   : > { %9671 = vmatprep.mubr.bf16.mxu1 %v6965_v14 }
 0x3b5   : > { %v9051_v63 = vpop.f32.mrb[200].mxu0 }
 0x3b6   : > { %v9052_v56 = vpop.f32.mrb[201].mxu0 }
 0x3b7   : > { %v13049_v23 = vadd.f32 %v9052_v56, %v9051_v63  ;;  %v9054_v15 = vpop.f32.mrb[202].mxu0 }
 0x3b8   : > { %v9055_v60 = vpop.f32.mrb[203].mxu0 }
 0x3b9   : > { %9672 = vmatmul.mubr.bf16.gmra.mrb[164].mxu1 %v6968_v30  ;;  %v13053_v37 = vadd.f32 %v9055_v60, %v9054_v15 }
 0x3ba   : > { %9675 = vmatprep.mubr.bf16.mxu1 %v6971_v13 }
 0x3bc   : > { %v9139_v4 = vpop.f32.mrb[188].mxu1 }
 0x3bd   : > { %v9140_v40 = vpop.f32.mrb[189].mxu1 }
 0x3be   : > { %v9141_v10 = vadd.f32 %v9140_v40, %v9139_v4  ;;  %v9142_v39 = vpop.f32.mrb[190].mxu1  ;;  %v9057_v22 = vpop.f32.mrb[204].mxu0 }
 0x3bf   : > { %v9143_v46 = vpop.f32.mrb[191].mxu1  ;;  %v9058_v1 = vpop.f32.mrb[205].mxu0 }
 0x3c0   : > { %v13060_v31 = vadd.f32 %v9141_v10, %v12899_v9  ;;  %v9144_v61 = vadd.f32 %v9143_v46, %v9142_v39  ;;  %v13063_v21 = vadd.f32 %v9058_v1, %v9057_v22  ;;  %v9060_v42 = vpop.f32.mrb[206].mxu0  ;;  %v6978_v9 = vrot.slane %v12883_v49, 1 }
 0x3c1   : > { %9676 = vmatmul.mubr.bf16.gmra.mrb[168].mxu1 %v6974_v28  ;;  %v9061_v12 = vpop.f32.mrb[207].mxu0 }
 0x3c2   : > { %v13067_v57 = vadd.f32 %v9144_v61, %v12905_v58  ;;  %9679 = vmatprep.mubr.bf16.mxu1 %v6977_v32  ;;  %v13069_v18 = vadd.f32 %v9061_v12, %v9060_v42  ;;  %v6980_v60 = vsel %vm954_vm0, %v6978_v9, %v6979_v55  ;;  %v6993_v55 = vrot.slane %v12966_v26, 1 }
 0x3c4   : > { %v9145_v44 = vpop.f32.mrb[192].mxu1 }
 0x3c5   : > { %v9146_v14 = vpop.f32.mrb[193].mxu1 }
 0x3c6   : > { %v9147_v63 = vadd.f32 %v9146_v14, %v9145_v44  ;;  %v9148_v36 = vpop.f32.mrb[194].mxu1  ;;  %v9063_v43 = vpop.f32.mrb[208].mxu0  ;;  %v6991_v44 = vrot.slane %v12959_v53, 1  ;;  %v13552_v14 = vld [vmem:[#allocation15_spill] sm:$0xff] }
 0x3c7   : > { %v9149_v56 = vpop.f32.mrb[195].mxu1  ;;  %v9064_v15 = vpop.f32.mrb[209].mxu0  ;;  %v6994_v20 = vrot.slane %v13552_v14, 1 }
 0x3c8   : > { %v13076_v58 = vadd.f32 %v9147_v63, %v12931_v51  ;;  %v9150_v30 = vadd.f32 %v9149_v56, %v9148_v36  ;;  %v13079_v13 = vadd.f32 %v9064_v15, %v9063_v43  ;;  %v9066_v49 = vpop.f32.mrb[210].mxu0  ;;  %v6984_v51 = vrot.slane %v12909_v35, 1 }
 0x3c9   : > { %9680 = vmatmul.mubr.bf16.gmra.mrb[172].mxu1 %v6980_v60  ;;  %v9067_v0 = vpop.f32.mrb[211].mxu0  ;;  %v6995_v53 = vsel %vm954_vm0, %v6993_v55, %v6994_v20 }
 0x3ca   : > { %v13083_v38 = vadd.f32 %v9150_v30, %v12937_v7  ;;  %9683 = vmatprep.mubr.bf16.mxu1 %v6983_v17  ;;  %v13085_v4 = vadd.f32 %v9067_v0, %v9066_v49  ;;  %v6986_v28 = vsel %vm954_vm0, %v6984_v51, %v6985_v41  ;;  %v6996_v0 = vrot.slane %v12980_v33, 1 }
 0x3cc   : > { %v9151_v27 = vpop.f32.mrb[196].mxu1 }
 0x3cd   : > { %v9152_v40 = vpop.f32.mrb[197].mxu1 }
 0x3ce   : > { %v9153_v10 = vadd.f32 %v9152_v40, %v9151_v27  ;;  %v9154_v39 = vpop.f32.mrb[198].mxu1  ;;  %v9069_v22 = vpop.f32.mrb[212].mxu0 }
 0x3cf   : > { %v9155_v46 = vpop.f32.mrb[199].mxu1  ;;  %v9070_v1 = vpop.f32.mrb[213].mxu0 }
 0x3d0   : > { %v13092_v7 = vadd.f32 %v9153_v10, %v12956_v29  ;;  %v9156_v61 = vadd.f32 %v9155_v46, %v9154_v39  ;;  %v13095_v42 = vadd.f32 %v9070_v1, %v9069_v22  ;;  %v9072_v35 = vpop.f32.mrb[214].mxu0  ;;  %v6990_v29 = vrot.slane %v12945_v50, 1 }
 0x3d1   : > { %9684 = vmatmul.mubr.bf16.gmra.mrb[176].mxu1 %v6986_v28  ;;  %v9073_v6 = vpop.f32.mrb[215].mxu0 }
 0x3d2   : > { %v13099_v19 = vadd.f32 %v9156_v61, %v12962_v48  ;;  %9687 = vmatprep.mubr.bf16.mxu1 %v6989_v47  ;;  %v13101_v32 = vadd.f32 %v9073_v6, %v9072_v35  ;;  %v6992_v30 = vsel %vm954_vm0, %v6990_v29, %v6991_v44 }
 0x3d4   : > { %v9157_v12 = vpop.f32.mrb[200].mxu1 }
 0x3d5   : > { %v9158_v9 = vpop.f32.mrb[201].mxu1 }
 0x3d6   : > { %v9159_v3 = vadd.f32 %v9158_v9, %v9157_v12  ;;  %v9160_v63 = vpop.f32.mrb[202].mxu1  ;;  %v9075_v36 = vpop.f32.mrb[216].mxu0 }
 0x3d7   : > { %v9161_v43 = vpop.f32.mrb[203].mxu1  ;;  %v9076_v56 = vpop.f32.mrb[217].mxu0 }
 0x3d8   : > { %v13108_v48 = vadd.f32 %v9159_v3, %v12992_v24  ;;  %v9162_v15 = vadd.f32 %v9161_v43, %v9160_v63  ;;  %v13111_v60 = vadd.f32 %v9076_v56, %v9075_v36  ;;  %v9078_v50 = vpop.f32.mrb[218].mxu0  ;;  %v6997_v24 = vrot.slane %v12989_v25, 1 }
 0x3d9   : > { %9688 = vmatmul.mubr.bf16.gmra.mrb[180].mxu1 %v6992_v30  ;;  %v9079_v26 = vpop.f32.mrb[219].mxu0 }
 0x3da   : > { %v13115_v49 = vadd.f32 %v9162_v15, %v12996_v59  ;;  %9691 = vmatprep.mubr.bf16.mxu1 %v6995_v53  ;;  %v13117_v17 = vadd.f32 %v9079_v26, %v9078_v50  ;;  %v6998_v8 = vsel %vm954_vm0, %v6996_v0, %v6997_v24 }
 0x3dc   : > { %v9163_v27 = vpop.f32.mrb[204].mxu1 }
 0x3dd   : > { %v9164_v51 = vpop.f32.mrb[205].mxu1 }
 0x3de   : > { %v9165_v41 = vadd.f32 %v9164_v51, %v9163_v27  ;;  %v9166_v40 = vpop.f32.mrb[206].mxu1  ;;  %v9081_v16 = vpop.f32.mrb[220].mxu0 }
 0x3df   : > { %v9167_v10 = vpop.f32.mrb[207].mxu1  ;;  %v9082_v39 = vpop.f32.mrb[221].mxu0 }
 0x3e0   : > { %v13123_v22 = vadd.f32 %v9165_v41, %v13012_v62  ;;  %v9168_v59 = vadd.f32 %v9167_v10, %v9166_v40  ;;  %v13125_v46 = vadd.f32 %v9082_v39, %v9081_v16  ;;  %v9084_v1 = vpop.f32.mrb[222].mxu0 }
 0x3e1   : > { %9692 = vmatmul.mubr.bf16.gmra.mrb[184].mxu1 %v6998_v8  ;;  %v9085_v33 = vpop.f32.mrb[223].mxu0 }
 0x3e2   : > { %v13128_v25 = vadd.f32 %v9168_v59, %v13016_v11  ;;  %v13130_v61 = vadd.f32 %v9085_v33, %v9084_v1 }
 0x3e4   : > { %v9169_v28 = vpop.f32.mrb[208].mxu1 }
 0x3e5   : > { %v9170_v35 = vpop.f32.mrb[209].mxu1 }
 0x3e6   : > { %v9171_v47 = vadd.f32 %v9170_v35, %v9169_v28  ;;  %v9172_v6 = vpop.f32.mrb[210].mxu1  ;;  %v9087_v12 = vpop.f32.mrb[224].mxu0 }
 0x3e7   : > { %v9173_v29 = vpop.f32.mrb[211].mxu1  ;;  %v9088_v44 = vpop.f32.mrb[225].mxu0 }
 0x3e8   : > { %v13133_v62 = vadd.f32 %v9171_v47, %v13023_v34  ;;  %v9174_v9 = vadd.f32 %v9173_v29, %v9172_v6  ;;  %v13135_v55 = vadd.f32 %v9088_v44, %v9087_v12  ;;  %v9090_v14 = vpop.f32.mrb[226].mxu0 }
 0x3e9   : > { %v9091_v20 = vpop.f32.mrb[227].mxu0 }
 0x3ea   : > { %v13138_v11 = vadd.f32 %v9174_v9, %v13026_v52  ;;  %v13140_v3 = vadd.f32 %v9091_v20, %v9090_v14 }
 0x3ec   : > { %v9175_v63 = vpop.f32.mrb[212].mxu1 }
 0x3ed   : > { %v9176_v36 = vpop.f32.mrb[213].mxu1 }
 0x3ee   : > { %v9177_v43 = vadd.f32 %v9176_v36, %v9175_v63  ;;  %v9178_v56 = vpop.f32.mrb[214].mxu1  ;;  %v9093_v15 = vpop.f32.mrb[228].mxu0 }
 0x3ef   : > { %v9179_v30 = vpop.f32.mrb[215].mxu1  ;;  %v9094_v50 = vpop.f32.mrb[229].mxu0 }
 0x3f0   : > { %v13143_v34 = vadd.f32 %v9177_v43, %v13029_v2  ;;  %v9180_v53 = vadd.f32 %v9179_v30, %v9178_v56  ;;  %v13145_v26 = vadd.f32 %v9094_v50, %v9093_v15  ;;  %v9096_v0 = vpop.f32.mrb[230].mxu0 }
 0x3f1   : > { %v9097_v24 = vpop.f32.mrb[231].mxu0 }
 0x3f2   : > { %v13148_v52 = vadd.f32 %v9180_v53, %v13032_v45  ;;  %v13150_v27 = vadd.f32 %v9097_v24, %v9096_v0 }
 0x3f4   : > { %v9181_v51 = vpop.f32.mrb[216].mxu1 }
 0x3f5   : > { %v9182_v41 = vpop.f32.mrb[217].mxu1 }
 0x3f6   : > { %v9183_v40 = vadd.f32 %v9182_v41, %v9181_v51  ;;  %v9184_v16 = vpop.f32.mrb[218].mxu1  ;;  %v9275_v8 = vpop.f32.mrb[232].mxu0 }
 0x3f7   : > { %v9185_v10 = vpop.f32.mrb[219].mxu1  ;;  %v9276_v39 = vpop.f32.mrb[233].mxu0 }
 0x3f8   : > { %v13153_v2 = vadd.f32 %v9183_v40, %v13039_v54  ;;  %v9186_v59 = vadd.f32 %v9185_v10, %v9184_v16  ;;  %v9277_v1 = vadd.f32 %v9276_v39, %v9275_v8  ;;  %v9278_v33 = vpop.f32.mrb[234].mxu0 }
 0x3f9   : > { %v9279_v28 = vpop.f32.mrb[235].mxu0 }
 0x3fa   : > { %v13156_v35 = vadd.f32 %v9186_v59, %v13043_v5  ;;  %v9280_v45 = vadd.f32 %v9279_v28, %v9278_v33  ;;  %v13159_v6 = vadd.f32 %v13060_v31, %v9277_v1 }
 0x3fc   : > { %v9187_v47 = vpop.f32.mrb[220].mxu1  ;;  %v13162_v14 = vadd.f32 %v13067_v57, %v9280_v45 }
 0x3fd   : > { %v9188_v12 = vpop.f32.mrb[221].mxu1 }
 0x3fe   : > { %v9189_v29 = vadd.f32 %v9188_v12, %v9187_v47  ;;  %v9190_v44 = vpop.f32.mrb[222].mxu1  ;;  %v9281_v9 = vpop.f32.mrb[236].mxu0 }
 0x3ff   : > { %v9191_v54 = vpop.f32.mrb[223].mxu1  ;;  %v9282_v20 = vpop.f32.mrb[237].mxu0 }
 0x400   : > { %v13165_v63 = vadd.f32 %v9189_v29, %v13049_v23  ;;  %v9192_v36 = vadd.f32 %v9191_v54, %v9190_v44  ;;  %v9283_v5 = vadd.f32 %v9282_v20, %v9281_v9  ;;  %v9284_v43 = vpop.f32.mrb[238].mxu0 }
 0x401   : > { %v9285_v56 = vpop.f32.mrb[239].mxu0 }
 0x402   : > { %v13168_v15 = vadd.f32 %v9192_v36, %v13053_v37  ;;  %v9286_v31 = vadd.f32 %v9285_v56, %v9284_v43  ;;  %v13171_v30 = vadd.f32 %v13076_v58, %v9283_v5 }
 0x404   : > { %v9193_v50 = vpop.f32.mrb[224].mxu1  ;;  %v13174_v57 = vadd.f32 %v13083_v38, %v9286_v31 }
 0x405   : > { %v9194_v53 = vpop.f32.mrb[225].mxu1 }
 0x406   : > { %v9195_v0 = vadd.f32 %v9194_v53, %v9193_v50  ;;  %v9196_v24 = vpop.f32.mrb[226].mxu1  ;;  %v9287_v23 = vpop.f32.mrb[240].mxu0 }
 0x407   : > { %v9197_v51 = vpop.f32.mrb[227].mxu1  ;;  %v9288_v41 = vpop.f32.mrb[241].mxu0 }
 0x408   : > { %v13177_v40 = vadd.f32 %v9195_v0, %v13063_v21  ;;  %v9198_v16 = vadd.f32 %v9197_v51, %v9196_v24  ;;  %v9289_v37 = vadd.f32 %v9288_v41, %v9287_v23  ;;  %v9290_v8 = vpop.f32.mrb[242].mxu0 }
 0x409   : > { %v9291_v10 = vpop.f32.mrb[243].mxu0 }
 0x40a   : > { %v13180_v58 = vadd.f32 %v9198_v16, %v13069_v18  ;;  %v9292_v39 = vadd.f32 %v9291_v10, %v9290_v8  ;;  %v13183_v38 = vadd.f32 %v13092_v7, %v9289_v37 }
 0x40c   : > { %v9199_v59 = vpop.f32.mrb[228].mxu1  ;;  %v13186_v47 = vadd.f32 %v13099_v19, %v9292_v39 }
 0x40d   : > { %v9200_v1 = vpop.f32.mrb[229].mxu1 }
 0x40e   : > { %v9201_v33 = vadd.f32 %v9200_v1, %v9199_v59  ;;  %v9202_v28 = vpop.f32.mrb[230].mxu1  ;;  %v9293_v45 = vpop.f32.mrb[244].mxu0 }
 0x40f   : > { %v9203_v21 = vpop.f32.mrb[231].mxu1  ;;  %v9294_v12 = vpop.f32.mrb[245].mxu0 }
 0x410   : > { %v13189_v29 = vadd.f32 %v9201_v33, %v13079_v13  ;;  %v9204_v44 = vadd.f32 %v9203_v21, %v9202_v28  ;;  %v9295_v18 = vadd.f32 %v9294_v12, %v9293_v45  ;;  %v9296_v9 = vpop.f32.mrb[246].mxu0 }
 0x411   : > { %v9297_v54 = vpop.f32.mrb[247].mxu0 }
 0x412   : > { %v13192_v7 = vadd.f32 %v9204_v44, %v13085_v4  ;;  %v9298_v20 = vadd.f32 %v9297_v54, %v9296_v9  ;;  %v13195_v36 = vadd.f32 %v13108_v48, %v9295_v18 }
 0x414   : > { %v9205_v5 = vpop.f32.mrb[232].mxu1  ;;  %v13198_v19 = vadd.f32 %v13115_v49, %v9298_v20 }
 0x415   : > { %v9206_v43 = vpop.f32.mrb[233].mxu1 }
 0x416   : > { %v9207_v56 = vadd.f32 %v9206_v43, %v9205_v5  ;;  %v9208_v31 = vpop.f32.mrb[234].mxu1  ;;  %v9299_v13 = vpop.f32.mrb[248].mxu0 }
 0x417   : > { %v9209_v50 = vpop.f32.mrb[235].mxu1  ;;  %v9300_v53 = vpop.f32.mrb[249].mxu0 }
 0x418   : > { %v13201_v0 = vadd.f32 %v9207_v56, %v13095_v42  ;;  %v9210_v24 = vadd.f32 %v9209_v50, %v9208_v31  ;;  %v9301_v4 = vadd.f32 %v9300_v53, %v9299_v13  ;;  %v9302_v23 = vpop.f32.mrb[250].mxu0 }
 0x419   : > { %v9303_v51 = vpop.f32.mrb[251].mxu0 }
 0x41a   : > { %v13204_v48 = vadd.f32 %v9210_v24, %v13101_v32  ;;  %v9304_v41 = vadd.f32 %v9303_v51, %v9302_v23  ;;  %v13207_v49 = vadd.f32 %v13123_v22, %v9301_v4 }
 0x41c   : > { %v9211_v16 = vpop.f32.mrb[236].mxu1  ;;  %v13210_v37 = vadd.f32 %v13128_v25, %v9304_v41 }
 0x41d   : > { %v9212_v8 = vpop.f32.mrb[237].mxu1 }
 0x41e   : > { %v9213_v10 = vadd.f32 %v9212_v8, %v9211_v16  ;;  %v9214_v39 = vpop.f32.mrb[238].mxu1  ;;  %v9305_v42 = vpop.f32.mrb[252].mxu0 }
 0x41f   : > { %v9215_v59 = vpop.f32.mrb[239].mxu1  ;;  %v9306_v1 = vpop.f32.mrb[253].mxu0 }
 0x420   : > { %v13213_v33 = vadd.f32 %v9213_v10, %v13111_v60  ;;  %v9216_v28 = vadd.f32 %v9215_v59, %v9214_v39  ;;  %v9307_v32 = vadd.f32 %v9306_v1, %v9305_v42  ;;  %v9308_v45 = vpop.f32.mrb[254].mxu0 }
 0x421   : > { %v9309_v21 = vpop.f32.mrb[255].mxu0 }
 0x422   : > { %v13216_v22 = vadd.f32 %v9216_v28, %v13117_v17  ;;  %v9310_v12 = vadd.f32 %v9309_v21, %v9308_v45  ;;  %v13219_v25 = vadd.f32 %v13133_v62, %v9307_v32 }
 0x424   : > { %v9217_v44 = vpop.f32.mrb[240].mxu1  ;;  %v13222_v18 = vadd.f32 %v13138_v11, %v9310_v12 }
 0x425   : > { %v9218_v9 = vpop.f32.mrb[241].mxu1 }
 0x426   : > { %v9219_v54 = vadd.f32 %v9218_v9, %v9217_v44  ;;  %v9220_v20 = vpop.f32.mrb[242].mxu1  ;;  %v9311_v60 = vpop.f32.mrb[0].mxu0 }
 0x427   : > { %v9221_v5 = vpop.f32.mrb[243].mxu1  ;;  %v9312_v43 = vpop.f32.mrb[1].mxu0 }
 0x428   : > { %v13225_v56 = vadd.f32 %v9219_v54, %v13125_v46  ;;  %v9222_v31 = vadd.f32 %v9221_v5, %v9220_v20  ;;  %v9313_v17 = vadd.f32 %v9312_v43, %v9311_v60  ;;  %v9314_v13 = vpop.f32.mrb[2].mxu0 }
 0x429   : > { %v9315_v50 = vpop.f32.mrb[3].mxu0 }
 0x42a   : > { %v13228_v62 = vadd.f32 %v9222_v31, %v13130_v61  ;;  %v9316_v53 = vadd.f32 %v9315_v50, %v9314_v13  ;;  %v13231_v11 = vadd.f32 %v13143_v34, %v9313_v17 }
 0x42c   : > { %v9223_v24 = vpop.f32.mrb[244].mxu1  ;;  %v13234_v4 = vadd.f32 %v13148_v52, %v9316_v53 }
 0x42d   : > { %v9224_v23 = vpop.f32.mrb[245].mxu1 }
 0x42e   : > { %v9225_v51 = vadd.f32 %v9224_v23, %v9223_v24  ;;  %v9226_v41 = vpop.f32.mrb[246].mxu1  ;;  %v9317_v46 = vpop.f32.mrb[4].mxu0 }
 0x42f   : > { %v9227_v16 = vpop.f32.mrb[247].mxu1  ;;  %v9318_v8 = vpop.f32.mrb[5].mxu0 }
 0x430   : > { %v13237_v10 = vadd.f32 %v9225_v51, %v13135_v55  ;;  %v9228_v39 = vadd.f32 %v9227_v16, %v9226_v41  ;;  %v9319_v61 = vadd.f32 %v9318_v8, %v9317_v46  ;;  %v9320_v42 = vpop.f32.mrb[6].mxu0 }
 0x431   : > { %v9321_v59 = vpop.f32.mrb[7].mxu0 }
 0x432   : > { %v13240_v34 = vadd.f32 %v9228_v39, %v13140_v3  ;;  %v9322_v1 = vadd.f32 %v9321_v59, %v9320_v42  ;;  %v13243_v52 = vadd.f32 %v13153_v2, %v9319_v61 }
 0x434   : > { %v9229_v28 = vpop.f32.mrb[248].mxu1  ;;  %v13246_v32 = vadd.f32 %v13156_v35, %v9322_v1 }
 0x435   : > { %v9230_v45 = vpop.f32.mrb[249].mxu1 }
 0x436   : > { %v9231_v21 = vadd.f32 %v9230_v45, %v9229_v28  ;;  %v9232_v12 = vpop.f32.mrb[250].mxu1  ;;  %v9323_v55 = vpop.f32.mrb[8].mxu0 }
 0x437   : > { %v9233_v44 = vpop.f32.mrb[251].mxu1  ;;  %v9324_v9 = vpop.f32.mrb[9].mxu0 }
 0x438   : > { %v13249_v54 = vadd.f32 %v9231_v21, %v13145_v26  ;;  %v9234_v20 = vadd.f32 %v9233_v44, %v9232_v12  ;;  %v9325_v3 = vadd.f32 %v9324_v9, %v9323_v55  ;;  %v9326_v60 = vpop.f32.mrb[10].mxu0 }
 0x439   : > { %v9327_v5 = vpop.f32.mrb[11].mxu0 }
 0x43a   : > { %v9817_v2 = vadd.f32 %v9234_v20, %v13150_v27  ;;  %v9328_v43 = vadd.f32 %v9327_v5, %v9326_v60  ;;  %v13253_v31 = vadd.f32 %v13165_v63, %v9325_v3 }
 0x43c   : > { %v13256_v35 = vadd.f32 %v13168_v15, %v9328_v43 }
 0x43e   : > { %v9329_v17 = vpop.f32.mrb[12].mxu0 }
 0x43f   : > { %v9330_v13 = vpop.f32.mrb[13].mxu0 }
 0x440   : > { %v9331_v50 = vadd.f32 %v9330_v13, %v9329_v17  ;;  %v9332_v53 = vpop.f32.mrb[14].mxu0 }
 0x441   : > { %v9333_v24 = vpop.f32.mrb[15].mxu0 }
 0x442   : > { %v9334_v26 = vadd.f32 %v9333_v24, %v9332_v53  ;;  %v13259_v23 = vadd.f32 %v13177_v40, %v9331_v50 }
 0x444   : > { %v13262_v51 = vadd.f32 %v13180_v58, %v9334_v26 }
 0x446   : > { %v9335_v27 = vpop.f32.mrb[16].mxu0 }
 0x447   : > { %v9336_v41 = vpop.f32.mrb[17].mxu0 }
 0x448   : > { %v9337_v46 = vadd.f32 %v9336_v41, %v9335_v27  ;;  %v9338_v63 = vpop.f32.mrb[18].mxu0 }
 0x449   : > { %v9339_v16 = vpop.f32.mrb[19].mxu0 }
 0x44a   : > { %v9340_v8 = vadd.f32 %v9339_v16, %v9338_v63  ;;  %v13265_v15 = vadd.f32 %v13189_v29, %v9337_v46 }
 0x44c   : > { %v13268_v39 = vadd.f32 %v13192_v7, %v9340_v8 }
 0x44e   : > { %v9341_v61 = vpop.f32.mrb[20].mxu0 }
 0x44f   : > { %v9342_v42 = vpop.f32.mrb[21].mxu0 }
 0x450   : > { %v9343_v59 = vadd.f32 %v9342_v42, %v9341_v61  ;;  %v9344_v40 = vpop.f32.mrb[22].mxu0 }
 0x451   : > { %v9345_v1 = vpop.f32.mrb[23].mxu0 }
 0x452   : > { %v9346_v28 = vadd.f32 %v9345_v1, %v9344_v40  ;;  %v13271_v58 = vadd.f32 %v13201_v0, %v9343_v59  ;;  %v13308_v1 = vld [vmem:[%s13436_s6] ss:$0 sm:$0xff] }
 0x454   : > { %v13274_v45 = vadd.f32 %v13204_v48, %v9346_v28 }
 0x456   : > { %v9347_v21 = vpop.f32.mrb[24].mxu0 }
 0x457   : > { %v9348_v12 = vpop.f32.mrb[25].mxu0 }
 0x458   : > { %v9349_v55 = vadd.f32 %v9348_v12, %v9347_v21  ;;  %v9350_v29 = vpop.f32.mrb[26].mxu0 }
 0x459   : > { %v9351_v44 = vpop.f32.mrb[27].mxu0 }
 0x45a   : > { %v9352_v9 = vadd.f32 %v9351_v44, %v9350_v29  ;;  %v13277_v7 = vadd.f32 %v13213_v33, %v9349_v55 }
 0x45c   : > { %v13280_v20 = vadd.f32 %v13216_v22, %v9352_v9 }
 0x45e   : > { %v9353_v3 = vpop.f32.mrb[28].mxu0 }
 0x45f   : > { %v9354_v60 = vpop.f32.mrb[29].mxu0 }
 0x460   : > { %v9355_v5 = vadd.f32 %v9354_v60, %v9353_v3  ;;  %v9356_v0 = vpop.f32.mrb[30].mxu0 }
 0x461   : > { %v9357_v43 = vpop.f32.mrb[31].mxu0 }
 0x462   : > { %v9358_v17 = vadd.f32 %v9357_v43, %v9356_v0  ;;  %v13283_v48 = vadd.f32 %v13225_v56, %v9355_v5 }
 0x464   : > { %v13286_v13 = vadd.f32 %v13228_v62, %v9358_v17 }
 0x466   : > { %v9359_v50 = vpop.f32.mrb[32].mxu0 }
 0x467   : > { %v9360_v53 = vpop.f32.mrb[33].mxu0 }
 0x468   : > { %v9361_v24 = vadd.f32 %v9360_v53, %v9359_v50  ;;  %v9362_v33 = vpop.f32.mrb[34].mxu0 }
 0x469   : > { %v9363_v26 = vpop.f32.mrb[35].mxu0 }
 0x46a   : > { %v9364_v27 = vadd.f32 %v9363_v26, %v9362_v33  ;;  %v13289_v22 = vadd.f32 %v13237_v10, %v9361_v24  ;;  %v13302_v10 = vld [vmem:[%s13435_s5] ss:$0 sm:$0xff] }
 0x46c   : > { %v13292_v41 = vadd.f32 %v13240_v34, %v9364_v27 }
 0x46e   : > { %v9365_v46 = vpop.f32.mrb[36].mxu0 }
 0x46f   : > { %v9366_v63 = vpop.f32.mrb[37].mxu0 }
 0x470   : > { %v9367_v16 = vadd.f32 %v9366_v63, %v9365_v46  ;;  %v9368_v56 = vpop.f32.mrb[38].mxu0 }
 0x471   : > { %v9369_v8 = vpop.f32.mrb[39].mxu0 }
 0x472   : > { %v9370_v61 = vadd.f32 %v9369_v8, %v9368_v56  ;;  %v13295_v62 = vadd.f32 %v13249_v54, %v9367_v16 }
 0x474   : > { %v13297_v42 = vadd.f32 %v9817_v2, %v9370_v61 }
 0x47c   : > { %v9665_v59 = vpop.f32.mrb[156].mxu1 }
 0x47d   : > { %v9729_v34 = vadd.f32 %v13171_v30, %v9665_v59  ;;  %v7403_v40 = vpop.f32.mrb[157].mxu1 }
 0x47e   : > { %v9732_v28 = vadd.f32 %v13159_v6, %v7403_v40  ;;  %v9666_v54 = vpop.f32.mrb[158].mxu1 }
 0x47f   : > { %v7571_v2 = vmul.f32 %v9729_v34, %v13302_v10  ;;  %v9735_v21 = vadd.f32 %v13174_v57, %v9666_v54  ;;  %v7406_v12 = vpop.f32.mrb[159].mxu1 }
 0x480   : > { %v7569_v55 = vmul.f32 %v9732_v28, %v13302_v10  ;;  %v9738_v29 = vadd.f32 %v13162_v14, %v7406_v12 }
 0x481   : > { %v7610_v30 = vadd.f32 %v13308_v1, %v7571_v2  ;;  %v7572_v44 = vmul.f32 %v9735_v21, %v13302_v10 }
 0x482   : > { %v7608_v9 = vadd.f32 %v13308_v1, %v7569_v55  ;;  %v7570_v3 = vmul.f32 %v9738_v29, %v13302_v10 }
 0x483   : > { %v7611_v6 = vadd.f32 %v13308_v1, %v7572_v44  ;;  %v7642_v57 = vmax.f32 %v7610_v30, 0.0 }
 0x484   : > { %v7609_v60 = vadd.f32 %v13308_v1, %v7570_v3  ;;  %v9669_v5 = vpop.f32.mrb[160].mxu1  ;;  %v7640_v17 = vmax.f32 %v7608_v9, 0.0 }
 0x485   : > { %v7643_v0 = vmax.f32 %v7611_v6, 0.0  ;;  %v9741_v43 = vadd.f32 %v13195_v36, %v9669_v5  ;;  %v7419_v14 = vpop.f32.mrb[161].mxu1 }
 0x486   : > { %v7641_v50 = vmax.f32 %v7609_v60, 0.0  ;;  %v9744_v53 = vadd.f32 %v13183_v38, %v7419_v14  ;;  %v9670_v24 = vpop.f32.mrb[162].mxu1 }
 0x487   : > { %v8822_v33 = vpack.c.bf16 %v7643_v0, %v7642_v57  ;;  %v7575_v26 = vmul.f32 %v9741_v43, %v13302_v10  ;;  %v9747_v27 = vadd.f32 %v13198_v19, %v9670_v24  ;;  %v7422_v46 = vpop.f32.mrb[163].mxu1 }
 0x488   : > { %v8817_v63 = vpack.c.bf16 %v7641_v50, %v7640_v17  ;;  %v7573_v16 = vmul.f32 %v9744_v53, %v13302_v10  ;;  %v9750_v56 = vadd.f32 %v13186_v47, %v7422_v46 }
 0x489   : > { %8894 = vst [vmem:[%s10389_s12 + $0x8] sm:$0xff] %v8822_v33   ;;  %v7614_v36 = vadd.f32 %v13308_v1, %v7575_v26  ;;  %v7576_v8 = vmul.f32 %v9747_v27, %v13302_v10 }
 0x48a   : > { %8818 = vst [vmem:[%s10389_s12] sm:$0xff] %v8817_v63   ;;  %v7612_v38 = vadd.f32 %v13308_v1, %v7573_v16  ;;  %v7574_v61 = vmul.f32 %v9750_v56, %v13302_v10 }
 0x48b   : > { %v7615_v59 = vadd.f32 %v13308_v1, %v7576_v8  ;;  %v7646_v40 = vmax.f32 %v7614_v36, 0.0 }
 0x48c   : > { %v7613_v19 = vadd.f32 %v13308_v1, %v7574_v61  ;;  %v9673_v34 = vpop.f32.mrb[164].mxu1  ;;  %v7644_v2 = vmax.f32 %v7612_v38, 0.0 }
 0x48d   : > { %v7647_v28 = vmax.f32 %v7615_v59, 0.0  ;;  %v9753_v47 = vadd.f32 %v13219_v25, %v9673_v34  ;;  %v7435_v54 = vpop.f32.mrb[165].mxu1 }
 0x48e   : > { %v7645_v21 = vmax.f32 %v7613_v19, 0.0  ;;  %v9756_v12 = vadd.f32 %v13207_v49, %v7435_v54  ;;  %v9674_v55 = vpop.f32.mrb[166].mxu1 }
 0x48f   : > { %v8832_v29 = vpack.c.bf16 %v7647_v28, %v7646_v40  ;;  %v7579_v30 = vmul.f32 %v9753_v47, %v13302_v10  ;;  %v9759_v44 = vadd.f32 %v13222_v18, %v9674_v55  ;;  %v7438_v9 = vpop.f32.mrb[167].mxu1 }
 0x490   : > { %v8827_v3 = vpack.c.bf16 %v7645_v21, %v7644_v2  ;;  %v7577_v6 = vmul.f32 %v9756_v12, %v13302_v10  ;;  %v9762_v60 = vadd.f32 %v13210_v37, %v7438_v9 }
 0x491   : > { %8896 = vst [vmem:[%s10389_s12 + $0x18] sm:$0xff] %v8832_v29   ;;  %v7618_v25 = vadd.f32 %v13308_v1, %v7579_v30  ;;  %v7580_v5 = vmul.f32 %v9759_v44, %v13302_v10 }
 0x492   : > { %8895 = vst [vmem:[%s10389_s12 + $0x10] sm:$0xff] %v8827_v3   ;;  %v7616_v49 = vadd.f32 %v13308_v1, %v7577_v6  ;;  %v7578_v57 = vmul.f32 %v9762_v60, %v13302_v10 }
 0x493   : > { %v7619_v0 = vadd.f32 %v13308_v1, %v7580_v5  ;;  %v7650_v14 = vmax.f32 %v7618_v25, 0.0 }
 0x494   : > { %v7617_v18 = vadd.f32 %v13308_v1, %v7578_v57  ;;  %v9677_v43 = vpop.f32.mrb[168].mxu1  ;;  %v7648_v53 = vmax.f32 %v7616_v49, 0.0 }
 0x495   : > { %v7651_v17 = vmax.f32 %v7619_v0, 0.0  ;;  %v9765_v37 = vadd.f32 %v13243_v52, %v9677_v43  ;;  %v7451_v50 = vpop.f32.mrb[169].mxu1 }
 0x496   : > { %v7649_v24 = vmax.f32 %v7617_v18, 0.0  ;;  %v9768_v33 = vadd.f32 %v13231_v11, %v7451_v50  ;;  %v9678_v26 = vpop.f32.mrb[170].mxu1 }
 0x497   : > { %v8842_v27 = vpack.c.bf16 %v7651_v17, %v7650_v14  ;;  %v7583_v46 = vmul.f32 %v9765_v37, %v13302_v10  ;;  %v9771_v63 = vadd.f32 %v13246_v32, %v9678_v26  ;;  %v7454_v16 = vpop.f32.mrb[171].mxu1 }
 0x498   : > { %v8837_v56 = vpack.c.bf16 %v7649_v24, %v7648_v53  ;;  %v7581_v36 = vmul.f32 %v9768_v33, %v13302_v10  ;;  %v9774_v8 = vadd.f32 %v13234_v4, %v7454_v16 }
 0x499   : > { %8898 = vst [vmem:[%s10389_s12 + $0x28] sm:$0xff] %v8842_v27   ;;  %v7622_v52 = vadd.f32 %v13308_v1, %v7583_v46  ;;  %v7584_v38 = vmul.f32 %v9771_v63, %v13302_v10 }
 0x49a   : > { %8897 = vst [vmem:[%s10389_s12 + $0x20] sm:$0xff] %v8837_v56   ;;  %v7620_v11 = vadd.f32 %v13308_v1, %v7581_v36  ;;  %v7582_v61 = vmul.f32 %v9774_v8, %v13302_v10 }
 0x49b   : > { %v7623_v59 = vadd.f32 %v13308_v1, %v7584_v38  ;;  %v7654_v34 = vmax.f32 %v7622_v52, 0.0 }
 0x49c   : > { %v7621_v32 = vadd.f32 %v13308_v1, %v7582_v61  ;;  %v9681_v19 = vpop.f32.mrb[172].mxu1  ;;  %v7652_v47 = vmax.f32 %v7620_v11, 0.0 }
 0x49d   : > { %v7655_v40 = vmax.f32 %v7623_v59, 0.0  ;;  %v9777_v4 = vadd.f32 %v13259_v23, %v9681_v19  ;;  %v7467_v28 = vpop.f32.mrb[173].mxu1 }
 0x49e   : > { %v7653_v54 = vmax.f32 %v7621_v32, 0.0  ;;  %v9780_v2 = vadd.f32 %v13253_v31, %v7467_v28  ;;  %v9682_v21 = vpop.f32.mrb[174].mxu1 }
 0x49f   : > { %v8852_v12 = vpack.c.bf16 %v7655_v40, %v7654_v34  ;;  %v7587_v55 = vmul.f32 %v9777_v4, %v13302_v10  ;;  %v9783_v29 = vadd.f32 %v13262_v51, %v9682_v21  ;;  %v7470_v30 = vpop.f32.mrb[175].mxu1 }
 0x4a0   : > { %v8847_v44 = vpack.c.bf16 %v7653_v54, %v7652_v47  ;;  %v7585_v9 = vmul.f32 %v9780_v2, %v13302_v10  ;;  %v9786_v3 = vadd.f32 %v13256_v35, %v7470_v30 }
 0x4a1   : > { %8900 = vst [vmem:[%s10389_s12 + $0x38] sm:$0xff] %v8852_v12   ;;  %v7626_v23 = vadd.f32 %v13308_v1, %v7587_v55  ;;  %v7588_v6 = vmul.f32 %v9783_v29, %v13302_v10 }
 0x4a2   : > { %8899 = vst [vmem:[%s10389_s12 + $0x30] sm:$0xff] %v8847_v44   ;;  %v7624_v31 = vadd.f32 %v13308_v1, %v7585_v9  ;;  %v7586_v60 = vmul.f32 %v9786_v3, %v13302_v10 }
 0x4a3   : > { %v7627_v25 = vadd.f32 %v13308_v1, %v7588_v6  ;;  %v7658_v49 = vmax.f32 %v7626_v23, 0.0 }
 0x4a4   : > { %v7625_v51 = vadd.f32 %v13308_v1, %v7586_v60  ;;  %v9685_v5 = vpop.f32.mrb[176].mxu1  ;;  %v7656_v18 = vmax.f32 %v7624_v31, 0.0 }
 0x4a5   : > { %v7659_v57 = vmax.f32 %v7627_v25, 0.0  ;;  %v9789_v35 = vadd.f32 %v13271_v58, %v9685_v5  ;;  %v7483_v0 = vpop.f32.mrb[177].mxu1 }
 0x4a6   : > { %v7657_v43 = vmax.f32 %v7625_v51, 0.0  ;;  %v9792_v14 = vadd.f32 %v13265_v15, %v7483_v0  ;;  %v9686_v17 = vpop.f32.mrb[178].mxu1 }
 0x4a7   : > { %v8862_v37 = vpack.c.bf16 %v7659_v57, %v7658_v49  ;;  %v7591_v50 = vmul.f32 %v9789_v35, %v13302_v10  ;;  %v9795_v53 = vadd.f32 %v13274_v45, %v9686_v17  ;;  %v7486_v24 = vpop.f32.mrb[179].mxu1 }
 0x4a8   : > { %v8857_v33 = vpack.c.bf16 %v7657_v43, %v7656_v18  ;;  %v7589_v26 = vmul.f32 %v9792_v14, %v13302_v10  ;;  %v9798_v27 = vadd.f32 %v13268_v39, %v7486_v24 }
 0x4a9   : > { %8902 = vst [vmem:[%s10389_s12 + $0x48] sm:$0xff] %v8862_v37   ;;  %v7630_v58 = vadd.f32 %v13308_v1, %v7591_v50  ;;  %v7592_v46 = vmul.f32 %v9795_v53, %v13302_v10 }
 0x4aa   : > { %8901 = vst [vmem:[%s10389_s12 + $0x40] sm:$0xff] %v8857_v33   ;;  %v7628_v15 = vadd.f32 %v13308_v1, %v7589_v26  ;;  %v7590_v63 = vmul.f32 %v9798_v27, %v13302_v10 }
 0x4ab   : > { %v7631_v16 = vadd.f32 %v13308_v1, %v7592_v46  ;;  %v7662_v36 = vmax.f32 %v7630_v58, 0.0 }
 0x4ac   : > { %v7629_v45 = vadd.f32 %v13308_v1, %v7590_v63  ;;  %v9689_v56 = vpop.f32.mrb[180].mxu1  ;;  %v7660_v38 = vmax.f32 %v7628_v15, 0.0 }
 0x4ad   : > { %v7663_v8 = vmax.f32 %v7631_v16, 0.0  ;;  %v9801_v39 = vadd.f32 %v13283_v48, %v9689_v56  ;;  %v7499_v52 = vpop.f32.mrb[181].mxu1 }
 0x4ae   : > { %v7661_v11 = vmax.f32 %v7629_v45, 0.0  ;;  %v9804_v61 = vadd.f32 %v13277_v7, %v7499_v52  ;;  %v9690_v59 = vpop.f32.mrb[182].mxu1 }
 0x4af   : > { %v8872_v32 = vpack.c.bf16 %v7663_v8, %v7662_v36  ;;  %v7595_v19 = vmul.f32 %v9801_v39, %v13302_v10  ;;  %v9807_v34 = vadd.f32 %v13286_v13, %v9690_v59  ;;  %v7502_v40 = vpop.f32.mrb[183].mxu1 }
 0x4b0   : > { %v8867_v4 = vpack.c.bf16 %v7661_v11, %v7660_v38  ;;  %v7593_v28 = vmul.f32 %v9804_v61, %v13302_v10  ;;  %v9810_v47 = vadd.f32 %v13280_v20, %v7502_v40 }
 0x4b1   : > { %8904 = vst [vmem:[%s10389_s12 + $0x58] sm:$0xff] %v8872_v32   ;;  %v7634_v48 = vadd.f32 %v13308_v1, %v7595_v19  ;;  %v7596_v54 = vmul.f32 %v9807_v34, %v13302_v10 }
 0x4b2   : > { %8903 = vst [vmem:[%s10389_s12 + $0x50] sm:$0xff] %v8867_v4   ;;  %v7632_v7 = vadd.f32 %v13308_v1, %v7593_v28  ;;  %v7594_v2 = vmul.f32 %v9810_v47, %v13302_v10 }
 0x4b3   : > { %v7635_v21 = vadd.f32 %v13308_v1, %v7596_v54  ;;  %v7666_v55 = vmax.f32 %v7634_v48, 0.0 }
 0x4b4   : > { %v7633_v13 = vadd.f32 %v13308_v1, %v7594_v2  ;;  %v9693_v12 = vpop.f32.mrb[184].mxu1  ;;  %v7664_v44 = vmax.f32 %v7632_v7, 0.0 }
 0x4b5   : > { %v7667_v29 = vmax.f32 %v7635_v21, 0.0  ;;  %v9813_v20 = vadd.f32 %v13295_v62, %v9693_v12  ;;  %v7515_v30 = vpop.f32.mrb[185].mxu1 }
 0x4b6   : > { %v7665_v9 = vmax.f32 %v7633_v13, 0.0  ;;  %v9816_v3 = vadd.f32 %v13289_v22, %v7515_v30  ;;  %v9694_v23 = vpop.f32.mrb[186].mxu1 }
 0x4b7   : > { %v8882_v6 = vpack.c.bf16 %v7667_v29, %v7666_v55  ;;  %v7599_v31 = vmul.f32 %v9813_v20, %v13302_v10  ;;  %v9819_v60 = vadd.f32 %v13297_v42, %v9694_v23  ;;  %v7518_v25 = vpop.f32.mrb[187].mxu1 }
 0x4b8   : > { %v8877_v51 = vpack.c.bf16 %v7665_v9, %v7664_v44  ;;  %v7597_v5 = vmul.f32 %v9816_v3, %v13302_v10  ;;  %v9822_v49 = vadd.f32 %v13292_v41, %v7518_v25 }
 0x4b9   : > { %8906 = vst [vmem:[%s10389_s12 + $0x68] sm:$0xff] %v8882_v6   ;;  %v7638_v62 = vadd.f32 %v13308_v1, %v7599_v31  ;;  %v7600_v57 = vmul.f32 %v9819_v60, %v13302_v10 }
 0x4ba   : > { %8905 = vst [vmem:[%s10389_s12 + $0x60] sm:$0xff] %v8877_v51   ;;  %v7636_v22 = vadd.f32 %v13308_v1, %v7597_v5  ;;  %v7598_v35 = vmul.f32 %v9822_v49, %v13302_v10 }
 0x4bb   : > { %v7639_v42 = vadd.f32 %v13308_v1, %v7600_v57  ;;  %v7670_v18 = vmax.f32 %v7638_v62, 0.0 }
 0x4bc   : > { %v7637_v0 = vadd.f32 %v13308_v1, %v7598_v35  ;;  %v7668_v14 = vmax.f32 %v7636_v22, 0.0 }
 0x4bd   : > { %v7671_v43 = vmax.f32 %v7639_v42, 0.0 }
 0x4be   : > { %v7669_v17 = vmax.f32 %v7637_v0, 0.0 }
 0x4bf   : > { %v8892_v41 = vpack.c.bf16 %v7671_v43, %v7670_v18 }
 0x4c0   : > { %v8887_v37 = vpack.c.bf16 %v7669_v17, %v7668_v14 }
 0x4c1   : > { %8908 = vst [vmem:[%s10389_s12 + $0x78] sm:$0xff] %v8892_v41  }
 0x4c2   : > { %8907 = vst [vmem:[%s10389_s12 + $0x70] sm:$0xff] %v8887_v37  }
 0x4c3 PF: > { %s17_s26 = sadd.s32 1, %s10317_s26   ;;  %s13553_s24 = smov %s10313_s25 }
 0x4c4   : > { %p14_p5 = scmp.ge.s32.totalorder %s17_s26, 4   ;;  %s13554_s25 = smov %s13556_s27 }
 0x4c6   :  { %16 = sbr.rel (!%p14_p5) target bundleno = 2 (0x2), region = 183 }
 0x4cd   :  { %7864 = vsyncmov [#allocation4] }
 0x4d0   :  { %s7865_s8 = vpop.sfrf %7864 }
 0x4d1   :  { %p8742_p6 = scmp.ne.s32.totalorder %s7865_s8, 0 }
 0x4d3   :  { %7869 = shalt.err (%p8742_p6)  }
 0x4d4   :  { %7871 = vsyncmov [#allocation4 + $0x1] }
 0x4d7   :  { %s7872_s9 = vpop.sfrf %7871 }
 0x4d8   :  { %p8743_p7 = scmp.ne.s32.totalorder %s7872_s9, 0 }
 0x4da   :  { %7876 = shalt.err (%p8743_p7)  }

</bundles_post_ra>
